<compile_context>
chip_gen: v7x
topology: tpu7x:2x2x1
jax: 0.10.0
libtpu: 0.0.40
codegen_flags: <defaults>
</compile_context>

<pallas_src>
import jax
import jax.numpy as jnp
from jax import lax
from jax.experimental import pallas as pl
from jax.experimental.pallas import tpu as pltpu


WEIGHT_ORDER = ("WdhT", "bdh", "wdx", "bdx",
                "WcombgT", "WcombmT", "bcomb",
                "WhT", "bhist", "WfeatT", "bfeat",
                "WihxT", "WihmT", "blstm",
                "WoutT", "bout")
BF16_KEYS = ("WhT", "WfeatT", "WihxT")   # per-step MXU weights


# ----------------------------------------------------------------------------
# Pallas kernel: both RITS directions, whole recurrence, one invocation.
# ----------------------------------------------------------------------------
def brits_kernel(
    x_ref, m_ref, mw_ref,                       # (2, L, B, K) per-step data
    d2_ref, m2_ref,                             # (2, L*B, K) time-major slabs (Stage 1)
    WdhT_ref, bdh_ref,                          # temp_decay_h: (2,K,H), (2,1,H)
    wdx_ref, bdx_ref,                           # temp_decay_x diag: (2,1,K), (2,1,K)
    WcombgT_ref, WcombmT_ref, bcomb_ref,        # weight_combine split: (2,K,K) x2, (2,1,K)
    WhT_ref, bhist_ref,                         # fused [WhhT|WhistT]: (2,H,4H+K) bf16, (2,1,K)
    WfeatT_ref, bfeat_ref,                      # feat_reg (zero diag): (2,K,K) bf16, (2,1,K)
    WihxT_ref, WihmT_ref, blstm_ref,            # LSTMCell: (2,K,4H) bf16, (2,K,4H), (2,1,4H)
    WoutT_ref, bout_ref,                        # out head: (2,H,1), (2,1,1)
    imp_ref, pred_ref, loss_ref,                # outputs: (B, 2*L*K), (B, 2), (1, 2)
):
    ndir, L, B, K = x_ref.shape
    H = WdhT_ref.shape[2]
    G4 = 4 * H
    f32 = jnp.float32
    bf16 = jnp.bfloat16

    # ---- Stage 1 (per direction): batch all non-recurrent math over the whole
    # sequence, then split into per-step pieces.  None of this depends on the
    # recurrence carry, so it sits off the serial critical path.
    dirs = []
    for d in range(ndir):
        d_all = d2_ref[d]                        # (L*B, K)
        m_all = m2_ref[d]                        # (L*B, K)
        gh_all = jnp.exp(-jnp.maximum(
            jnp.dot(d_all, WdhT_ref[d], preferred_element_type=f32)
            + bdh_ref[d], 0.0))                                   # gamma_h, (L*B, H)
        gx_all = jnp.exp(-jnp.maximum(d_all * wdx_ref[d] + bdx_ref[d], 0.0))
        alpha_all = jax.nn.sigmoid(                               # sigmoid (review fix)
            jnp.dot(gx_all, WcombgT_ref[d], preferred_element_type=f32)
            + jnp.dot(m_all, WcombmT_ref[d], preferred_element_type=f32)
            + bcomb_ref[d])                                       # (L*B, K)
        gpre_all = (jnp.dot(m_all, WihmT_ref[d], preferred_element_type=f32)
                    + blstm_ref[d])                               # mask->gates + bias

        dirs.append(dict(
            d=d,
            Wh=WhT_ref[d],                       # bf16 (H, 4H+K)
            Wfeat=WfeatT_ref[d],                 # bf16 (K, K)
            Wihx=WihxT_ref[d],                   # bf16 (K, 4H)
            # Pre-broadcast loop-invariant bias rows (JAX does not CSE
            # broadcast_in_dim across the unrolled iterations).
            bhist=jnp.broadcast_to(bhist_ref[d], (B, K)),
            bfeat=jnp.broadcast_to(bfeat_ref[d], (B, K)),
            gh=[gh_all[t * B:(t + 1) * B, :] for t in range(L)],
            alpha=[alpha_all[t * B:(t + 1) * B, :] for t in range(L)],
            gpre=[gpre_all[t * B:(t + 1) * B, :] for t in range(L)],
        ))

    # ---- One recurrence step for one direction (static t -> full unroll).
    def one_step(P, t, h_prev, c_prev, loss_vec):
        d = P["d"]
        x_t = x_ref[d, t]                        # (B, K) tile-aligned loads
        m_t = m_ref[d, t]
        mw_t = mw_ref[d, t]                      # m_t / (sum(m_t)+1e-5), exact

        h = h_prev * P["gh"][t]                  # temporal decay on hidden state
        hproj = jnp.dot(h.astype(bf16), P["Wh"],
                        preferred_element_type=f32)          # (B, 4H+K)

        x_h = hproj[:, G4:] + P["bhist"]                     # history estimate
        x_c = x_h + m_t * (x_t - x_h)                        # = m*x + (1-m)*x_h
        z_h = (jnp.dot(x_c.astype(bf16), P["Wfeat"],
                       preferred_element_type=f32)
               + P["bfeat"])                                  # feature estimate
        a_t = P["alpha"][t]
        c_h = x_h + a_t * (z_h - x_h)                        # combined estimate

        # Masked L1 loss; normalizer already folded into mw_t (hoisted).
        loss_vec = loss_vec + (jnp.abs(x_t - x_h) + jnp.abs(x_t - z_h)
                               + jnp.abs(x_t - c_h)) * mw_t

        c_c = c_h + m_t * (x_t - c_h)                        # imputed input

        # LSTMCell on [c_c, m]; the m part + both biases were precomputed.
        gates = (jnp.dot(c_c.astype(bf16), P["Wihx"],
                         preferred_element_type=f32)
                 + P["gpre"][t] + hproj[:, :G4])             # (B, 4H)
        # At B=2 the gate block is a single vreg, so full-width sigmoid+tanh is
        # cheaper than per-gate slicing; revisit if B >= 8 (review note).
        sig = jax.nn.sigmoid(gates)
        tnh = jnp.tanh(gates)
        i_g = sig[:, 0:H]
        f_g = sig[:, H:2 * H]
        g_g = tnh[:, 2 * H:3 * H]
        o_g = sig[:, 3 * H:4 * H]
        c_new = f_g * c_prev + i_g * g_g
        h_new = o_g * jnp.tanh(c_new)
        return h_new, c_new, loss_vec, c_c

    # ---- Stage 2: fully unrolled, directions interleaved per time step.
    zero_h = jnp.zeros((B, H), f32)
    zero_l = jnp.zeros((B, K), f32)
    state = [(zero_h, zero_h, zero_l) for _ in range(ndir)]
    imps = [[] for _ in range(ndir)]
    for t in range(L):
        for d in range(ndir):
            h, c, lv = state[d]
            h, c, lv, c_c = one_step(dirs[d], t, h, c, lv)
            state[d] = (h, c, lv)
            imps[d].append(c_c)

    # ---- Stage 3: single lane-dense stores after the recurrence.
    # imp layout along lanes: [dir0 t0..tL-1 | dir1 t0..tL-1], each piece K wide.
    imp_ref[...] = jnp.concatenate(imps[0] + imps[1], axis=1).astype(imp_ref.dtype)

    preds = []
    losses = []
    for d in range(ndir):
        h_fin, _c_fin, lv = state[d]
        preds.append(jnp.dot(h_fin, WoutT_ref[d], preferred_element_type=f32)
                     + bout_ref[d])                          # (B, 1)
        losses.append(jnp.sum(lv, keepdims=True))            # (1, 1)
    pred_ref[...] = jnp.concatenate(preds, axis=1).astype(pred_ref.dtype)
    loss_ref[...] = jnp.concatenate(losses, axis=1).astype(loss_ref.dtype)


def brits_pallas(x_stk, m_stk, mw_stk, d2_stk, m2_stk, params_stk):
    """Single gridless pallas_call running both RITS directions interleaved.

    x_stk/m_stk/mw_stk: (2, L, B, K); d2_stk/m2_stk: (2, L*B, K).
    Returns (imputations (B, 2*L*K), predictions (B, 2), losses (1, 2)).
    """
    ndir, L, B, K = x_stk.shape
    weights = [params_stk[k] for k in WEIGHT_ORDER]
    args = [x_stk, m_stk, mw_stk, d2_stk, m2_stk] + weights

    vmem_spec = pl.BlockSpec(memory_space=pltpu.MemorySpace.VMEM)
    out_shape = (
        jax.ShapeDtypeStruct((B, ndir * L * K), jnp.float32),   # imputations (lane-dense)
        jax.ShapeDtypeStruct((B, ndir), jnp.float32),           # predictions
        jax.ShapeDtypeStruct((1, ndir), jnp.float32),           # per-direction x_loss
    )
    return pl.pallas_call(
        brits_kernel,
        out_shape=out_shape,
        in_specs=[vmem_spec] * len(args),
        out_specs=(vmem_spec, vmem_spec, vmem_spec),
    )(*args)


# ----------------------------------------------------------------------------
# Parameter initialization (deterministic, PyTorch-default-style uniform).
# ----------------------------------------------------------------------------
def init_rits_params(key, K, H):
    keys = jax.random.split(key, 16)

    def uni(k, shape, fan_in):
        bound = 1.0 / float(fan_in) ** 0.5
        return jax.random.uniform(k, shape, jnp.float32, -bound, bound)

    Wdh = uni(keys[0], (H, K), K);  bdh = uni(keys[1], (H,), K)           # TemporalDecay(K->H)
    Wdx = uni(keys[2], (K, K), K);  bdx = uni(keys[3], (K,), K)           # TemporalDecay(K->K, diag)
    Whist = uni(keys[4], (K, H), H); bhist = uni(keys[5], (K,), H)        # Linear(H->K)
    Wfeat = uni(keys[6], (K, K), K); bfeat = uni(keys[7], (K,), K)        # FeatureRegression(K)
    Wfeat = Wfeat * (1.0 - jnp.eye(K, dtype=jnp.float32))                 # zero diagonal
    Wcomb = uni(keys[8], (K, 2 * K), 2 * K); bcomb = uni(keys[9], (K,), 2 * K)  # Linear(2K->K)
    Wih = uni(keys[10], (4 * H, 2 * K), H); Whh = uni(keys[11], (4 * H, H), H)  # LSTMCell(2K,H)
    bih = uni(keys[12], (4 * H,), H); bhh = uni(keys[13], (4 * H,), H)
    Wout = uni(keys[14], (1, H), H); bout = uni(keys[15], (1,), H)        # Linear(H->1)

    return {
        "WdhT": Wdh.T, "bdh": bdh[None, :],
        "wdx": jnp.diag(Wdx)[None, :], "bdx": bdx[None, :],
        "WcombgT": Wcomb[:, :K].T, "WcombmT": Wcomb[:, K:].T, "bcomb": bcomb[None, :],
        # Fused h-side weight: [hidden->gates | hist_reg]; gates occupy lanes
        # [0, 4H) so the split is vreg-aligned when H is a multiple of 32.
        "WhT": jnp.concatenate([Whh.T, Whist.T], axis=1),
        "bhist": bhist[None, :],
        "WfeatT": Wfeat.T, "bfeat": bfeat[None, :],
        "WihxT": Wih[:, :K].T, "WihmT": Wih[:, K:].T,
        "blstm": (bih + bhh)[None, :],
        "WoutT": Wout.T, "bout": bout[None, :],
    }


# ----------------------------------------------------------------------------
# JAX glue reproducing brits.forward / reverse_input / merge_ret.
# ----------------------------------------------------------------------------
def compute_deltas(time_stamp, mask):
    """Canonical BRITS mask-dependent delta accumulation (per feature):
       d[0]=0; d[t] = |s_t - s_{t-1}| + (1 - m[t-1]) * d[t-1]."""
    B, L = time_stamp.shape
    K = mask.shape[-1]
    gap = jnp.abs(time_stamp[:, 1:] - time_stamp[:, :-1]).astype(jnp.float32)
    gap = jnp.concatenate([jnp.zeros((B, 1), jnp.float32), gap], axis=1)      # (B, L)
    m_prev = jnp.concatenate(
        [jnp.ones((B, 1, K), jnp.float32), mask[:, :-1, :].astype(jnp.float32)], axis=1)

    def body(carry, inp):
        g_t, mp_t = inp                                   # (B,), (B, K)
        d_t = g_t[:, None] + (1.0 - mp_t) * carry
        return d_t, d_t

    _, deltas = lax.scan(body, jnp.zeros((B, K), jnp.float32),
                         (gap.T, jnp.transpose(m_prev, (1, 0, 2))))
    return jnp.transpose(deltas, (1, 0, 2))               # (B, L, K)


def reverse_input(x, mask, record_num, time_stamp):
    # Per-batch flip of the first `record_num[i]` steps (vectorized gather
    # replaces the Python loop in the PyTorch module).
    B, L, K = x.shape
    idx = jnp.arange(L)[None, :]
    n = record_num[:, None]
    src = jnp.clip(n - 1 - idx, 0, L - 1)
    valid = (idx < n).astype(x.dtype)
    x_r = jnp.take_along_axis(x, src[:, :, None], axis=1) * valid[:, :, None]
    mask_r = jnp.take_along_axis(mask, src[:, :, None], axis=1) * valid[:, :, None]
    ts_r = jnp.take_along_axis(time_stamp, src, axis=1) * valid
    return x_r, mask_r, record_num, ts_r


def unreverse_imputations(imp_rev, record_num):
    """Map backward-direction imputations back to forward time order."""
    B, L, K = imp_rev.shape
    idx = jnp.arange(L)[None, :]
    n = record_num[:, None]
    src = jnp.clip(n - 1 - idx, 0, L - 1)
    valid = (idx < n).astype(imp_rev.dtype)
    return jnp.take_along_axis(imp_rev, src[:, :, None], axis=1) * valid[:, :, None]


def brits_forward(params_f, params_b, x, mask, record_num, time_stamp):
    B, L, K = x.shape
    valid = (jnp.arange(L)[None, :] < record_num[:, None]).astype(x.dtype)    # (B, L)
    valid3 = valid[:, :, None]

    def prep(x_, m_raw, ts_):
        # Steps beyond record_num contribute no loss (mask forced to 0 there).
        m_eff = m_raw * valid3
        d_ = compute_deltas(ts_, m_eff)
        # Exact per-step loss normalizer folded into a loss-weight slab.
        msum = jnp.sum(m_eff, axis=(0, 2))                                    # (L,)
        mw = m_eff / (msum[None, :, None] + 1e-5)
        tmaj = lambda a: jnp.transpose(a, (1, 0, 2))                          # (L, B, K)
        flat = lambda a: jnp.transpose(a, (1, 0, 2)).reshape(L * B, K)        # (L*B, K)
        return tmaj(x_), tmaj(m_eff), tmaj(mw), flat(d_), flat(m_eff)

    xf3, mf3, mwf3, df2, mf2 = prep(x, mask, time_stamp)
    x_r, m_r, _, ts_r = reverse_input(x, mask, record_num, time_stamp)
    xb3, mb3, mwb3, db2, mb2 = prep(x_r, m_r, ts_r)

    x_stk = jnp.stack([xf3, xb3])
    m_stk = jnp.stack([mf3, mb3])
    mw_stk = jnp.stack([mwf3, mwb3])
    d2_stk = jnp.stack([df2, db2])
    m2_stk = jnp.stack([mf2, mb2])

    params_stk = {}
    for k in WEIGHT_ORDER:
        w = jnp.stack([params_f[k], params_b[k]])
        if k in BF16_KEYS:
            w = w.astype(jnp.bfloat16)       # per-step MXU weights -> bf16, f32 acc
        params_stk[k] = w

    imp_pack, pred_pack, loss_pack = brits_pallas(
        x_stk, m_stk, mw_stk, d2_stk, m2_stk, params_stk)

    imp = imp_pack.reshape(B, 2, L, K)
    # TODO(synk): original `rits` source not provided; padded timesteps
    # (t >= record_num) are zeroed in both directions so the consistency loss
    # is not biased by padding, and the backward imputations are un-reversed
    # to forward time before merging (the spec's reverse_output is never
    # called and references an undefined variable).
    imp_f = imp[:, 0] * valid3
    imp_b = unreverse_imputations(imp[:, 1], record_num)

    loss_f = loss_pack[0, 0]
    loss_b = loss_pack[0, 1]
    pred_f = pred_pack[:, 0:1]
    pred_b = pred_pack[:, 1:2]

    # merge_ret (consistency loss + averaging), as in the module.
    loss_c = jnp.mean(jnp.abs(imp_f - imp_b)) * 0.1
    total_loss = loss_f + loss_b + loss_c
    predictions = (pred_f + pred_b) / 2.0
    imputations = (imp_f + imp_b) / 2.0
    return {"x_loss": total_loss, "predictions": predictions, "imputations": imputations}


# ----------------------------------------------------------------------------
if __name__ == "__main__":
    B, L, K, H = 2, 8, 8, 32
    key = jax.random.PRNGKey(0)
    k1, k2, k3, k4, k5 = jax.random.split(key, 5)

    x = jax.random.normal(k1, (B, L, K), jnp.float32)
    mask = (jax.random.uniform(k2, (B, L, K)) > 0.3).astype(jnp.float32)
    record_num = jnp.array([L, 5], dtype=jnp.int32)
    time_stamp = jnp.cumsum(jax.random.uniform(k3, (B, L), jnp.float32, 0.1, 1.0), axis=1)

    params_f = init_rits_params(k4, K, H)
    params_b = init_rits_params(k5, K, H)

    fwd = jax.jit(lambda a, b, c, d: brits_forward(params_f, params_b, a, b, c, d))
    ret = fwd(x, mask, record_num, time_stamp)
    jax.block_until_ready(ret)

    assert ret["imputations"].shape == (B, L, K)
    assert ret["predictions"].shape == (B, 1)
    assert ret["x_loss"].shape == ()
    assert bool(jnp.all(jnp.isfinite(ret["imputations"])))
    assert bool(jnp.isfinite(ret["x_loss"]))
    print("KERNEL_OK")
</pallas_src>

<mosaic_0001>
module attributes {stable_mosaic.version = 11 : i64} {
  func.func @brits_kernel(%arg0: memref<2x8x2x8xf32, #tpu.memory_space<vmem>>, %arg1: memref<2x8x2x8xf32, #tpu.memory_space<vmem>>, %arg2: memref<2x8x2x8xf32, #tpu.memory_space<vmem>>, %arg3: memref<2x16x8xf32, #tpu.memory_space<vmem>>, %arg4: memref<2x16x8xf32, #tpu.memory_space<vmem>>, %arg5: memref<2x8x32xf32, #tpu.memory_space<vmem>>, %arg6: memref<2x1x32xf32, #tpu.memory_space<vmem>>, %arg7: memref<2x1x8xf32, #tpu.memory_space<vmem>>, %arg8: memref<2x1x8xf32, #tpu.memory_space<vmem>>, %arg9: memref<2x8x8xf32, #tpu.memory_space<vmem>>, %arg10: memref<2x8x8xf32, #tpu.memory_space<vmem>>, %arg11: memref<2x1x8xf32, #tpu.memory_space<vmem>>, %arg12: memref<2x32x136xbf16, #tpu.memory_space<vmem>>, %arg13: memref<2x1x8xf32, #tpu.memory_space<vmem>>, %arg14: memref<2x8x8xbf16, #tpu.memory_space<vmem>>, %arg15: memref<2x1x8xf32, #tpu.memory_space<vmem>>, %arg16: memref<2x8x128xbf16, #tpu.memory_space<vmem>>, %arg17: memref<2x8x128xf32, #tpu.memory_space<vmem>>, %arg18: memref<2x1x128xf32, #tpu.memory_space<vmem>>, %arg19: memref<2x32x1xf32, #tpu.memory_space<vmem>>, %arg20: memref<2x1x1xf32, #tpu.memory_space<vmem>>, %arg21: memref<2x128xf32, #tpu.memory_space<vmem>>, %arg22: memref<2x2xf32, #tpu.memory_space<vmem>>, %arg23: memref<1x2xf32, #tpu.memory_space<vmem>>) attributes {dimension_semantics = [], scalar_prefetch = 0 : i64, scratch_operands = 0 : i64, tpu.core_type = #tpu.core_type<tc>} {
    %c0 = arith.constant 0 : index
    %c0_0 = arith.constant 0 : index
    %c0_1 = arith.constant 0 : index
    %0 = vector.load %arg3[%c0, %c0_0, %c0_1] : memref<2x16x8xf32, #tpu.memory_space<vmem>>, vector<1x16x8xf32>
    %1 = vector.shape_cast %0 : vector<1x16x8xf32> to vector<16x8xf32>
    %c0_2 = arith.constant 0 : index
    %c0_3 = arith.constant 0 : index
    %c0_4 = arith.constant 0 : index
    %2 = vector.load %arg4[%c0_2, %c0_3, %c0_4] : memref<2x16x8xf32, #tpu.memory_space<vmem>>, vector<1x16x8xf32>
    %3 = vector.shape_cast %2 : vector<1x16x8xf32> to vector<16x8xf32>
    %c0_5 = arith.constant 0 : index
    %c0_6 = arith.constant 0 : index
    %c0_7 = arith.constant 0 : index
    %4 = vector.load %arg5[%c0_5, %c0_6, %c0_7] : memref<2x8x32xf32, #tpu.memory_space<vmem>>, vector<1x8x32xf32>
    %5 = vector.shape_cast %4 : vector<1x8x32xf32> to vector<8x32xf32>
    %cst = arith.constant dense<0.000000e+00> : vector<16x32xf32>
    %6 = tpu.matmul %1, %5, %cst {dimension_numbers = #tpu.dot_dimension_numbers<[1], [0], [0], [1], [0, 0, 1, 1], [], []>} : vector<16x8xf32>, vector<8x32xf32>, vector<16x32xf32> -> vector<16x32xf32>
    %c0_8 = arith.constant 0 : index
    %c0_9 = arith.constant 0 : index
    %c0_10 = arith.constant 0 : index
    %7 = vector.load %arg6[%c0_8, %c0_9, %c0_10] : memref<2x1x32xf32, #tpu.memory_space<vmem>>, vector<1x1x32xf32>
    %8 = vector.shape_cast %7 : vector<1x1x32xf32> to vector<1x32xf32>
    %9 = vector.broadcast %8 : vector<1x32xf32> to vector<16x32xf32>
    %10 = arith.addf %6, %9 : vector<16x32xf32>
    %cst_11 = arith.constant 0.000000e+00 : f32
    %11 = vector.broadcast %cst_11 : f32 to vector<16x32xf32>
    %12 = arith.maximumf %10, %11 : vector<16x32xf32>
    %cst_12 = arith.constant 0.000000e+00 : f32
    %13 = vector.broadcast %cst_12 : f32 to vector<16x32xf32>
    %14 = arith.subf %13, %12 : vector<16x32xf32>
    %15 = math.exp %14 : vector<16x32xf32>
    %c0_13 = arith.constant 0 : index
    %c0_14 = arith.constant 0 : index
    %c0_15 = arith.constant 0 : index
    %16 = vector.load %arg7[%c0_13, %c0_14, %c0_15] : memref<2x1x8xf32, #tpu.memory_space<vmem>>, vector<1x1x8xf32>
    %17 = vector.shape_cast %16 : vector<1x1x8xf32> to vector<1x8xf32>
    %18 = vector.broadcast %17 : vector<1x8xf32> to vector<16x8xf32>
    %19 = arith.mulf %1, %18 : vector<16x8xf32>
    %c0_16 = arith.constant 0 : index
    %c0_17 = arith.constant 0 : index
    %c0_18 = arith.constant 0 : index
    %20 = vector.load %arg8[%c0_16, %c0_17, %c0_18] : memref<2x1x8xf32, #tpu.memory_space<vmem>>, vector<1x1x8xf32>
    %21 = vector.shape_cast %20 : vector<1x1x8xf32> to vector<1x8xf32>
    %22 = vector.broadcast %21 : vector<1x8xf32> to vector<16x8xf32>
    %23 = arith.addf %19, %22 : vector<16x8xf32>
    %cst_19 = arith.constant 0.000000e+00 : f32
    %24 = vector.broadcast %cst_19 : f32 to vector<16x8xf32>
    %25 = arith.maximumf %23, %24 : vector<16x8xf32>
    %cst_20 = arith.constant 0.000000e+00 : f32
    %26 = vector.broadcast %cst_20 : f32 to vector<16x8xf32>
    %27 = arith.subf %26, %25 : vector<16x8xf32>
    %28 = math.exp %27 : vector<16x8xf32>
    %c0_21 = arith.constant 0 : index
    %c0_22 = arith.constant 0 : index
    %c0_23 = arith.constant 0 : index
    %29 = vector.load %arg9[%c0_21, %c0_22, %c0_23] : memref<2x8x8xf32, #tpu.memory_space<vmem>>, vector<1x8x8xf32>
    %30 = vector.shape_cast %29 : vector<1x8x8xf32> to vector<8x8xf32>
    %cst_24 = arith.constant dense<0.000000e+00> : vector<16x8xf32>
    %31 = tpu.matmul %28, %30, %cst_24 {dimension_numbers = #tpu.dot_dimension_numbers<[1], [0], [0], [1], [0, 0, 1, 1], [], []>} : vector<16x8xf32>, vector<8x8xf32>, vector<16x8xf32> -> vector<16x8xf32>
    %c0_25 = arith.constant 0 : index
    %c0_26 = arith.constant 0 : index
    %c0_27 = arith.constant 0 : index
    %32 = vector.load %arg10[%c0_25, %c0_26, %c0_27] : memref<2x8x8xf32, #tpu.memory_space<vmem>>, vector<1x8x8xf32>
    %33 = vector.shape_cast %32 : vector<1x8x8xf32> to vector<8x8xf32>
    %cst_28 = arith.constant dense<0.000000e+00> : vector<16x8xf32>
    %34 = tpu.matmul %3, %33, %cst_28 {dimension_numbers = #tpu.dot_dimension_numbers<[1], [0], [0], [1], [0, 0, 1, 1], [], []>} : vector<16x8xf32>, vector<8x8xf32>, vector<16x8xf32> -> vector<16x8xf32>
    %35 = arith.addf %31, %34 : vector<16x8xf32>
    %c0_29 = arith.constant 0 : index
    %c0_30 = arith.constant 0 : index
    %c0_31 = arith.constant 0 : index
    %36 = vector.load %arg11[%c0_29, %c0_30, %c0_31] : memref<2x1x8xf32, #tpu.memory_space<vmem>>, vector<1x1x8xf32>
    %37 = vector.shape_cast %36 : vector<1x1x8xf32> to vector<1x8xf32>
    %38 = vector.broadcast %37 : vector<1x8xf32> to vector<16x8xf32>
    %39 = arith.addf %35, %38 : vector<16x8xf32>
    %40 = arith.negf %39 : vector<16x8xf32>
    %41 = math.exp %40 : vector<16x8xf32>
    %cst_32 = arith.constant 1.000000e+00 : f32
    %42 = vector.broadcast %cst_32 : f32 to vector<16x8xf32>
    %43 = arith.addf %42, %41 : vector<16x8xf32>
    %44 = arith.divf %42, %43 : vector<16x8xf32>
    %c0_33 = arith.constant 0 : index
    %c0_34 = arith.constant 0 : index
    %c0_35 = arith.constant 0 : index
    %45 = vector.load %arg17[%c0_33, %c0_34, %c0_35] : memref<2x8x128xf32, #tpu.memory_space<vmem>>, vector<1x8x128xf32>
    %46 = vector.shape_cast %45 : vector<1x8x128xf32> to vector<8x128xf32>
    %cst_36 = arith.constant dense<0.000000e+00> : vector<16x128xf32>
    %47 = tpu.matmul %3, %46, %cst_36 {dimension_numbers = #tpu.dot_dimension_numbers<[1], [0], [0], [1], [0, 0, 1, 1], [], []>} : vector<16x8xf32>, vector<8x128xf32>, vector<16x128xf32> -> vector<16x128xf32>
    %c0_37 = arith.constant 0 : index
    %c0_38 = arith.constant 0 : index
    %c0_39 = arith.constant 0 : index
    %48 = vector.load %arg18[%c0_37, %c0_38, %c0_39] : memref<2x1x128xf32, #tpu.memory_space<vmem>>, vector<1x1x128xf32>
    %49 = vector.shape_cast %48 : vector<1x1x128xf32> to vector<1x128xf32>
    %50 = vector.broadcast %49 : vector<1x128xf32> to vector<16x128xf32>
    %51 = arith.addf %47, %50 : vector<16x128xf32>
    %c0_40 = arith.constant 0 : index
    %c0_41 = arith.constant 0 : index
    %c0_42 = arith.constant 0 : index
    %52 = vector.load %arg12[%c0_40, %c0_41, %c0_42] : memref<2x32x136xbf16, #tpu.memory_space<vmem>>, vector<1x32x136xbf16>
    %53 = vector.shape_cast %52 : vector<1x32x136xbf16> to vector<32x136xbf16>
    %c0_43 = arith.constant 0 : index
    %c0_44 = arith.constant 0 : index
    %c0_45 = arith.constant 0 : index
    %54 = vector.load %arg14[%c0_43, %c0_44, %c0_45] : memref<2x8x8xbf16, #tpu.memory_space<vmem>>, vector<1x8x8xbf16>
    %55 = vector.shape_cast %54 : vector<1x8x8xbf16> to vector<8x8xbf16>
    %c0_46 = arith.constant 0 : index
    %c0_47 = arith.constant 0 : index
    %c0_48 = arith.constant 0 : index
    %56 = vector.load %arg16[%c0_46, %c0_47, %c0_48] : memref<2x8x128xbf16, #tpu.memory_space<vmem>>, vector<1x8x128xbf16>
    %57 = vector.shape_cast %56 : vector<1x8x128xbf16> to vector<8x128xbf16>
    %c0_49 = arith.constant 0 : index
    %c0_50 = arith.constant 0 : index
    %c0_51 = arith.constant 0 : index
    %58 = vector.load %arg13[%c0_49, %c0_50, %c0_51] : memref<2x1x8xf32, #tpu.memory_space<vmem>>, vector<1x1x8xf32>
    %59 = vector.shape_cast %58 : vector<1x1x8xf32> to vector<1x8xf32>
    %60 = vector.shape_cast %59 : vector<1x8xf32> to vector<1x8xf32>
    %61 = vector.broadcast %60 : vector<1x8xf32> to vector<2x8xf32>
    %c0_52 = arith.constant 0 : index
    %c0_53 = arith.constant 0 : index
    %c0_54 = arith.constant 0 : index
    %62 = vector.load %arg15[%c0_52, %c0_53, %c0_54] : memref<2x1x8xf32, #tpu.memory_space<vmem>>, vector<1x1x8xf32>
    %63 = vector.shape_cast %62 : vector<1x1x8xf32> to vector<1x8xf32>
    %64 = vector.shape_cast %63 : vector<1x8xf32> to vector<1x8xf32>
    %65 = vector.broadcast %64 : vector<1x8xf32> to vector<2x8xf32>
    %66 = vector.extract_strided_slice %15 {offsets = [0, 0], sizes = [2, 32], strides = [1, 1]} : vector<16x32xf32> to vector<2x32xf32>
    %67 = vector.extract_strided_slice %15 {offsets = [2, 0], sizes = [2, 32], strides = [1, 1]} : vector<16x32xf32> to vector<2x32xf32>
    %68 = vector.extract_strided_slice %15 {offsets = [4, 0], sizes = [2, 32], strides = [1, 1]} : vector<16x32xf32> to vector<2x32xf32>
    %69 = vector.extract_strided_slice %15 {offsets = [6, 0], sizes = [2, 32], strides = [1, 1]} : vector<16x32xf32> to vector<2x32xf32>
    %70 = vector.extract_strided_slice %15 {offsets = [8, 0], sizes = [2, 32], strides = [1, 1]} : vector<16x32xf32> to vector<2x32xf32>
    %71 = vector.extract_strided_slice %15 {offsets = [10, 0], sizes = [2, 32], strides = [1, 1]} : vector<16x32xf32> to vector<2x32xf32>
    %72 = vector.extract_strided_slice %15 {offsets = [12, 0], sizes = [2, 32], strides = [1, 1]} : vector<16x32xf32> to vector<2x32xf32>
    %73 = vector.extract_strided_slice %15 {offsets = [14, 0], sizes = [2, 32], strides = [1, 1]} : vector<16x32xf32> to vector<2x32xf32>
    %74 = vector.extract_strided_slice %44 {offsets = [0, 0], sizes = [2, 8], strides = [1, 1]} : vector<16x8xf32> to vector<2x8xf32>
    %75 = vector.extract_strided_slice %44 {offsets = [2, 0], sizes = [2, 8], strides = [1, 1]} : vector<16x8xf32> to vector<2x8xf32>
    %76 = vector.extract_strided_slice %44 {offsets = [4, 0], sizes = [2, 8], strides = [1, 1]} : vector<16x8xf32> to vector<2x8xf32>
    %77 = vector.extract_strided_slice %44 {offsets = [6, 0], sizes = [2, 8], strides = [1, 1]} : vector<16x8xf32> to vector<2x8xf32>
    %78 = vector.extract_strided_slice %44 {offsets = [8, 0], sizes = [2, 8], strides = [1, 1]} : vector<16x8xf32> to vector<2x8xf32>
    %79 = vector.extract_strided_slice %44 {offsets = [10, 0], sizes = [2, 8], strides = [1, 1]} : vector<16x8xf32> to vector<2x8xf32>
    %80 = vector.extract_strided_slice %44 {offsets = [12, 0], sizes = [2, 8], strides = [1, 1]} : vector<16x8xf32> to vector<2x8xf32>
    %81 = vector.extract_strided_slice %44 {offsets = [14, 0], sizes = [2, 8], strides = [1, 1]} : vector<16x8xf32> to vector<2x8xf32>
    %82 = vector.extract_strided_slice %51 {offsets = [0, 0], sizes = [2, 128], strides = [1, 1]} : vector<16x128xf32> to vector<2x128xf32>
    %83 = vector.extract_strided_slice %51 {offsets = [2, 0], sizes = [2, 128], strides = [1, 1]} : vector<16x128xf32> to vector<2x128xf32>
    %84 = vector.extract_strided_slice %51 {offsets = [4, 0], sizes = [2, 128], strides = [1, 1]} : vector<16x128xf32> to vector<2x128xf32>
    %85 = vector.extract_strided_slice %51 {offsets = [6, 0], sizes = [2, 128], strides = [1, 1]} : vector<16x128xf32> to vector<2x128xf32>
    %86 = vector.extract_strided_slice %51 {offsets = [8, 0], sizes = [2, 128], strides = [1, 1]} : vector<16x128xf32> to vector<2x128xf32>
    %87 = vector.extract_strided_slice %51 {offsets = [10, 0], sizes = [2, 128], strides = [1, 1]} : vector<16x128xf32> to vector<2x128xf32>
    %88 = vector.extract_strided_slice %51 {offsets = [12, 0], sizes = [2, 128], strides = [1, 1]} : vector<16x128xf32> to vector<2x128xf32>
    %89 = vector.extract_strided_slice %51 {offsets = [14, 0], sizes = [2, 128], strides = [1, 1]} : vector<16x128xf32> to vector<2x128xf32>
    %c1 = arith.constant 1 : index
    %c0_55 = arith.constant 0 : index
    %c0_56 = arith.constant 0 : index
    %90 = vector.load %arg3[%c1, %c0_55, %c0_56] : memref<2x16x8xf32, #tpu.memory_space<vmem>>, vector<1x16x8xf32>
    %91 = vector.shape_cast %90 : vector<1x16x8xf32> to vector<16x8xf32>
    %c1_57 = arith.constant 1 : index
    %c0_58 = arith.constant 0 : index
    %c0_59 = arith.constant 0 : index
    %92 = vector.load %arg4[%c1_57, %c0_58, %c0_59] : memref<2x16x8xf32, #tpu.memory_space<vmem>>, vector<1x16x8xf32>
    %93 = vector.shape_cast %92 : vector<1x16x8xf32> to vector<16x8xf32>
    %c1_60 = arith.constant 1 : index
    %c0_61 = arith.constant 0 : index
    %c0_62 = arith.constant 0 : index
    %94 = vector.load %arg5[%c1_60, %c0_61, %c0_62] : memref<2x8x32xf32, #tpu.memory_space<vmem>>, vector<1x8x32xf32>
    %95 = vector.shape_cast %94 : vector<1x8x32xf32> to vector<8x32xf32>
    %cst_63 = arith.constant dense<0.000000e+00> : vector<16x32xf32>
    %96 = tpu.matmul %91, %95, %cst_63 {dimension_numbers = #tpu.dot_dimension_numbers<[1], [0], [0], [1], [0, 0, 1, 1], [], []>} : vector<16x8xf32>, vector<8x32xf32>, vector<16x32xf32> -> vector<16x32xf32>
    %c1_64 = arith.constant 1 : index
    %c0_65 = arith.constant 0 : index
    %c0_66 = arith.constant 0 : index
    %97 = vector.load %arg6[%c1_64, %c0_65, %c0_66] : memref<2x1x32xf32, #tpu.memory_space<vmem>>, vector<1x1x32xf32>
    %98 = vector.shape_cast %97 : vector<1x1x32xf32> to vector<1x32xf32>
    %99 = vector.broadcast %98 : vector<1x32xf32> to vector<16x32xf32>
    %100 = arith.addf %96, %99 : vector<16x32xf32>
    %cst_67 = arith.constant 0.000000e+00 : f32
    %101 = vector.broadcast %cst_67 : f32 to vector<16x32xf32>
    %102 = arith.maximumf %100, %101 : vector<16x32xf32>
    %cst_68 = arith.constant 0.000000e+00 : f32
    %103 = vector.broadcast %cst_68 : f32 to vector<16x32xf32>
    %104 = arith.subf %103, %102 : vector<16x32xf32>
    %105 = math.exp %104 : vector<16x32xf32>
    %c1_69 = arith.constant 1 : index
    %c0_70 = arith.constant 0 : index
    %c0_71 = arith.constant 0 : index
    %106 = vector.load %arg7[%c1_69, %c0_70, %c0_71] : memref<2x1x8xf32, #tpu.memory_space<vmem>>, vector<1x1x8xf32>
    %107 = vector.shape_cast %106 : vector<1x1x8xf32> to vector<1x8xf32>
    %108 = vector.broadcast %107 : vector<1x8xf32> to vector<16x8xf32>
    %109 = arith.mulf %91, %108 : vector<16x8xf32>
    %c1_72 = arith.constant 1 : index
    %c0_73 = arith.constant 0 : index
    %c0_74 = arith.constant 0 : index
    %110 = vector.load %arg8[%c1_72, %c0_73, %c0_74] : memref<2x1x8xf32, #tpu.memory_space<vmem>>, vector<1x1x8xf32>
    %111 = vector.shape_cast %110 : vector<1x1x8xf32> to vector<1x8xf32>
    %112 = vector.broadcast %111 : vector<1x8xf32> to vector<16x8xf32>
    %113 = arith.addf %109, %112 : vector<16x8xf32>
    %cst_75 = arith.constant 0.000000e+00 : f32
    %114 = vector.broadcast %cst_75 : f32 to vector<16x8xf32>
    %115 = arith.maximumf %113, %114 : vector<16x8xf32>
    %cst_76 = arith.constant 0.000000e+00 : f32
    %116 = vector.broadcast %cst_76 : f32 to vector<16x8xf32>
    %117 = arith.subf %116, %115 : vector<16x8xf32>
    %118 = math.exp %117 : vector<16x8xf32>
    %c1_77 = arith.constant 1 : index
    %c0_78 = arith.constant 0 : index
    %c0_79 = arith.constant 0 : index
    %119 = vector.load %arg9[%c1_77, %c0_78, %c0_79] : memref<2x8x8xf32, #tpu.memory_space<vmem>>, vector<1x8x8xf32>
    %120 = vector.shape_cast %119 : vector<1x8x8xf32> to vector<8x8xf32>
    %cst_80 = arith.constant dense<0.000000e+00> : vector<16x8xf32>
    %121 = tpu.matmul %118, %120, %cst_80 {dimension_numbers = #tpu.dot_dimension_numbers<[1], [0], [0], [1], [0, 0, 1, 1], [], []>} : vector<16x8xf32>, vector<8x8xf32>, vector<16x8xf32> -> vector<16x8xf32>
    %c1_81 = arith.constant 1 : index
    %c0_82 = arith.constant 0 : index
    %c0_83 = arith.constant 0 : index
    %122 = vector.load %arg10[%c1_81, %c0_82, %c0_83] : memref<2x8x8xf32, #tpu.memory_space<vmem>>, vector<1x8x8xf32>
    %123 = vector.shape_cast %122 : vector<1x8x8xf32> to vector<8x8xf32>
    %cst_84 = arith.constant dense<0.000000e+00> : vector<16x8xf32>
    %124 = tpu.matmul %93, %123, %cst_84 {dimension_numbers = #tpu.dot_dimension_numbers<[1], [0], [0], [1], [0, 0, 1, 1], [], []>} : vector<16x8xf32>, vector<8x8xf32>, vector<16x8xf32> -> vector<16x8xf32>
    %125 = arith.addf %121, %124 : vector<16x8xf32>
    %c1_85 = arith.constant 1 : index
    %c0_86 = arith.constant 0 : index
    %c0_87 = arith.constant 0 : index
    %126 = vector.load %arg11[%c1_85, %c0_86, %c0_87] : memref<2x1x8xf32, #tpu.memory_space<vmem>>, vector<1x1x8xf32>
    %127 = vector.shape_cast %126 : vector<1x1x8xf32> to vector<1x8xf32>
    %128 = vector.broadcast %127 : vector<1x8xf32> to vector<16x8xf32>
    %129 = arith.addf %125, %128 : vector<16x8xf32>
    %130 = arith.negf %129 : vector<16x8xf32>
    %131 = math.exp %130 : vector<16x8xf32>
    %cst_88 = arith.constant 1.000000e+00 : f32
    %132 = vector.broadcast %cst_88 : f32 to vector<16x8xf32>
    %133 = arith.addf %132, %131 : vector<16x8xf32>
    %134 = arith.divf %132, %133 : vector<16x8xf32>
    %c1_89 = arith.constant 1 : index
    %c0_90 = arith.constant 0 : index
    %c0_91 = arith.constant 0 : index
    %135 = vector.load %arg17[%c1_89, %c0_90, %c0_91] : memref<2x8x128xf32, #tpu.memory_space<vmem>>, vector<1x8x128xf32>
    %136 = vector.shape_cast %135 : vector<1x8x128xf32> to vector<8x128xf32>
    %cst_92 = arith.constant dense<0.000000e+00> : vector<16x128xf32>
    %137 = tpu.matmul %93, %136, %cst_92 {dimension_numbers = #tpu.dot_dimension_numbers<[1], [0], [0], [1], [0, 0, 1, 1], [], []>} : vector<16x8xf32>, vector<8x128xf32>, vector<16x128xf32> -> vector<16x128xf32>
    %c1_93 = arith.constant 1 : index
    %c0_94 = arith.constant 0 : index
    %c0_95 = arith.constant 0 : index
    %138 = vector.load %arg18[%c1_93, %c0_94, %c0_95] : memref<2x1x128xf32, #tpu.memory_space<vmem>>, vector<1x1x128xf32>
    %139 = vector.shape_cast %138 : vector<1x1x128xf32> to vector<1x128xf32>
    %140 = vector.broadcast %139 : vector<1x128xf32> to vector<16x128xf32>
    %141 = arith.addf %137, %140 : vector<16x128xf32>
    %c1_96 = arith.constant 1 : index
    %c0_97 = arith.constant 0 : index
    %c0_98 = arith.constant 0 : index
    %142 = vector.load %arg12[%c1_96, %c0_97, %c0_98] : memref<2x32x136xbf16, #tpu.memory_space<vmem>>, vector<1x32x136xbf16>
    %143 = vector.shape_cast %142 : vector<1x32x136xbf16> to vector<32x136xbf16>
    %c1_99 = arith.constant 1 : index
    %c0_100 = arith.constant 0 : index
    %c0_101 = arith.constant 0 : index
    %144 = vector.load %arg14[%c1_99, %c0_100, %c0_101] : memref<2x8x8xbf16, #tpu.memory_space<vmem>>, vector<1x8x8xbf16>
    %145 = vector.shape_cast %144 : vector<1x8x8xbf16> to vector<8x8xbf16>
    %c1_102 = arith.constant 1 : index
    %c0_103 = arith.constant 0 : index
    %c0_104 = arith.constant 0 : index
    %146 = vector.load %arg16[%c1_102, %c0_103, %c0_104] : memref<2x8x128xbf16, #tpu.memory_space<vmem>>, vector<1x8x128xbf16>
    %147 = vector.shape_cast %146 : vector<1x8x128xbf16> to vector<8x128xbf16>
    %c1_105 = arith.constant 1 : index
    %c0_106 = arith.constant 0 : index
    %c0_107 = arith.constant 0 : index
    %148 = vector.load %arg13[%c1_105, %c0_106, %c0_107] : memref<2x1x8xf32, #tpu.memory_space<vmem>>, vector<1x1x8xf32>
    %149 = vector.shape_cast %148 : vector<1x1x8xf32> to vector<1x8xf32>
    %150 = vector.shape_cast %149 : vector<1x8xf32> to vector<1x8xf32>
    %151 = vector.broadcast %150 : vector<1x8xf32> to vector<2x8xf32>
    %c1_108 = arith.constant 1 : index
    %c0_109 = arith.constant 0 : index
    %c0_110 = arith.constant 0 : index
    %152 = vector.load %arg15[%c1_108, %c0_109, %c0_110] : memref<2x1x8xf32, #tpu.memory_space<vmem>>, vector<1x1x8xf32>
    %153 = vector.shape_cast %152 : vector<1x1x8xf32> to vector<1x8xf32>
    %154 = vector.shape_cast %153 : vector<1x8xf32> to vector<1x8xf32>
    %155 = vector.broadcast %154 : vector<1x8xf32> to vector<2x8xf32>
    %156 = vector.extract_strided_slice %105 {offsets = [0, 0], sizes = [2, 32], strides = [1, 1]} : vector<16x32xf32> to vector<2x32xf32>
    %157 = vector.extract_strided_slice %105 {offsets = [2, 0], sizes = [2, 32], strides = [1, 1]} : vector<16x32xf32> to vector<2x32xf32>
    %158 = vector.extract_strided_slice %105 {offsets = [4, 0], sizes = [2, 32], strides = [1, 1]} : vector<16x32xf32> to vector<2x32xf32>
    %159 = vector.extract_strided_slice %105 {offsets = [6, 0], sizes = [2, 32], strides = [1, 1]} : vector<16x32xf32> to vector<2x32xf32>
    %160 = vector.extract_strided_slice %105 {offsets = [8, 0], sizes = [2, 32], strides = [1, 1]} : vector<16x32xf32> to vector<2x32xf32>
    %161 = vector.extract_strided_slice %105 {offsets = [10, 0], sizes = [2, 32], strides = [1, 1]} : vector<16x32xf32> to vector<2x32xf32>
    %162 = vector.extract_strided_slice %105 {offsets = [12, 0], sizes = [2, 32], strides = [1, 1]} : vector<16x32xf32> to vector<2x32xf32>
    %163 = vector.extract_strided_slice %105 {offsets = [14, 0], sizes = [2, 32], strides = [1, 1]} : vector<16x32xf32> to vector<2x32xf32>
    %164 = vector.extract_strided_slice %134 {offsets = [0, 0], sizes = [2, 8], strides = [1, 1]} : vector<16x8xf32> to vector<2x8xf32>
    %165 = vector.extract_strided_slice %134 {offsets = [2, 0], sizes = [2, 8], strides = [1, 1]} : vector<16x8xf32> to vector<2x8xf32>
    %166 = vector.extract_strided_slice %134 {offsets = [4, 0], sizes = [2, 8], strides = [1, 1]} : vector<16x8xf32> to vector<2x8xf32>
    %167 = vector.extract_strided_slice %134 {offsets = [6, 0], sizes = [2, 8], strides = [1, 1]} : vector<16x8xf32> to vector<2x8xf32>
    %168 = vector.extract_strided_slice %134 {offsets = [8, 0], sizes = [2, 8], strides = [1, 1]} : vector<16x8xf32> to vector<2x8xf32>
    %169 = vector.extract_strided_slice %134 {offsets = [10, 0], sizes = [2, 8], strides = [1, 1]} : vector<16x8xf32> to vector<2x8xf32>
    %170 = vector.extract_strided_slice %134 {offsets = [12, 0], sizes = [2, 8], strides = [1, 1]} : vector<16x8xf32> to vector<2x8xf32>
    %171 = vector.extract_strided_slice %134 {offsets = [14, 0], sizes = [2, 8], strides = [1, 1]} : vector<16x8xf32> to vector<2x8xf32>
    %172 = vector.extract_strided_slice %141 {offsets = [0, 0], sizes = [2, 128], strides = [1, 1]} : vector<16x128xf32> to vector<2x128xf32>
    %173 = vector.extract_strided_slice %141 {offsets = [2, 0], sizes = [2, 128], strides = [1, 1]} : vector<16x128xf32> to vector<2x128xf32>
    %174 = vector.extract_strided_slice %141 {offsets = [4, 0], sizes = [2, 128], strides = [1, 1]} : vector<16x128xf32> to vector<2x128xf32>
    %175 = vector.extract_strided_slice %141 {offsets = [6, 0], sizes = [2, 128], strides = [1, 1]} : vector<16x128xf32> to vector<2x128xf32>
    %176 = vector.extract_strided_slice %141 {offsets = [8, 0], sizes = [2, 128], strides = [1, 1]} : vector<16x128xf32> to vector<2x128xf32>
    %177 = vector.extract_strided_slice %141 {offsets = [10, 0], sizes = [2, 128], strides = [1, 1]} : vector<16x128xf32> to vector<2x128xf32>
    %178 = vector.extract_strided_slice %141 {offsets = [12, 0], sizes = [2, 128], strides = [1, 1]} : vector<16x128xf32> to vector<2x128xf32>
    %179 = vector.extract_strided_slice %141 {offsets = [14, 0], sizes = [2, 128], strides = [1, 1]} : vector<16x128xf32> to vector<2x128xf32>
    %cst_111 = arith.constant 0.000000e+00 : f32
    %180 = vector.broadcast %cst_111 : f32 to vector<2x32xf32>
    %cst_112 = arith.constant 0.000000e+00 : f32
    %181 = vector.broadcast %cst_112 : f32 to vector<2x8xf32>
    %c0_113 = arith.constant 0 : index
    %c0_114 = arith.constant 0 : index
    %c0_115 = arith.constant 0 : index
    %c0_116 = arith.constant 0 : index
    %182 = vector.load %arg0[%c0_113, %c0_114, %c0_115, %c0_116] : memref<2x8x2x8xf32, #tpu.memory_space<vmem>>, vector<1x1x2x8xf32>
    %183 = vector.shape_cast %182 : vector<1x1x2x8xf32> to vector<2x8xf32>
    %c0_117 = arith.constant 0 : index
    %c0_118 = arith.constant 0 : index
    %c0_119 = arith.constant 0 : index
    %c0_120 = arith.constant 0 : index
    %184 = vector.load %arg1[%c0_117, %c0_118, %c0_119, %c0_120] : memref<2x8x2x8xf32, #tpu.memory_space<vmem>>, vector<1x1x2x8xf32>
    %185 = vector.shape_cast %184 : vector<1x1x2x8xf32> to vector<2x8xf32>
    %c0_121 = arith.constant 0 : index
    %c0_122 = arith.constant 0 : index
    %c0_123 = arith.constant 0 : index
    %c0_124 = arith.constant 0 : index
    %186 = vector.load %arg2[%c0_121, %c0_122, %c0_123, %c0_124] : memref<2x8x2x8xf32, #tpu.memory_space<vmem>>, vector<1x1x2x8xf32>
    %187 = vector.shape_cast %186 : vector<1x1x2x8xf32> to vector<2x8xf32>
    %188 = arith.mulf %180, %66 : vector<2x32xf32>
    %189 = arith.truncf %188 : vector<2x32xf32> to vector<2x32xbf16>
    %cst_125 = arith.constant dense<0.000000e+00> : vector<2x136xf32>
    %190 = tpu.matmul %189, %53, %cst_125 {dimension_numbers = #tpu.dot_dimension_numbers<[1], [0], [0], [1], [0, 0, 1, 1], [], []>} : vector<2x32xbf16>, vector<32x136xbf16>, vector<2x136xf32> -> vector<2x136xf32>
    %191 = vector.extract_strided_slice %190 {offsets = [0, 128], sizes = [2, 8], strides = [1, 1]} : vector<2x136xf32> to vector<2x8xf32>
    %192 = arith.addf %191, %61 : vector<2x8xf32>
    %193 = arith.subf %183, %192 : vector<2x8xf32>
    %194 = arith.mulf %185, %193 : vector<2x8xf32>
    %195 = arith.addf %192, %194 : vector<2x8xf32>
    %196 = arith.truncf %195 : vector<2x8xf32> to vector<2x8xbf16>
    %cst_126 = arith.constant dense<0.000000e+00> : vector<2x8xf32>
    %197 = tpu.matmul %196, %55, %cst_126 {dimension_numbers = #tpu.dot_dimension_numbers<[1], [0], [0], [1], [0, 0, 1, 1], [], []>} : vector<2x8xbf16>, vector<8x8xbf16>, vector<2x8xf32> -> vector<2x8xf32>
    %198 = arith.addf %197, %65 : vector<2x8xf32>
    %199 = arith.subf %198, %192 : vector<2x8xf32>
    %200 = arith.mulf %74, %199 : vector<2x8xf32>
    %201 = arith.addf %192, %200 : vector<2x8xf32>
    %202 = arith.subf %183, %192 : vector<2x8xf32>
    %203 = math.absf %202 : vector<2x8xf32>
    %204 = arith.subf %183, %198 : vector<2x8xf32>
    %205 = math.absf %204 : vector<2x8xf32>
    %206 = arith.addf %203, %205 : vector<2x8xf32>
    %207 = arith.subf %183, %201 : vector<2x8xf32>
    %208 = math.absf %207 : vector<2x8xf32>
    %209 = arith.addf %206, %208 : vector<2x8xf32>
    %210 = arith.mulf %209, %187 : vector<2x8xf32>
    %211 = arith.addf %181, %210 : vector<2x8xf32>
    %212 = arith.subf %183, %201 : vector<2x8xf32>
    %213 = arith.mulf %185, %212 : vector<2x8xf32>
    %214 = arith.addf %201, %213 : vector<2x8xf32>
    %215 = arith.truncf %214 : vector<2x8xf32> to vector<2x8xbf16>
    %cst_127 = arith.constant dense<0.000000e+00> : vector<2x128xf32>
    %216 = tpu.matmul %215, %57, %cst_127 {dimension_numbers = #tpu.dot_dimension_numbers<[1], [0], [0], [1], [0, 0, 1, 1], [], []>} : vector<2x8xbf16>, vector<8x128xbf16>, vector<2x128xf32> -> vector<2x128xf32>
    %217 = arith.addf %216, %82 : vector<2x128xf32>
    %218 = vector.extract_strided_slice %190 {offsets = [0, 0], sizes = [2, 128], strides = [1, 1]} : vector<2x136xf32> to vector<2x128xf32>
    %219 = arith.addf %217, %218 : vector<2x128xf32>
    %220 = arith.negf %219 : vector<2x128xf32>
    %221 = math.exp %220 : vector<2x128xf32>
    %cst_128 = arith.constant 1.000000e+00 : f32
    %222 = vector.broadcast %cst_128 : f32 to vector<2x128xf32>
    %223 = arith.addf %222, %221 : vector<2x128xf32>
    %224 = arith.divf %222, %223 : vector<2x128xf32>
    %225 = math.tanh %219 : vector<2x128xf32>
    %226 = vector.extract_strided_slice %224 {offsets = [0, 0], sizes = [2, 32], strides = [1, 1]} : vector<2x128xf32> to vector<2x32xf32>
    %227 = vector.extract_strided_slice %224 {offsets = [0, 32], sizes = [2, 32], strides = [1, 1]} : vector<2x128xf32> to vector<2x32xf32>
    %228 = vector.extract_strided_slice %225 {offsets = [0, 64], sizes = [2, 32], strides = [1, 1]} : vector<2x128xf32> to vector<2x32xf32>
    %229 = vector.extract_strided_slice %224 {offsets = [0, 96], sizes = [2, 32], strides = [1, 1]} : vector<2x128xf32> to vector<2x32xf32>
    %230 = arith.mulf %227, %180 : vector<2x32xf32>
    %231 = arith.mulf %226, %228 : vector<2x32xf32>
    %232 = arith.addf %230, %231 : vector<2x32xf32>
    %233 = math.tanh %232 : vector<2x32xf32>
    %234 = arith.mulf %229, %233 : vector<2x32xf32>
    %c1_129 = arith.constant 1 : index
    %c0_130 = arith.constant 0 : index
    %c0_131 = arith.constant 0 : index
    %c0_132 = arith.constant 0 : index
    %235 = vector.load %arg0[%c1_129, %c0_130, %c0_131, %c0_132] : memref<2x8x2x8xf32, #tpu.memory_space<vmem>>, vector<1x1x2x8xf32>
    %236 = vector.shape_cast %235 : vector<1x1x2x8xf32> to vector<2x8xf32>
    %c1_133 = arith.constant 1 : index
    %c0_134 = arith.constant 0 : index
    %c0_135 = arith.constant 0 : index
    %c0_136 = arith.constant 0 : index
    %237 = vector.load %arg1[%c1_133, %c0_134, %c0_135, %c0_136] : memref<2x8x2x8xf32, #tpu.memory_space<vmem>>, vector<1x1x2x8xf32>
    %238 = vector.shape_cast %237 : vector<1x1x2x8xf32> to vector<2x8xf32>
    %c1_137 = arith.constant 1 : index
    %c0_138 = arith.constant 0 : index
    %c0_139 = arith.constant 0 : index
    %c0_140 = arith.constant 0 : index
    %239 = vector.load %arg2[%c1_137, %c0_138, %c0_139, %c0_140] : memref<2x8x2x8xf32, #tpu.memory_space<vmem>>, vector<1x1x2x8xf32>
    %240 = vector.shape_cast %239 : vector<1x1x2x8xf32> to vector<2x8xf32>
    %241 = arith.mulf %180, %156 : vector<2x32xf32>
    %242 = arith.truncf %241 : vector<2x32xf32> to vector<2x32xbf16>
    %cst_141 = arith.constant dense<0.000000e+00> : vector<2x136xf32>
    %243 = tpu.matmul %242, %143, %cst_141 {dimension_numbers = #tpu.dot_dimension_numbers<[1], [0], [0], [1], [0, 0, 1, 1], [], []>} : vector<2x32xbf16>, vector<32x136xbf16>, vector<2x136xf32> -> vector<2x136xf32>
    %244 = vector.extract_strided_slice %243 {offsets = [0, 128], sizes = [2, 8], strides = [1, 1]} : vector<2x136xf32> to vector<2x8xf32>
    %245 = arith.addf %244, %151 : vector<2x8xf32>
    %246 = arith.subf %236, %245 : vector<2x8xf32>
    %247 = arith.mulf %238, %246 : vector<2x8xf32>
    %248 = arith.addf %245, %247 : vector<2x8xf32>
    %249 = arith.truncf %248 : vector<2x8xf32> to vector<2x8xbf16>
    %cst_142 = arith.constant dense<0.000000e+00> : vector<2x8xf32>
    %250 = tpu.matmul %249, %145, %cst_142 {dimension_numbers = #tpu.dot_dimension_numbers<[1], [0], [0], [1], [0, 0, 1, 1], [], []>} : vector<2x8xbf16>, vector<8x8xbf16>, vector<2x8xf32> -> vector<2x8xf32>
    %251 = arith.addf %250, %155 : vector<2x8xf32>
    %252 = arith.subf %251, %245 : vector<2x8xf32>
    %253 = arith.mulf %164, %252 : vector<2x8xf32>
    %254 = arith.addf %245, %253 : vector<2x8xf32>
    %255 = arith.subf %236, %245 : vector<2x8xf32>
    %256 = math.absf %255 : vector<2x8xf32>
    %257 = arith.subf %236, %251 : vector<2x8xf32>
    %258 = math.absf %257 : vector<2x8xf32>
    %259 = arith.addf %256, %258 : vector<2x8xf32>
    %260 = arith.subf %236, %254 : vector<2x8xf32>
    %261 = math.absf %260 : vector<2x8xf32>
    %262 = arith.addf %259, %261 : vector<2x8xf32>
    %263 = arith.mulf %262, %240 : vector<2x8xf32>
    %264 = arith.addf %181, %263 : vector<2x8xf32>
    %265 = arith.subf %236, %254 : vector<2x8xf32>
    %266 = arith.mulf %238, %265 : vector<2x8xf32>
    %267 = arith.addf %254, %266 : vector<2x8xf32>
    %268 = arith.truncf %267 : vector<2x8xf32> to vector<2x8xbf16>
    %cst_143 = arith.constant dense<0.000000e+00> : vector<2x128xf32>
    %269 = tpu.matmul %268, %147, %cst_143 {dimension_numbers = #tpu.dot_dimension_numbers<[1], [0], [0], [1], [0, 0, 1, 1], [], []>} : vector<2x8xbf16>, vector<8x128xbf16>, vector<2x128xf32> -> vector<2x128xf32>
    %270 = arith.addf %269, %172 : vector<2x128xf32>
    %271 = vector.extract_strided_slice %243 {offsets = [0, 0], sizes = [2, 128], strides = [1, 1]} : vector<2x136xf32> to vector<2x128xf32>
    %272 = arith.addf %270, %271 : vector<2x128xf32>
    %273 = arith.negf %272 : vector<2x128xf32>
    %274 = math.exp %273 : vector<2x128xf32>
    %cst_144 = arith.constant 1.000000e+00 : f32
    %275 = vector.broadcast %cst_144 : f32 to vector<2x128xf32>
    %276 = arith.addf %275, %274 : vector<2x128xf32>
    %277 = arith.divf %275, %276 : vector<2x128xf32>
    %278 = math.tanh %272 : vector<2x128xf32>
    %279 = vector.extract_strided_slice %277 {offsets = [0, 0], sizes = [2, 32], strides = [1, 1]} : vector<2x128xf32> to vector<2x32xf32>
    %280 = vector.extract_strided_slice %277 {offsets = [0, 32], sizes = [2, 32], strides = [1, 1]} : vector<2x128xf32> to vector<2x32xf32>
    %281 = vector.extract_strided_slice %278 {offsets = [0, 64], sizes = [2, 32], strides = [1, 1]} : vector<2x128xf32> to vector<2x32xf32>
    %282 = vector.extract_strided_slice %277 {offsets = [0, 96], sizes = [2, 32], strides = [1, 1]} : vector<2x128xf32> to vector<2x32xf32>
    %283 = arith.mulf %280, %180 : vector<2x32xf32>
    %284 = arith.mulf %279, %281 : vector<2x32xf32>
    %285 = arith.addf %283, %284 : vector<2x32xf32>
    %286 = math.tanh %285 : vector<2x32xf32>
    %287 = arith.mulf %282, %286 : vector<2x32xf32>
    %c0_145 = arith.constant 0 : index
    %c1_146 = arith.constant 1 : index
    %c0_147 = arith.constant 0 : index
    %c0_148 = arith.constant 0 : index
    %288 = vector.load %arg0[%c0_145, %c1_146, %c0_147, %c0_148] : memref<2x8x2x8xf32, #tpu.memory_space<vmem>>, vector<1x1x2x8xf32>
    %289 = vector.shape_cast %288 : vector<1x1x2x8xf32> to vector<2x8xf32>
    %c0_149 = arith.constant 0 : index
    %c1_150 = arith.constant 1 : index
    %c0_151 = arith.constant 0 : index
    %c0_152 = arith.constant 0 : index
    %290 = vector.load %arg1[%c0_149, %c1_150, %c0_151, %c0_152] : memref<2x8x2x8xf32, #tpu.memory_space<vmem>>, vector<1x1x2x8xf32>
    %291 = vector.shape_cast %290 : vector<1x1x2x8xf32> to vector<2x8xf32>
    %c0_153 = arith.constant 0 : index
    %c1_154 = arith.constant 1 : index
    %c0_155 = arith.constant 0 : index
    %c0_156 = arith.constant 0 : index
    %292 = vector.load %arg2[%c0_153, %c1_154, %c0_155, %c0_156] : memref<2x8x2x8xf32, #tpu.memory_space<vmem>>, vector<1x1x2x8xf32>
    %293 = vector.shape_cast %292 : vector<1x1x2x8xf32> to vector<2x8xf32>
    %294 = arith.mulf %234, %67 : vector<2x32xf32>
    %295 = arith.truncf %294 : vector<2x32xf32> to vector<2x32xbf16>
    %cst_157 = arith.constant dense<0.000000e+00> : vector<2x136xf32>
    %296 = tpu.matmul %295, %53, %cst_157 {dimension_numbers = #tpu.dot_dimension_numbers<[1], [0], [0], [1], [0, 0, 1, 1], [], []>} : vector<2x32xbf16>, vector<32x136xbf16>, vector<2x136xf32> -> vector<2x136xf32>
    %297 = vector.extract_strided_slice %296 {offsets = [0, 128], sizes = [2, 8], strides = [1, 1]} : vector<2x136xf32> to vector<2x8xf32>
    %298 = arith.addf %297, %61 : vector<2x8xf32>
    %299 = arith.subf %289, %298 : vector<2x8xf32>
    %300 = arith.mulf %291, %299 : vector<2x8xf32>
    %301 = arith.addf %298, %300 : vector<2x8xf32>
    %302 = arith.truncf %301 : vector<2x8xf32> to vector<2x8xbf16>
    %cst_158 = arith.constant dense<0.000000e+00> : vector<2x8xf32>
    %303 = tpu.matmul %302, %55, %cst_158 {dimension_numbers = #tpu.dot_dimension_numbers<[1], [0], [0], [1], [0, 0, 1, 1], [], []>} : vector<2x8xbf16>, vector<8x8xbf16>, vector<2x8xf32> -> vector<2x8xf32>
    %304 = arith.addf %303, %65 : vector<2x8xf32>
    %305 = arith.subf %304, %298 : vector<2x8xf32>
    %306 = arith.mulf %75, %305 : vector<2x8xf32>
    %307 = arith.addf %298, %306 : vector<2x8xf32>
    %308 = arith.subf %289, %298 : vector<2x8xf32>
    %309 = math.absf %308 : vector<2x8xf32>
    %310 = arith.subf %289, %304 : vector<2x8xf32>
    %311 = math.absf %310 : vector<2x8xf32>
    %312 = arith.addf %309, %311 : vector<2x8xf32>
    %313 = arith.subf %289, %307 : vector<2x8xf32>
    %314 = math.absf %313 : vector<2x8xf32>
    %315 = arith.addf %312, %314 : vector<2x8xf32>
    %316 = arith.mulf %315, %293 : vector<2x8xf32>
    %317 = arith.addf %211, %316 : vector<2x8xf32>
    %318 = arith.subf %289, %307 : vector<2x8xf32>
    %319 = arith.mulf %291, %318 : vector<2x8xf32>
    %320 = arith.addf %307, %319 : vector<2x8xf32>
    %321 = arith.truncf %320 : vector<2x8xf32> to vector<2x8xbf16>
    %cst_159 = arith.constant dense<0.000000e+00> : vector<2x128xf32>
    %322 = tpu.matmul %321, %57, %cst_159 {dimension_numbers = #tpu.dot_dimension_numbers<[1], [0], [0], [1], [0, 0, 1, 1], [], []>} : vector<2x8xbf16>, vector<8x128xbf16>, vector<2x128xf32> -> vector<2x128xf32>
    %323 = arith.addf %322, %83 : vector<2x128xf32>
    %324 = vector.extract_strided_slice %296 {offsets = [0, 0], sizes = [2, 128], strides = [1, 1]} : vector<2x136xf32> to vector<2x128xf32>
    %325 = arith.addf %323, %324 : vector<2x128xf32>
    %326 = arith.negf %325 : vector<2x128xf32>
    %327 = math.exp %326 : vector<2x128xf32>
    %cst_160 = arith.constant 1.000000e+00 : f32
    %328 = vector.broadcast %cst_160 : f32 to vector<2x128xf32>
    %329 = arith.addf %328, %327 : vector<2x128xf32>
    %330 = arith.divf %328, %329 : vector<2x128xf32>
    %331 = math.tanh %325 : vector<2x128xf32>
    %332 = vector.extract_strided_slice %330 {offsets = [0, 0], sizes = [2, 32], strides = [1, 1]} : vector<2x128xf32> to vector<2x32xf32>
    %333 = vector.extract_strided_slice %330 {offsets = [0, 32], sizes = [2, 32], strides = [1, 1]} : vector<2x128xf32> to vector<2x32xf32>
    %334 = vector.extract_strided_slice %331 {offsets = [0, 64], sizes = [2, 32], strides = [1, 1]} : vector<2x128xf32> to vector<2x32xf32>
    %335 = vector.extract_strided_slice %330 {offsets = [0, 96], sizes = [2, 32], strides = [1, 1]} : vector<2x128xf32> to vector<2x32xf32>
    %336 = arith.mulf %333, %232 : vector<2x32xf32>
    %337 = arith.mulf %332, %334 : vector<2x32xf32>
    %338 = arith.addf %336, %337 : vector<2x32xf32>
    %339 = math.tanh %338 : vector<2x32xf32>
    %340 = arith.mulf %335, %339 : vector<2x32xf32>
    %c1_161 = arith.constant 1 : index
    %c1_162 = arith.constant 1 : index
    %c0_163 = arith.constant 0 : index
    %c0_164 = arith.constant 0 : index
    %341 = vector.load %arg0[%c1_161, %c1_162, %c0_163, %c0_164] : memref<2x8x2x8xf32, #tpu.memory_space<vmem>>, vector<1x1x2x8xf32>
    %342 = vector.shape_cast %341 : vector<1x1x2x8xf32> to vector<2x8xf32>
    %c1_165 = arith.constant 1 : index
    %c1_166 = arith.constant 1 : index
    %c0_167 = arith.constant 0 : index
    %c0_168 = arith.constant 0 : index
    %343 = vector.load %arg1[%c1_165, %c1_166, %c0_167, %c0_168] : memref<2x8x2x8xf32, #tpu.memory_space<vmem>>, vector<1x1x2x8xf32>
    %344 = vector.shape_cast %343 : vector<1x1x2x8xf32> to vector<2x8xf32>
    %c1_169 = arith.constant 1 : index
    %c1_170 = arith.constant 1 : index
    %c0_171 = arith.constant 0 : index
    %c0_172 = arith.constant 0 : index
    %345 = vector.load %arg2[%c1_169, %c1_170, %c0_171, %c0_172] : memref<2x8x2x8xf32, #tpu.memory_space<vmem>>, vector<1x1x2x8xf32>
    %346 = vector.shape_cast %345 : vector<1x1x2x8xf32> to vector<2x8xf32>
    %347 = arith.mulf %287, %157 : vector<2x32xf32>
    %348 = arith.truncf %347 : vector<2x32xf32> to vector<2x32xbf16>
    %cst_173 = arith.constant dense<0.000000e+00> : vector<2x136xf32>
    %349 = tpu.matmul %348, %143, %cst_173 {dimension_numbers = #tpu.dot_dimension_numbers<[1], [0], [0], [1], [0, 0, 1, 1], [], []>} : vector<2x32xbf16>, vector<32x136xbf16>, vector<2x136xf32> -> vector<2x136xf32>
    %350 = vector.extract_strided_slice %349 {offsets = [0, 128], sizes = [2, 8], strides = [1, 1]} : vector<2x136xf32> to vector<2x8xf32>
    %351 = arith.addf %350, %151 : vector<2x8xf32>
    %352 = arith.subf %342, %351 : vector<2x8xf32>
    %353 = arith.mulf %344, %352 : vector<2x8xf32>
    %354 = arith.addf %351, %353 : vector<2x8xf32>
    %355 = arith.truncf %354 : vector<2x8xf32> to vector<2x8xbf16>
    %cst_174 = arith.constant dense<0.000000e+00> : vector<2x8xf32>
    %356 = tpu.matmul %355, %145, %cst_174 {dimension_numbers = #tpu.dot_dimension_numbers<[1], [0], [0], [1], [0, 0, 1, 1], [], []>} : vector<2x8xbf16>, vector<8x8xbf16>, vector<2x8xf32> -> vector<2x8xf32>
    %357 = arith.addf %356, %155 : vector<2x8xf32>
    %358 = arith.subf %357, %351 : vector<2x8xf32>
    %359 = arith.mulf %165, %358 : vector<2x8xf32>
    %360 = arith.addf %351, %359 : vector<2x8xf32>
    %361 = arith.subf %342, %351 : vector<2x8xf32>
    %362 = math.absf %361 : vector<2x8xf32>
    %363 = arith.subf %342, %357 : vector<2x8xf32>
    %364 = math.absf %363 : vector<2x8xf32>
    %365 = arith.addf %362, %364 : vector<2x8xf32>
    %366 = arith.subf %342, %360 : vector<2x8xf32>
    %367 = math.absf %366 : vector<2x8xf32>
    %368 = arith.addf %365, %367 : vector<2x8xf32>
    %369 = arith.mulf %368, %346 : vector<2x8xf32>
    %370 = arith.addf %264, %369 : vector<2x8xf32>
    %371 = arith.subf %342, %360 : vector<2x8xf32>
    %372 = arith.mulf %344, %371 : vector<2x8xf32>
    %373 = arith.addf %360, %372 : vector<2x8xf32>
    %374 = arith.truncf %373 : vector<2x8xf32> to vector<2x8xbf16>
    %cst_175 = arith.constant dense<0.000000e+00> : vector<2x128xf32>
    %375 = tpu.matmul %374, %147, %cst_175 {dimension_numbers = #tpu.dot_dimension_numbers<[1], [0], [0], [1], [0, 0, 1, 1], [], []>} : vector<2x8xbf16>, vector<8x128xbf16>, vector<2x128xf32> -> vector<2x128xf32>
    %376 = arith.addf %375, %173 : vector<2x128xf32>
    %377 = vector.extract_strided_slice %349 {offsets = [0, 0], sizes = [2, 128], strides = [1, 1]} : vector<2x136xf32> to vector<2x128xf32>
    %378 = arith.addf %376, %377 : vector<2x128xf32>
    %379 = arith.negf %378 : vector<2x128xf32>
    %380 = math.exp %379 : vector<2x128xf32>
    %cst_176 = arith.constant 1.000000e+00 : f32
    %381 = vector.broadcast %cst_176 : f32 to vector<2x128xf32>
    %382 = arith.addf %381, %380 : vector<2x128xf32>
    %383 = arith.divf %381, %382 : vector<2x128xf32>
    %384 = math.tanh %378 : vector<2x128xf32>
    %385 = vector.extract_strided_slice %383 {offsets = [0, 0], sizes = [2, 32], strides = [1, 1]} : vector<2x128xf32> to vector<2x32xf32>
    %386 = vector.extract_strided_slice %383 {offsets = [0, 32], sizes = [2, 32], strides = [1, 1]} : vector<2x128xf32> to vector<2x32xf32>
    %387 = vector.extract_strided_slice %384 {offsets = [0, 64], sizes = [2, 32], strides = [1, 1]} : vector<2x128xf32> to vector<2x32xf32>
    %388 = vector.extract_strided_slice %383 {offsets = [0, 96], sizes = [2, 32], strides = [1, 1]} : vector<2x128xf32> to vector<2x32xf32>
    %389 = arith.mulf %386, %285 : vector<2x32xf32>
    %390 = arith.mulf %385, %387 : vector<2x32xf32>
    %391 = arith.addf %389, %390 : vector<2x32xf32>
    %392 = math.tanh %391 : vector<2x32xf32>
    %393 = arith.mulf %388, %392 : vector<2x32xf32>
    %c0_177 = arith.constant 0 : index
    %c2 = arith.constant 2 : index
    %c0_178 = arith.constant 0 : index
    %c0_179 = arith.constant 0 : index
    %394 = vector.load %arg0[%c0_177, %c2, %c0_178, %c0_179] : memref<2x8x2x8xf32, #tpu.memory_space<vmem>>, vector<1x1x2x8xf32>
    %395 = vector.shape_cast %394 : vector<1x1x2x8xf32> to vector<2x8xf32>
    %c0_180 = arith.constant 0 : index
    %c2_181 = arith.constant 2 : index
    %c0_182 = arith.constant 0 : index
    %c0_183 = arith.constant 0 : index
    %396 = vector.load %arg1[%c0_180, %c2_181, %c0_182, %c0_183] : memref<2x8x2x8xf32, #tpu.memory_space<vmem>>, vector<1x1x2x8xf32>
    %397 = vector.shape_cast %396 : vector<1x1x2x8xf32> to vector<2x8xf32>
    %c0_184 = arith.constant 0 : index
    %c2_185 = arith.constant 2 : index
    %c0_186 = arith.constant 0 : index
    %c0_187 = arith.constant 0 : index
    %398 = vector.load %arg2[%c0_184, %c2_185, %c0_186, %c0_187] : memref<2x8x2x8xf32, #tpu.memory_space<vmem>>, vector<1x1x2x8xf32>
    %399 = vector.shape_cast %398 : vector<1x1x2x8xf32> to vector<2x8xf32>
    %400 = arith.mulf %340, %68 : vector<2x32xf32>
    %401 = arith.truncf %400 : vector<2x32xf32> to vector<2x32xbf16>
    %cst_188 = arith.constant dense<0.000000e+00> : vector<2x136xf32>
    %402 = tpu.matmul %401, %53, %cst_188 {dimension_numbers = #tpu.dot_dimension_numbers<[1], [0], [0], [1], [0, 0, 1, 1], [], []>} : vector<2x32xbf16>, vector<32x136xbf16>, vector<2x136xf32> -> vector<2x136xf32>
    %403 = vector.extract_strided_slice %402 {offsets = [0, 128], sizes = [2, 8], strides = [1, 1]} : vector<2x136xf32> to vector<2x8xf32>
    %404 = arith.addf %403, %61 : vector<2x8xf32>
    %405 = arith.subf %395, %404 : vector<2x8xf32>
    %406 = arith.mulf %397, %405 : vector<2x8xf32>
    %407 = arith.addf %404, %406 : vector<2x8xf32>
    %408 = arith.truncf %407 : vector<2x8xf32> to vector<2x8xbf16>
    %cst_189 = arith.constant dense<0.000000e+00> : vector<2x8xf32>
    %409 = tpu.matmul %408, %55, %cst_189 {dimension_numbers = #tpu.dot_dimension_numbers<[1], [0], [0], [1], [0, 0, 1, 1], [], []>} : vector<2x8xbf16>, vector<8x8xbf16>, vector<2x8xf32> -> vector<2x8xf32>
    %410 = arith.addf %409, %65 : vector<2x8xf32>
    %411 = arith.subf %410, %404 : vector<2x8xf32>
    %412 = arith.mulf %76, %411 : vector<2x8xf32>
    %413 = arith.addf %404, %412 : vector<2x8xf32>
    %414 = arith.subf %395, %404 : vector<2x8xf32>
    %415 = math.absf %414 : vector<2x8xf32>
    %416 = arith.subf %395, %410 : vector<2x8xf32>
    %417 = math.absf %416 : vector<2x8xf32>
    %418 = arith.addf %415, %417 : vector<2x8xf32>
    %419 = arith.subf %395, %413 : vector<2x8xf32>
    %420 = math.absf %419 : vector<2x8xf32>
    %421 = arith.addf %418, %420 : vector<2x8xf32>
    %422 = arith.mulf %421, %399 : vector<2x8xf32>
    %423 = arith.addf %317, %422 : vector<2x8xf32>
    %424 = arith.subf %395, %413 : vector<2x8xf32>
    %425 = arith.mulf %397, %424 : vector<2x8xf32>
    %426 = arith.addf %413, %425 : vector<2x8xf32>
    %427 = arith.truncf %426 : vector<2x8xf32> to vector<2x8xbf16>
    %cst_190 = arith.constant dense<0.000000e+00> : vector<2x128xf32>
    %428 = tpu.matmul %427, %57, %cst_190 {dimension_numbers = #tpu.dot_dimension_numbers<[1], [0], [0], [1], [0, 0, 1, 1], [], []>} : vector<2x8xbf16>, vector<8x128xbf16>, vector<2x128xf32> -> vector<2x128xf32>
    %429 = arith.addf %428, %84 : vector<2x128xf32>
    %430 = vector.extract_strided_slice %402 {offsets = [0, 0], sizes = [2, 128], strides = [1, 1]} : vector<2x136xf32> to vector<2x128xf32>
    %431 = arith.addf %429, %430 : vector<2x128xf32>
    %432 = arith.negf %431 : vector<2x128xf32>
    %433 = math.exp %432 : vector<2x128xf32>
    %cst_191 = arith.constant 1.000000e+00 : f32
    %434 = vector.broadcast %cst_191 : f32 to vector<2x128xf32>
    %435 = arith.addf %434, %433 : vector<2x128xf32>
    %436 = arith.divf %434, %435 : vector<2x128xf32>
    %437 = math.tanh %431 : vector<2x128xf32>
    %438 = vector.extract_strided_slice %436 {offsets = [0, 0], sizes = [2, 32], strides = [1, 1]} : vector<2x128xf32> to vector<2x32xf32>
    %439 = vector.extract_strided_slice %436 {offsets = [0, 32], sizes = [2, 32], strides = [1, 1]} : vector<2x128xf32> to vector<2x32xf32>
    %440 = vector.extract_strided_slice %437 {offsets = [0, 64], sizes = [2, 32], strides = [1, 1]} : vector<2x128xf32> to vector<2x32xf32>
    %441 = vector.extract_strided_slice %436 {offsets = [0, 96], sizes = [2, 32], strides = [1, 1]} : vector<2x128xf32> to vector<2x32xf32>
    %442 = arith.mulf %439, %338 : vector<2x32xf32>
    %443 = arith.mulf %438, %440 : vector<2x32xf32>
    %444 = arith.addf %442, %443 : vector<2x32xf32>
    %445 = math.tanh %444 : vector<2x32xf32>
    %446 = arith.mulf %441, %445 : vector<2x32xf32>
    %c1_192 = arith.constant 1 : index
    %c2_193 = arith.constant 2 : index
    %c0_194 = arith.constant 0 : index
    %c0_195 = arith.constant 0 : index
    %447 = vector.load %arg0[%c1_192, %c2_193, %c0_194, %c0_195] : memref<2x8x2x8xf32, #tpu.memory_space<vmem>>, vector<1x1x2x8xf32>
    %448 = vector.shape_cast %447 : vector<1x1x2x8xf32> to vector<2x8xf32>
    %c1_196 = arith.constant 1 : index
    %c2_197 = arith.constant 2 : index
    %c0_198 = arith.constant 0 : index
    %c0_199 = arith.constant 0 : index
    %449 = vector.load %arg1[%c1_196, %c2_197, %c0_198, %c0_199] : memref<2x8x2x8xf32, #tpu.memory_space<vmem>>, vector<1x1x2x8xf32>
    %450 = vector.shape_cast %449 : vector<1x1x2x8xf32> to vector<2x8xf32>
    %c1_200 = arith.constant 1 : index
    %c2_201 = arith.constant 2 : index
    %c0_202 = arith.constant 0 : index
    %c0_203 = arith.constant 0 : index
    %451 = vector.load %arg2[%c1_200, %c2_201, %c0_202, %c0_203] : memref<2x8x2x8xf32, #tpu.memory_space<vmem>>, vector<1x1x2x8xf32>
    %452 = vector.shape_cast %451 : vector<1x1x2x8xf32> to vector<2x8xf32>
    %453 = arith.mulf %393, %158 : vector<2x32xf32>
    %454 = arith.truncf %453 : vector<2x32xf32> to vector<2x32xbf16>
    %cst_204 = arith.constant dense<0.000000e+00> : vector<2x136xf32>
    %455 = tpu.matmul %454, %143, %cst_204 {dimension_numbers = #tpu.dot_dimension_numbers<[1], [0], [0], [1], [0, 0, 1, 1], [], []>} : vector<2x32xbf16>, vector<32x136xbf16>, vector<2x136xf32> -> vector<2x136xf32>
    %456 = vector.extract_strided_slice %455 {offsets = [0, 128], sizes = [2, 8], strides = [1, 1]} : vector<2x136xf32> to vector<2x8xf32>
    %457 = arith.addf %456, %151 : vector<2x8xf32>
    %458 = arith.subf %448, %457 : vector<2x8xf32>
    %459 = arith.mulf %450, %458 : vector<2x8xf32>
    %460 = arith.addf %457, %459 : vector<2x8xf32>
    %461 = arith.truncf %460 : vector<2x8xf32> to vector<2x8xbf16>
    %cst_205 = arith.constant dense<0.000000e+00> : vector<2x8xf32>
    %462 = tpu.matmul %461, %145, %cst_205 {dimension_numbers = #tpu.dot_dimension_numbers<[1], [0], [0], [1], [0, 0, 1, 1], [], []>} : vector<2x8xbf16>, vector<8x8xbf16>, vector<2x8xf32> -> vector<2x8xf32>
    %463 = arith.addf %462, %155 : vector<2x8xf32>
    %464 = arith.subf %463, %457 : vector<2x8xf32>
    %465 = arith.mulf %166, %464 : vector<2x8xf32>
    %466 = arith.addf %457, %465 : vector<2x8xf32>
    %467 = arith.subf %448, %457 : vector<2x8xf32>
    %468 = math.absf %467 : vector<2x8xf32>
    %469 = arith.subf %448, %463 : vector<2x8xf32>
    %470 = math.absf %469 : vector<2x8xf32>
    %471 = arith.addf %468, %470 : vector<2x8xf32>
    %472 = arith.subf %448, %466 : vector<2x8xf32>
    %473 = math.absf %472 : vector<2x8xf32>
    %474 = arith.addf %471, %473 : vector<2x8xf32>
    %475 = arith.mulf %474, %452 : vector<2x8xf32>
    %476 = arith.addf %370, %475 : vector<2x8xf32>
    %477 = arith.subf %448, %466 : vector<2x8xf32>
    %478 = arith.mulf %450, %477 : vector<2x8xf32>
    %479 = arith.addf %466, %478 : vector<2x8xf32>
    %480 = arith.truncf %479 : vector<2x8xf32> to vector<2x8xbf16>
    %cst_206 = arith.constant dense<0.000000e+00> : vector<2x128xf32>
    %481 = tpu.matmul %480, %147, %cst_206 {dimension_numbers = #tpu.dot_dimension_numbers<[1], [0], [0], [1], [0, 0, 1, 1], [], []>} : vector<2x8xbf16>, vector<8x128xbf16>, vector<2x128xf32> -> vector<2x128xf32>
    %482 = arith.addf %481, %174 : vector<2x128xf32>
    %483 = vector.extract_strided_slice %455 {offsets = [0, 0], sizes = [2, 128], strides = [1, 1]} : vector<2x136xf32> to vector<2x128xf32>
    %484 = arith.addf %482, %483 : vector<2x128xf32>
    %485 = arith.negf %484 : vector<2x128xf32>
    %486 = math.exp %485 : vector<2x128xf32>
    %cst_207 = arith.constant 1.000000e+00 : f32
    %487 = vector.broadcast %cst_207 : f32 to vector<2x128xf32>
    %488 = arith.addf %487, %486 : vector<2x128xf32>
    %489 = arith.divf %487, %488 : vector<2x128xf32>
    %490 = math.tanh %484 : vector<2x128xf32>
    %491 = vector.extract_strided_slice %489 {offsets = [0, 0], sizes = [2, 32], strides = [1, 1]} : vector<2x128xf32> to vector<2x32xf32>
    %492 = vector.extract_strided_slice %489 {offsets = [0, 32], sizes = [2, 32], strides = [1, 1]} : vector<2x128xf32> to vector<2x32xf32>
    %493 = vector.extract_strided_slice %490 {offsets = [0, 64], sizes = [2, 32], strides = [1, 1]} : vector<2x128xf32> to vector<2x32xf32>
    %494 = vector.extract_strided_slice %489 {offsets = [0, 96], sizes = [2, 32], strides = [1, 1]} : vector<2x128xf32> to vector<2x32xf32>
    %495 = arith.mulf %492, %391 : vector<2x32xf32>
    %496 = arith.mulf %491, %493 : vector<2x32xf32>
    %497 = arith.addf %495, %496 : vector<2x32xf32>
    %498 = math.tanh %497 : vector<2x32xf32>
    %499 = arith.mulf %494, %498 : vector<2x32xf32>
    %c0_208 = arith.constant 0 : index
    %c3 = arith.constant 3 : index
    %c0_209 = arith.constant 0 : index
    %c0_210 = arith.constant 0 : index
    %500 = vector.load %arg0[%c0_208, %c3, %c0_209, %c0_210] : memref<2x8x2x8xf32, #tpu.memory_space<vmem>>, vector<1x1x2x8xf32>
    %501 = vector.shape_cast %500 : vector<1x1x2x8xf32> to vector<2x8xf32>
    %c0_211 = arith.constant 0 : index
    %c3_212 = arith.constant 3 : index
    %c0_213 = arith.constant 0 : index
    %c0_214 = arith.constant 0 : index
    %502 = vector.load %arg1[%c0_211, %c3_212, %c0_213, %c0_214] : memref<2x8x2x8xf32, #tpu.memory_space<vmem>>, vector<1x1x2x8xf32>
    %503 = vector.shape_cast %502 : vector<1x1x2x8xf32> to vector<2x8xf32>
    %c0_215 = arith.constant 0 : index
    %c3_216 = arith.constant 3 : index
    %c0_217 = arith.constant 0 : index
    %c0_218 = arith.constant 0 : index
    %504 = vector.load %arg2[%c0_215, %c3_216, %c0_217, %c0_218] : memref<2x8x2x8xf32, #tpu.memory_space<vmem>>, vector<1x1x2x8xf32>
    %505 = vector.shape_cast %504 : vector<1x1x2x8xf32> to vector<2x8xf32>
    %506 = arith.mulf %446, %69 : vector<2x32xf32>
    %507 = arith.truncf %506 : vector<2x32xf32> to vector<2x32xbf16>
    %cst_219 = arith.constant dense<0.000000e+00> : vector<2x136xf32>
    %508 = tpu.matmul %507, %53, %cst_219 {dimension_numbers = #tpu.dot_dimension_numbers<[1], [0], [0], [1], [0, 0, 1, 1], [], []>} : vector<2x32xbf16>, vector<32x136xbf16>, vector<2x136xf32> -> vector<2x136xf32>
    %509 = vector.extract_strided_slice %508 {offsets = [0, 128], sizes = [2, 8], strides = [1, 1]} : vector<2x136xf32> to vector<2x8xf32>
    %510 = arith.addf %509, %61 : vector<2x8xf32>
    %511 = arith.subf %501, %510 : vector<2x8xf32>
    %512 = arith.mulf %503, %511 : vector<2x8xf32>
    %513 = arith.addf %510, %512 : vector<2x8xf32>
    %514 = arith.truncf %513 : vector<2x8xf32> to vector<2x8xbf16>
    %cst_220 = arith.constant dense<0.000000e+00> : vector<2x8xf32>
    %515 = tpu.matmul %514, %55, %cst_220 {dimension_numbers = #tpu.dot_dimension_numbers<[1], [0], [0], [1], [0, 0, 1, 1], [], []>} : vector<2x8xbf16>, vector<8x8xbf16>, vector<2x8xf32> -> vector<2x8xf32>
    %516 = arith.addf %515, %65 : vector<2x8xf32>
    %517 = arith.subf %516, %510 : vector<2x8xf32>
    %518 = arith.mulf %77, %517 : vector<2x8xf32>
    %519 = arith.addf %510, %518 : vector<2x8xf32>
    %520 = arith.subf %501, %510 : vector<2x8xf32>
    %521 = math.absf %520 : vector<2x8xf32>
    %522 = arith.subf %501, %516 : vector<2x8xf32>
    %523 = math.absf %522 : vector<2x8xf32>
    %524 = arith.addf %521, %523 : vector<2x8xf32>
    %525 = arith.subf %501, %519 : vector<2x8xf32>
    %526 = math.absf %525 : vector<2x8xf32>
    %527 = arith.addf %524, %526 : vector<2x8xf32>
    %528 = arith.mulf %527, %505 : vector<2x8xf32>
    %529 = arith.addf %423, %528 : vector<2x8xf32>
    %530 = arith.subf %501, %519 : vector<2x8xf32>
    %531 = arith.mulf %503, %530 : vector<2x8xf32>
    %532 = arith.addf %519, %531 : vector<2x8xf32>
    %533 = arith.truncf %532 : vector<2x8xf32> to vector<2x8xbf16>
    %cst_221 = arith.constant dense<0.000000e+00> : vector<2x128xf32>
    %534 = tpu.matmul %533, %57, %cst_221 {dimension_numbers = #tpu.dot_dimension_numbers<[1], [0], [0], [1], [0, 0, 1, 1], [], []>} : vector<2x8xbf16>, vector<8x128xbf16>, vector<2x128xf32> -> vector<2x128xf32>
    %535 = arith.addf %534, %85 : vector<2x128xf32>
    %536 = vector.extract_strided_slice %508 {offsets = [0, 0], sizes = [2, 128], strides = [1, 1]} : vector<2x136xf32> to vector<2x128xf32>
    %537 = arith.addf %535, %536 : vector<2x128xf32>
    %538 = arith.negf %537 : vector<2x128xf32>
    %539 = math.exp %538 : vector<2x128xf32>
    %cst_222 = arith.constant 1.000000e+00 : f32
    %540 = vector.broadcast %cst_222 : f32 to vector<2x128xf32>
    %541 = arith.addf %540, %539 : vector<2x128xf32>
    %542 = arith.divf %540, %541 : vector<2x128xf32>
    %543 = math.tanh %537 : vector<2x128xf32>
    %544 = vector.extract_strided_slice %542 {offsets = [0, 0], sizes = [2, 32], strides = [1, 1]} : vector<2x128xf32> to vector<2x32xf32>
    %545 = vector.extract_strided_slice %542 {offsets = [0, 32], sizes = [2, 32], strides = [1, 1]} : vector<2x128xf32> to vector<2x32xf32>
    %546 = vector.extract_strided_slice %543 {offsets = [0, 64], sizes = [2, 32], strides = [1, 1]} : vector<2x128xf32> to vector<2x32xf32>
    %547 = vector.extract_strided_slice %542 {offsets = [0, 96], sizes = [2, 32], strides = [1, 1]} : vector<2x128xf32> to vector<2x32xf32>
    %548 = arith.mulf %545, %444 : vector<2x32xf32>
    %549 = arith.mulf %544, %546 : vector<2x32xf32>
    %550 = arith.addf %548, %549 : vector<2x32xf32>
    %551 = math.tanh %550 : vector<2x32xf32>
    %552 = arith.mulf %547, %551 : vector<2x32xf32>
    %c1_223 = arith.constant 1 : index
    %c3_224 = arith.constant 3 : index
    %c0_225 = arith.constant 0 : index
    %c0_226 = arith.constant 0 : index
    %553 = vector.load %arg0[%c1_223, %c3_224, %c0_225, %c0_226] : memref<2x8x2x8xf32, #tpu.memory_space<vmem>>, vector<1x1x2x8xf32>
    %554 = vector.shape_cast %553 : vector<1x1x2x8xf32> to vector<2x8xf32>
    %c1_227 = arith.constant 1 : index
    %c3_228 = arith.constant 3 : index
    %c0_229 = arith.constant 0 : index
    %c0_230 = arith.constant 0 : index
    %555 = vector.load %arg1[%c1_227, %c3_228, %c0_229, %c0_230] : memref<2x8x2x8xf32, #tpu.memory_space<vmem>>, vector<1x1x2x8xf32>
    %556 = vector.shape_cast %555 : vector<1x1x2x8xf32> to vector<2x8xf32>
    %c1_231 = arith.constant 1 : index
    %c3_232 = arith.constant 3 : index
    %c0_233 = arith.constant 0 : index
    %c0_234 = arith.constant 0 : index
    %557 = vector.load %arg2[%c1_231, %c3_232, %c0_233, %c0_234] : memref<2x8x2x8xf32, #tpu.memory_space<vmem>>, vector<1x1x2x8xf32>
    %558 = vector.shape_cast %557 : vector<1x1x2x8xf32> to vector<2x8xf32>
    %559 = arith.mulf %499, %159 : vector<2x32xf32>
    %560 = arith.truncf %559 : vector<2x32xf32> to vector<2x32xbf16>
    %cst_235 = arith.constant dense<0.000000e+00> : vector<2x136xf32>
    %561 = tpu.matmul %560, %143, %cst_235 {dimension_numbers = #tpu.dot_dimension_numbers<[1], [0], [0], [1], [0, 0, 1, 1], [], []>} : vector<2x32xbf16>, vector<32x136xbf16>, vector<2x136xf32> -> vector<2x136xf32>
    %562 = vector.extract_strided_slice %561 {offsets = [0, 128], sizes = [2, 8], strides = [1, 1]} : vector<2x136xf32> to vector<2x8xf32>
    %563 = arith.addf %562, %151 : vector<2x8xf32>
    %564 = arith.subf %554, %563 : vector<2x8xf32>
    %565 = arith.mulf %556, %564 : vector<2x8xf32>
    %566 = arith.addf %563, %565 : vector<2x8xf32>
    %567 = arith.truncf %566 : vector<2x8xf32> to vector<2x8xbf16>
    %cst_236 = arith.constant dense<0.000000e+00> : vector<2x8xf32>
    %568 = tpu.matmul %567, %145, %cst_236 {dimension_numbers = #tpu.dot_dimension_numbers<[1], [0], [0], [1], [0, 0, 1, 1], [], []>} : vector<2x8xbf16>, vector<8x8xbf16>, vector<2x8xf32> -> vector<2x8xf32>
    %569 = arith.addf %568, %155 : vector<2x8xf32>
    %570 = arith.subf %569, %563 : vector<2x8xf32>
    %571 = arith.mulf %167, %570 : vector<2x8xf32>
    %572 = arith.addf %563, %571 : vector<2x8xf32>
    %573 = arith.subf %554, %563 : vector<2x8xf32>
    %574 = math.absf %573 : vector<2x8xf32>
    %575 = arith.subf %554, %569 : vector<2x8xf32>
    %576 = math.absf %575 : vector<2x8xf32>
    %577 = arith.addf %574, %576 : vector<2x8xf32>
    %578 = arith.subf %554, %572 : vector<2x8xf32>
    %579 = math.absf %578 : vector<2x8xf32>
    %580 = arith.addf %577, %579 : vector<2x8xf32>
    %581 = arith.mulf %580, %558 : vector<2x8xf32>
    %582 = arith.addf %476, %581 : vector<2x8xf32>
    %583 = arith.subf %554, %572 : vector<2x8xf32>
    %584 = arith.mulf %556, %583 : vector<2x8xf32>
    %585 = arith.addf %572, %584 : vector<2x8xf32>
    %586 = arith.truncf %585 : vector<2x8xf32> to vector<2x8xbf16>
    %cst_237 = arith.constant dense<0.000000e+00> : vector<2x128xf32>
    %587 = tpu.matmul %586, %147, %cst_237 {dimension_numbers = #tpu.dot_dimension_numbers<[1], [0], [0], [1], [0, 0, 1, 1], [], []>} : vector<2x8xbf16>, vector<8x128xbf16>, vector<2x128xf32> -> vector<2x128xf32>
    %588 = arith.addf %587, %175 : vector<2x128xf32>
    %589 = vector.extract_strided_slice %561 {offsets = [0, 0], sizes = [2, 128], strides = [1, 1]} : vector<2x136xf32> to vector<2x128xf32>
    %590 = arith.addf %588, %589 : vector<2x128xf32>
    %591 = arith.negf %590 : vector<2x128xf32>
    %592 = math.exp %591 : vector<2x128xf32>
    %cst_238 = arith.constant 1.000000e+00 : f32
    %593 = vector.broadcast %cst_238 : f32 to vector<2x128xf32>
    %594 = arith.addf %593, %592 : vector<2x128xf32>
    %595 = arith.divf %593, %594 : vector<2x128xf32>
    %596 = math.tanh %590 : vector<2x128xf32>
    %597 = vector.extract_strided_slice %595 {offsets = [0, 0], sizes = [2, 32], strides = [1, 1]} : vector<2x128xf32> to vector<2x32xf32>
    %598 = vector.extract_strided_slice %595 {offsets = [0, 32], sizes = [2, 32], strides = [1, 1]} : vector<2x128xf32> to vector<2x32xf32>
    %599 = vector.extract_strided_slice %596 {offsets = [0, 64], sizes = [2, 32], strides = [1, 1]} : vector<2x128xf32> to vector<2x32xf32>
    %600 = vector.extract_strided_slice %595 {offsets = [0, 96], sizes = [2, 32], strides = [1, 1]} : vector<2x128xf32> to vector<2x32xf32>
    %601 = arith.mulf %598, %497 : vector<2x32xf32>
    %602 = arith.mulf %597, %599 : vector<2x32xf32>
    %603 = arith.addf %601, %602 : vector<2x32xf32>
    %604 = math.tanh %603 : vector<2x32xf32>
    %605 = arith.mulf %600, %604 : vector<2x32xf32>
    %c0_239 = arith.constant 0 : index
    %c4 = arith.constant 4 : index
    %c0_240 = arith.constant 0 : index
    %c0_241 = arith.constant 0 : index
    %606 = vector.load %arg0[%c0_239, %c4, %c0_240, %c0_241] : memref<2x8x2x8xf32, #tpu.memory_space<vmem>>, vector<1x1x2x8xf32>
    %607 = vector.shape_cast %606 : vector<1x1x2x8xf32> to vector<2x8xf32>
    %c0_242 = arith.constant 0 : index
    %c4_243 = arith.constant 4 : index
    %c0_244 = arith.constant 0 : index
    %c0_245 = arith.constant 0 : index
    %608 = vector.load %arg1[%c0_242, %c4_243, %c0_244, %c0_245] : memref<2x8x2x8xf32, #tpu.memory_space<vmem>>, vector<1x1x2x8xf32>
    %609 = vector.shape_cast %608 : vector<1x1x2x8xf32> to vector<2x8xf32>
    %c0_246 = arith.constant 0 : index
    %c4_247 = arith.constant 4 : index
    %c0_248 = arith.constant 0 : index
    %c0_249 = arith.constant 0 : index
    %610 = vector.load %arg2[%c0_246, %c4_247, %c0_248, %c0_249] : memref<2x8x2x8xf32, #tpu.memory_space<vmem>>, vector<1x1x2x8xf32>
    %611 = vector.shape_cast %610 : vector<1x1x2x8xf32> to vector<2x8xf32>
    %612 = arith.mulf %552, %70 : vector<2x32xf32>
    %613 = arith.truncf %612 : vector<2x32xf32> to vector<2x32xbf16>
    %cst_250 = arith.constant dense<0.000000e+00> : vector<2x136xf32>
    %614 = tpu.matmul %613, %53, %cst_250 {dimension_numbers = #tpu.dot_dimension_numbers<[1], [0], [0], [1], [0, 0, 1, 1], [], []>} : vector<2x32xbf16>, vector<32x136xbf16>, vector<2x136xf32> -> vector<2x136xf32>
    %615 = vector.extract_strided_slice %614 {offsets = [0, 128], sizes = [2, 8], strides = [1, 1]} : vector<2x136xf32> to vector<2x8xf32>
    %616 = arith.addf %615, %61 : vector<2x8xf32>
    %617 = arith.subf %607, %616 : vector<2x8xf32>
    %618 = arith.mulf %609, %617 : vector<2x8xf32>
    %619 = arith.addf %616, %618 : vector<2x8xf32>
    %620 = arith.truncf %619 : vector<2x8xf32> to vector<2x8xbf16>
    %cst_251 = arith.constant dense<0.000000e+00> : vector<2x8xf32>
    %621 = tpu.matmul %620, %55, %cst_251 {dimension_numbers = #tpu.dot_dimension_numbers<[1], [0], [0], [1], [0, 0, 1, 1], [], []>} : vector<2x8xbf16>, vector<8x8xbf16>, vector<2x8xf32> -> vector<2x8xf32>
    %622 = arith.addf %621, %65 : vector<2x8xf32>
    %623 = arith.subf %622, %616 : vector<2x8xf32>
    %624 = arith.mulf %78, %623 : vector<2x8xf32>
    %625 = arith.addf %616, %624 : vector<2x8xf32>
    %626 = arith.subf %607, %616 : vector<2x8xf32>
    %627 = math.absf %626 : vector<2x8xf32>
    %628 = arith.subf %607, %622 : vector<2x8xf32>
    %629 = math.absf %628 : vector<2x8xf32>
    %630 = arith.addf %627, %629 : vector<2x8xf32>
    %631 = arith.subf %607, %625 : vector<2x8xf32>
    %632 = math.absf %631 : vector<2x8xf32>
    %633 = arith.addf %630, %632 : vector<2x8xf32>
    %634 = arith.mulf %633, %611 : vector<2x8xf32>
    %635 = arith.addf %529, %634 : vector<2x8xf32>
    %636 = arith.subf %607, %625 : vector<2x8xf32>
    %637 = arith.mulf %609, %636 : vector<2x8xf32>
    %638 = arith.addf %625, %637 : vector<2x8xf32>
    %639 = arith.truncf %638 : vector<2x8xf32> to vector<2x8xbf16>
    %cst_252 = arith.constant dense<0.000000e+00> : vector<2x128xf32>
    %640 = tpu.matmul %639, %57, %cst_252 {dimension_numbers = #tpu.dot_dimension_numbers<[1], [0], [0], [1], [0, 0, 1, 1], [], []>} : vector<2x8xbf16>, vector<8x128xbf16>, vector<2x128xf32> -> vector<2x128xf32>
    %641 = arith.addf %640, %86 : vector<2x128xf32>
    %642 = vector.extract_strided_slice %614 {offsets = [0, 0], sizes = [2, 128], strides = [1, 1]} : vector<2x136xf32> to vector<2x128xf32>
    %643 = arith.addf %641, %642 : vector<2x128xf32>
    %644 = arith.negf %643 : vector<2x128xf32>
    %645 = math.exp %644 : vector<2x128xf32>
    %cst_253 = arith.constant 1.000000e+00 : f32
    %646 = vector.broadcast %cst_253 : f32 to vector<2x128xf32>
    %647 = arith.addf %646, %645 : vector<2x128xf32>
    %648 = arith.divf %646, %647 : vector<2x128xf32>
    %649 = math.tanh %643 : vector<2x128xf32>
    %650 = vector.extract_strided_slice %648 {offsets = [0, 0], sizes = [2, 32], strides = [1, 1]} : vector<2x128xf32> to vector<2x32xf32>
    %651 = vector.extract_strided_slice %648 {offsets = [0, 32], sizes = [2, 32], strides = [1, 1]} : vector<2x128xf32> to vector<2x32xf32>
    %652 = vector.extract_strided_slice %649 {offsets = [0, 64], sizes = [2, 32], strides = [1, 1]} : vector<2x128xf32> to vector<2x32xf32>
    %653 = vector.extract_strided_slice %648 {offsets = [0, 96], sizes = [2, 32], strides = [1, 1]} : vector<2x128xf32> to vector<2x32xf32>
    %654 = arith.mulf %651, %550 : vector<2x32xf32>
    %655 = arith.mulf %650, %652 : vector<2x32xf32>
    %656 = arith.addf %654, %655 : vector<2x32xf32>
    %657 = math.tanh %656 : vector<2x32xf32>
    %658 = arith.mulf %653, %657 : vector<2x32xf32>
    %c1_254 = arith.constant 1 : index
    %c4_255 = arith.constant 4 : index
    %c0_256 = arith.constant 0 : index
    %c0_257 = arith.constant 0 : index
    %659 = vector.load %arg0[%c1_254, %c4_255, %c0_256, %c0_257] : memref<2x8x2x8xf32, #tpu.memory_space<vmem>>, vector<1x1x2x8xf32>
    %660 = vector.shape_cast %659 : vector<1x1x2x8xf32> to vector<2x8xf32>
    %c1_258 = arith.constant 1 : index
    %c4_259 = arith.constant 4 : index
    %c0_260 = arith.constant 0 : index
    %c0_261 = arith.constant 0 : index
    %661 = vector.load %arg1[%c1_258, %c4_259, %c0_260, %c0_261] : memref<2x8x2x8xf32, #tpu.memory_space<vmem>>, vector<1x1x2x8xf32>
    %662 = vector.shape_cast %661 : vector<1x1x2x8xf32> to vector<2x8xf32>
    %c1_262 = arith.constant 1 : index
    %c4_263 = arith.constant 4 : index
    %c0_264 = arith.constant 0 : index
    %c0_265 = arith.constant 0 : index
    %663 = vector.load %arg2[%c1_262, %c4_263, %c0_264, %c0_265] : memref<2x8x2x8xf32, #tpu.memory_space<vmem>>, vector<1x1x2x8xf32>
    %664 = vector.shape_cast %663 : vector<1x1x2x8xf32> to vector<2x8xf32>
    %665 = arith.mulf %605, %160 : vector<2x32xf32>
    %666 = arith.truncf %665 : vector<2x32xf32> to vector<2x32xbf16>
    %cst_266 = arith.constant dense<0.000000e+00> : vector<2x136xf32>
    %667 = tpu.matmul %666, %143, %cst_266 {dimension_numbers = #tpu.dot_dimension_numbers<[1], [0], [0], [1], [0, 0, 1, 1], [], []>} : vector<2x32xbf16>, vector<32x136xbf16>, vector<2x136xf32> -> vector<2x136xf32>
    %668 = vector.extract_strided_slice %667 {offsets = [0, 128], sizes = [2, 8], strides = [1, 1]} : vector<2x136xf32> to vector<2x8xf32>
    %669 = arith.addf %668, %151 : vector<2x8xf32>
    %670 = arith.subf %660, %669 : vector<2x8xf32>
    %671 = arith.mulf %662, %670 : vector<2x8xf32>
    %672 = arith.addf %669, %671 : vector<2x8xf32>
    %673 = arith.truncf %672 : vector<2x8xf32> to vector<2x8xbf16>
    %cst_267 = arith.constant dense<0.000000e+00> : vector<2x8xf32>
    %674 = tpu.matmul %673, %145, %cst_267 {dimension_numbers = #tpu.dot_dimension_numbers<[1], [0], [0], [1], [0, 0, 1, 1], [], []>} : vector<2x8xbf16>, vector<8x8xbf16>, vector<2x8xf32> -> vector<2x8xf32>
    %675 = arith.addf %674, %155 : vector<2x8xf32>
    %676 = arith.subf %675, %669 : vector<2x8xf32>
    %677 = arith.mulf %168, %676 : vector<2x8xf32>
    %678 = arith.addf %669, %677 : vector<2x8xf32>
    %679 = arith.subf %660, %669 : vector<2x8xf32>
    %680 = math.absf %679 : vector<2x8xf32>
    %681 = arith.subf %660, %675 : vector<2x8xf32>
    %682 = math.absf %681 : vector<2x8xf32>
    %683 = arith.addf %680, %682 : vector<2x8xf32>
    %684 = arith.subf %660, %678 : vector<2x8xf32>
    %685 = math.absf %684 : vector<2x8xf32>
    %686 = arith.addf %683, %685 : vector<2x8xf32>
    %687 = arith.mulf %686, %664 : vector<2x8xf32>
    %688 = arith.addf %582, %687 : vector<2x8xf32>
    %689 = arith.subf %660, %678 : vector<2x8xf32>
    %690 = arith.mulf %662, %689 : vector<2x8xf32>
    %691 = arith.addf %678, %690 : vector<2x8xf32>
    %692 = arith.truncf %691 : vector<2x8xf32> to vector<2x8xbf16>
    %cst_268 = arith.constant dense<0.000000e+00> : vector<2x128xf32>
    %693 = tpu.matmul %692, %147, %cst_268 {dimension_numbers = #tpu.dot_dimension_numbers<[1], [0], [0], [1], [0, 0, 1, 1], [], []>} : vector<2x8xbf16>, vector<8x128xbf16>, vector<2x128xf32> -> vector<2x128xf32>
    %694 = arith.addf %693, %176 : vector<2x128xf32>
    %695 = vector.extract_strided_slice %667 {offsets = [0, 0], sizes = [2, 128], strides = [1, 1]} : vector<2x136xf32> to vector<2x128xf32>
    %696 = arith.addf %694, %695 : vector<2x128xf32>
    %697 = arith.negf %696 : vector<2x128xf32>
    %698 = math.exp %697 : vector<2x128xf32>
    %cst_269 = arith.constant 1.000000e+00 : f32
    %699 = vector.broadcast %cst_269 : f32 to vector<2x128xf32>
    %700 = arith.addf %699, %698 : vector<2x128xf32>
    %701 = arith.divf %699, %700 : vector<2x128xf32>
    %702 = math.tanh %696 : vector<2x128xf32>
    %703 = vector.extract_strided_slice %701 {offsets = [0, 0], sizes = [2, 32], strides = [1, 1]} : vector<2x128xf32> to vector<2x32xf32>
    %704 = vector.extract_strided_slice %701 {offsets = [0, 32], sizes = [2, 32], strides = [1, 1]} : vector<2x128xf32> to vector<2x32xf32>
    %705 = vector.extract_strided_slice %702 {offsets = [0, 64], sizes = [2, 32], strides = [1, 1]} : vector<2x128xf32> to vector<2x32xf32>
    %706 = vector.extract_strided_slice %701 {offsets = [0, 96], sizes = [2, 32], strides = [1, 1]} : vector<2x128xf32> to vector<2x32xf32>
    %707 = arith.mulf %704, %603 : vector<2x32xf32>
    %708 = arith.mulf %703, %705 : vector<2x32xf32>
    %709 = arith.addf %707, %708 : vector<2x32xf32>
    %710 = math.tanh %709 : vector<2x32xf32>
    %711 = arith.mulf %706, %710 : vector<2x32xf32>
    %c0_270 = arith.constant 0 : index
    %c5 = arith.constant 5 : index
    %c0_271 = arith.constant 0 : index
    %c0_272 = arith.constant 0 : index
    %712 = vector.load %arg0[%c0_270, %c5, %c0_271, %c0_272] : memref<2x8x2x8xf32, #tpu.memory_space<vmem>>, vector<1x1x2x8xf32>
    %713 = vector.shape_cast %712 : vector<1x1x2x8xf32> to vector<2x8xf32>
    %c0_273 = arith.constant 0 : index
    %c5_274 = arith.constant 5 : index
    %c0_275 = arith.constant 0 : index
    %c0_276 = arith.constant 0 : index
    %714 = vector.load %arg1[%c0_273, %c5_274, %c0_275, %c0_276] : memref<2x8x2x8xf32, #tpu.memory_space<vmem>>, vector<1x1x2x8xf32>
    %715 = vector.shape_cast %714 : vector<1x1x2x8xf32> to vector<2x8xf32>
    %c0_277 = arith.constant 0 : index
    %c5_278 = arith.constant 5 : index
    %c0_279 = arith.constant 0 : index
    %c0_280 = arith.constant 0 : index
    %716 = vector.load %arg2[%c0_277, %c5_278, %c0_279, %c0_280] : memref<2x8x2x8xf32, #tpu.memory_space<vmem>>, vector<1x1x2x8xf32>
    %717 = vector.shape_cast %716 : vector<1x1x2x8xf32> to vector<2x8xf32>
    %718 = arith.mulf %658, %71 : vector<2x32xf32>
    %719 = arith.truncf %718 : vector<2x32xf32> to vector<2x32xbf16>
    %cst_281 = arith.constant dense<0.000000e+00> : vector<2x136xf32>
    %720 = tpu.matmul %719, %53, %cst_281 {dimension_numbers = #tpu.dot_dimension_numbers<[1], [0], [0], [1], [0, 0, 1, 1], [], []>} : vector<2x32xbf16>, vector<32x136xbf16>, vector<2x136xf32> -> vector<2x136xf32>
    %721 = vector.extract_strided_slice %720 {offsets = [0, 128], sizes = [2, 8], strides = [1, 1]} : vector<2x136xf32> to vector<2x8xf32>
    %722 = arith.addf %721, %61 : vector<2x8xf32>
    %723 = arith.subf %713, %722 : vector<2x8xf32>
    %724 = arith.mulf %715, %723 : vector<2x8xf32>
    %725 = arith.addf %722, %724 : vector<2x8xf32>
    %726 = arith.truncf %725 : vector<2x8xf32> to vector<2x8xbf16>
    %cst_282 = arith.constant dense<0.000000e+00> : vector<2x8xf32>
    %727 = tpu.matmul %726, %55, %cst_282 {dimension_numbers = #tpu.dot_dimension_numbers<[1], [0], [0], [1], [0, 0, 1, 1], [], []>} : vector<2x8xbf16>, vector<8x8xbf16>, vector<2x8xf32> -> vector<2x8xf32>
    %728 = arith.addf %727, %65 : vector<2x8xf32>
    %729 = arith.subf %728, %722 : vector<2x8xf32>
    %730 = arith.mulf %79, %729 : vector<2x8xf32>
    %731 = arith.addf %722, %730 : vector<2x8xf32>
    %732 = arith.subf %713, %722 : vector<2x8xf32>
    %733 = math.absf %732 : vector<2x8xf32>
    %734 = arith.subf %713, %728 : vector<2x8xf32>
    %735 = math.absf %734 : vector<2x8xf32>
    %736 = arith.addf %733, %735 : vector<2x8xf32>
    %737 = arith.subf %713, %731 : vector<2x8xf32>
    %738 = math.absf %737 : vector<2x8xf32>
    %739 = arith.addf %736, %738 : vector<2x8xf32>
    %740 = arith.mulf %739, %717 : vector<2x8xf32>
    %741 = arith.addf %635, %740 : vector<2x8xf32>
    %742 = arith.subf %713, %731 : vector<2x8xf32>
    %743 = arith.mulf %715, %742 : vector<2x8xf32>
    %744 = arith.addf %731, %743 : vector<2x8xf32>
    %745 = arith.truncf %744 : vector<2x8xf32> to vector<2x8xbf16>
    %cst_283 = arith.constant dense<0.000000e+00> : vector<2x128xf32>
    %746 = tpu.matmul %745, %57, %cst_283 {dimension_numbers = #tpu.dot_dimension_numbers<[1], [0], [0], [1], [0, 0, 1, 1], [], []>} : vector<2x8xbf16>, vector<8x128xbf16>, vector<2x128xf32> -> vector<2x128xf32>
    %747 = arith.addf %746, %87 : vector<2x128xf32>
    %748 = vector.extract_strided_slice %720 {offsets = [0, 0], sizes = [2, 128], strides = [1, 1]} : vector<2x136xf32> to vector<2x128xf32>
    %749 = arith.addf %747, %748 : vector<2x128xf32>
    %750 = arith.negf %749 : vector<2x128xf32>
    %751 = math.exp %750 : vector<2x128xf32>
    %cst_284 = arith.constant 1.000000e+00 : f32
    %752 = vector.broadcast %cst_284 : f32 to vector<2x128xf32>
    %753 = arith.addf %752, %751 : vector<2x128xf32>
    %754 = arith.divf %752, %753 : vector<2x128xf32>
    %755 = math.tanh %749 : vector<2x128xf32>
    %756 = vector.extract_strided_slice %754 {offsets = [0, 0], sizes = [2, 32], strides = [1, 1]} : vector<2x128xf32> to vector<2x32xf32>
    %757 = vector.extract_strided_slice %754 {offsets = [0, 32], sizes = [2, 32], strides = [1, 1]} : vector<2x128xf32> to vector<2x32xf32>
    %758 = vector.extract_strided_slice %755 {offsets = [0, 64], sizes = [2, 32], strides = [1, 1]} : vector<2x128xf32> to vector<2x32xf32>
    %759 = vector.extract_strided_slice %754 {offsets = [0, 96], sizes = [2, 32], strides = [1, 1]} : vector<2x128xf32> to vector<2x32xf32>
    %760 = arith.mulf %757, %656 : vector<2x32xf32>
    %761 = arith.mulf %756, %758 : vector<2x32xf32>
    %762 = arith.addf %760, %761 : vector<2x32xf32>
    %763 = math.tanh %762 : vector<2x32xf32>
    %764 = arith.mulf %759, %763 : vector<2x32xf32>
    %c1_285 = arith.constant 1 : index
    %c5_286 = arith.constant 5 : index
    %c0_287 = arith.constant 0 : index
    %c0_288 = arith.constant 0 : index
    %765 = vector.load %arg0[%c1_285, %c5_286, %c0_287, %c0_288] : memref<2x8x2x8xf32, #tpu.memory_space<vmem>>, vector<1x1x2x8xf32>
    %766 = vector.shape_cast %765 : vector<1x1x2x8xf32> to vector<2x8xf32>
    %c1_289 = arith.constant 1 : index
    %c5_290 = arith.constant 5 : index
    %c0_291 = arith.constant 0 : index
    %c0_292 = arith.constant 0 : index
    %767 = vector.load %arg1[%c1_289, %c5_290, %c0_291, %c0_292] : memref<2x8x2x8xf32, #tpu.memory_space<vmem>>, vector<1x1x2x8xf32>
    %768 = vector.shape_cast %767 : vector<1x1x2x8xf32> to vector<2x8xf32>
    %c1_293 = arith.constant 1 : index
    %c5_294 = arith.constant 5 : index
    %c0_295 = arith.constant 0 : index
    %c0_296 = arith.constant 0 : index
    %769 = vector.load %arg2[%c1_293, %c5_294, %c0_295, %c0_296] : memref<2x8x2x8xf32, #tpu.memory_space<vmem>>, vector<1x1x2x8xf32>
    %770 = vector.shape_cast %769 : vector<1x1x2x8xf32> to vector<2x8xf32>
    %771 = arith.mulf %711, %161 : vector<2x32xf32>
    %772 = arith.truncf %771 : vector<2x32xf32> to vector<2x32xbf16>
    %cst_297 = arith.constant dense<0.000000e+00> : vector<2x136xf32>
    %773 = tpu.matmul %772, %143, %cst_297 {dimension_numbers = #tpu.dot_dimension_numbers<[1], [0], [0], [1], [0, 0, 1, 1], [], []>} : vector<2x32xbf16>, vector<32x136xbf16>, vector<2x136xf32> -> vector<2x136xf32>
    %774 = vector.extract_strided_slice %773 {offsets = [0, 128], sizes = [2, 8], strides = [1, 1]} : vector<2x136xf32> to vector<2x8xf32>
    %775 = arith.addf %774, %151 : vector<2x8xf32>
    %776 = arith.subf %766, %775 : vector<2x8xf32>
    %777 = arith.mulf %768, %776 : vector<2x8xf32>
    %778 = arith.addf %775, %777 : vector<2x8xf32>
    %779 = arith.truncf %778 : vector<2x8xf32> to vector<2x8xbf16>
    %cst_298 = arith.constant dense<0.000000e+00> : vector<2x8xf32>
    %780 = tpu.matmul %779, %145, %cst_298 {dimension_numbers = #tpu.dot_dimension_numbers<[1], [0], [0], [1], [0, 0, 1, 1], [], []>} : vector<2x8xbf16>, vector<8x8xbf16>, vector<2x8xf32> -> vector<2x8xf32>
    %781 = arith.addf %780, %155 : vector<2x8xf32>
    %782 = arith.subf %781, %775 : vector<2x8xf32>
    %783 = arith.mulf %169, %782 : vector<2x8xf32>
    %784 = arith.addf %775, %783 : vector<2x8xf32>
    %785 = arith.subf %766, %775 : vector<2x8xf32>
    %786 = math.absf %785 : vector<2x8xf32>
    %787 = arith.subf %766, %781 : vector<2x8xf32>
    %788 = math.absf %787 : vector<2x8xf32>
    %789 = arith.addf %786, %788 : vector<2x8xf32>
    %790 = arith.subf %766, %784 : vector<2x8xf32>
    %791 = math.absf %790 : vector<2x8xf32>
    %792 = arith.addf %789, %791 : vector<2x8xf32>
    %793 = arith.mulf %792, %770 : vector<2x8xf32>
    %794 = arith.addf %688, %793 : vector<2x8xf32>
    %795 = arith.subf %766, %784 : vector<2x8xf32>
    %796 = arith.mulf %768, %795 : vector<2x8xf32>
    %797 = arith.addf %784, %796 : vector<2x8xf32>
    %798 = arith.truncf %797 : vector<2x8xf32> to vector<2x8xbf16>
    %cst_299 = arith.constant dense<0.000000e+00> : vector<2x128xf32>
    %799 = tpu.matmul %798, %147, %cst_299 {dimension_numbers = #tpu.dot_dimension_numbers<[1], [0], [0], [1], [0, 0, 1, 1], [], []>} : vector<2x8xbf16>, vector<8x128xbf16>, vector<2x128xf32> -> vector<2x128xf32>
    %800 = arith.addf %799, %177 : vector<2x128xf32>
    %801 = vector.extract_strided_slice %773 {offsets = [0, 0], sizes = [2, 128], strides = [1, 1]} : vector<2x136xf32> to vector<2x128xf32>
    %802 = arith.addf %800, %801 : vector<2x128xf32>
    %803 = arith.negf %802 : vector<2x128xf32>
    %804 = math.exp %803 : vector<2x128xf32>
    %cst_300 = arith.constant 1.000000e+00 : f32
    %805 = vector.broadcast %cst_300 : f32 to vector<2x128xf32>
    %806 = arith.addf %805, %804 : vector<2x128xf32>
    %807 = arith.divf %805, %806 : vector<2x128xf32>
    %808 = math.tanh %802 : vector<2x128xf32>
    %809 = vector.extract_strided_slice %807 {offsets = [0, 0], sizes = [2, 32], strides = [1, 1]} : vector<2x128xf32> to vector<2x32xf32>
    %810 = vector.extract_strided_slice %807 {offsets = [0, 32], sizes = [2, 32], strides = [1, 1]} : vector<2x128xf32> to vector<2x32xf32>
    %811 = vector.extract_strided_slice %808 {offsets = [0, 64], sizes = [2, 32], strides = [1, 1]} : vector<2x128xf32> to vector<2x32xf32>
    %812 = vector.extract_strided_slice %807 {offsets = [0, 96], sizes = [2, 32], strides = [1, 1]} : vector<2x128xf32> to vector<2x32xf32>
    %813 = arith.mulf %810, %709 : vector<2x32xf32>
    %814 = arith.mulf %809, %811 : vector<2x32xf32>
    %815 = arith.addf %813, %814 : vector<2x32xf32>
    %816 = math.tanh %815 : vector<2x32xf32>
    %817 = arith.mulf %812, %816 : vector<2x32xf32>
    %c0_301 = arith.constant 0 : index
    %c6 = arith.constant 6 : index
    %c0_302 = arith.constant 0 : index
    %c0_303 = arith.constant 0 : index
    %818 = vector.load %arg0[%c0_301, %c6, %c0_302, %c0_303] : memref<2x8x2x8xf32, #tpu.memory_space<vmem>>, vector<1x1x2x8xf32>
    %819 = vector.shape_cast %818 : vector<1x1x2x8xf32> to vector<2x8xf32>
    %c0_304 = arith.constant 0 : index
    %c6_305 = arith.constant 6 : index
    %c0_306 = arith.constant 0 : index
    %c0_307 = arith.constant 0 : index
    %820 = vector.load %arg1[%c0_304, %c6_305, %c0_306, %c0_307] : memref<2x8x2x8xf32, #tpu.memory_space<vmem>>, vector<1x1x2x8xf32>
    %821 = vector.shape_cast %820 : vector<1x1x2x8xf32> to vector<2x8xf32>
    %c0_308 = arith.constant 0 : index
    %c6_309 = arith.constant 6 : index
    %c0_310 = arith.constant 0 : index
    %c0_311 = arith.constant 0 : index
    %822 = vector.load %arg2[%c0_308, %c6_309, %c0_310, %c0_311] : memref<2x8x2x8xf32, #tpu.memory_space<vmem>>, vector<1x1x2x8xf32>
    %823 = vector.shape_cast %822 : vector<1x1x2x8xf32> to vector<2x8xf32>
    %824 = arith.mulf %764, %72 : vector<2x32xf32>
    %825 = arith.truncf %824 : vector<2x32xf32> to vector<2x32xbf16>
    %cst_312 = arith.constant dense<0.000000e+00> : vector<2x136xf32>
    %826 = tpu.matmul %825, %53, %cst_312 {dimension_numbers = #tpu.dot_dimension_numbers<[1], [0], [0], [1], [0, 0, 1, 1], [], []>} : vector<2x32xbf16>, vector<32x136xbf16>, vector<2x136xf32> -> vector<2x136xf32>
    %827 = vector.extract_strided_slice %826 {offsets = [0, 128], sizes = [2, 8], strides = [1, 1]} : vector<2x136xf32> to vector<2x8xf32>
    %828 = arith.addf %827, %61 : vector<2x8xf32>
    %829 = arith.subf %819, %828 : vector<2x8xf32>
    %830 = arith.mulf %821, %829 : vector<2x8xf32>
    %831 = arith.addf %828, %830 : vector<2x8xf32>
    %832 = arith.truncf %831 : vector<2x8xf32> to vector<2x8xbf16>
    %cst_313 = arith.constant dense<0.000000e+00> : vector<2x8xf32>
    %833 = tpu.matmul %832, %55, %cst_313 {dimension_numbers = #tpu.dot_dimension_numbers<[1], [0], [0], [1], [0, 0, 1, 1], [], []>} : vector<2x8xbf16>, vector<8x8xbf16>, vector<2x8xf32> -> vector<2x8xf32>
    %834 = arith.addf %833, %65 : vector<2x8xf32>
    %835 = arith.subf %834, %828 : vector<2x8xf32>
    %836 = arith.mulf %80, %835 : vector<2x8xf32>
    %837 = arith.addf %828, %836 : vector<2x8xf32>
    %838 = arith.subf %819, %828 : vector<2x8xf32>
    %839 = math.absf %838 : vector<2x8xf32>
    %840 = arith.subf %819, %834 : vector<2x8xf32>
    %841 = math.absf %840 : vector<2x8xf32>
    %842 = arith.addf %839, %841 : vector<2x8xf32>
    %843 = arith.subf %819, %837 : vector<2x8xf32>
    %844 = math.absf %843 : vector<2x8xf32>
    %845 = arith.addf %842, %844 : vector<2x8xf32>
    %846 = arith.mulf %845, %823 : vector<2x8xf32>
    %847 = arith.addf %741, %846 : vector<2x8xf32>
    %848 = arith.subf %819, %837 : vector<2x8xf32>
    %849 = arith.mulf %821, %848 : vector<2x8xf32>
    %850 = arith.addf %837, %849 : vector<2x8xf32>
    %851 = arith.truncf %850 : vector<2x8xf32> to vector<2x8xbf16>
    %cst_314 = arith.constant dense<0.000000e+00> : vector<2x128xf32>
    %852 = tpu.matmul %851, %57, %cst_314 {dimension_numbers = #tpu.dot_dimension_numbers<[1], [0], [0], [1], [0, 0, 1, 1], [], []>} : vector<2x8xbf16>, vector<8x128xbf16>, vector<2x128xf32> -> vector<2x128xf32>
    %853 = arith.addf %852, %88 : vector<2x128xf32>
    %854 = vector.extract_strided_slice %826 {offsets = [0, 0], sizes = [2, 128], strides = [1, 1]} : vector<2x136xf32> to vector<2x128xf32>
    %855 = arith.addf %853, %854 : vector<2x128xf32>
    %856 = arith.negf %855 : vector<2x128xf32>
    %857 = math.exp %856 : vector<2x128xf32>
    %cst_315 = arith.constant 1.000000e+00 : f32
    %858 = vector.broadcast %cst_315 : f32 to vector<2x128xf32>
    %859 = arith.addf %858, %857 : vector<2x128xf32>
    %860 = arith.divf %858, %859 : vector<2x128xf32>
    %861 = math.tanh %855 : vector<2x128xf32>
    %862 = vector.extract_strided_slice %860 {offsets = [0, 0], sizes = [2, 32], strides = [1, 1]} : vector<2x128xf32> to vector<2x32xf32>
    %863 = vector.extract_strided_slice %860 {offsets = [0, 32], sizes = [2, 32], strides = [1, 1]} : vector<2x128xf32> to vector<2x32xf32>
    %864 = vector.extract_strided_slice %861 {offsets = [0, 64], sizes = [2, 32], strides = [1, 1]} : vector<2x128xf32> to vector<2x32xf32>
    %865 = vector.extract_strided_slice %860 {offsets = [0, 96], sizes = [2, 32], strides = [1, 1]} : vector<2x128xf32> to vector<2x32xf32>
    %866 = arith.mulf %863, %762 : vector<2x32xf32>
    %867 = arith.mulf %862, %864 : vector<2x32xf32>
    %868 = arith.addf %866, %867 : vector<2x32xf32>
    %869 = math.tanh %868 : vector<2x32xf32>
    %870 = arith.mulf %865, %869 : vector<2x32xf32>
    %c1_316 = arith.constant 1 : index
    %c6_317 = arith.constant 6 : index
    %c0_318 = arith.constant 0 : index
    %c0_319 = arith.constant 0 : index
    %871 = vector.load %arg0[%c1_316, %c6_317, %c0_318, %c0_319] : memref<2x8x2x8xf32, #tpu.memory_space<vmem>>, vector<1x1x2x8xf32>
    %872 = vector.shape_cast %871 : vector<1x1x2x8xf32> to vector<2x8xf32>
    %c1_320 = arith.constant 1 : index
    %c6_321 = arith.constant 6 : index
    %c0_322 = arith.constant 0 : index
    %c0_323 = arith.constant 0 : index
    %873 = vector.load %arg1[%c1_320, %c6_321, %c0_322, %c0_323] : memref<2x8x2x8xf32, #tpu.memory_space<vmem>>, vector<1x1x2x8xf32>
    %874 = vector.shape_cast %873 : vector<1x1x2x8xf32> to vector<2x8xf32>
    %c1_324 = arith.constant 1 : index
    %c6_325 = arith.constant 6 : index
    %c0_326 = arith.constant 0 : index
    %c0_327 = arith.constant 0 : index
    %875 = vector.load %arg2[%c1_324, %c6_325, %c0_326, %c0_327] : memref<2x8x2x8xf32, #tpu.memory_space<vmem>>, vector<1x1x2x8xf32>
    %876 = vector.shape_cast %875 : vector<1x1x2x8xf32> to vector<2x8xf32>
    %877 = arith.mulf %817, %162 : vector<2x32xf32>
    %878 = arith.truncf %877 : vector<2x32xf32> to vector<2x32xbf16>
    %cst_328 = arith.constant dense<0.000000e+00> : vector<2x136xf32>
    %879 = tpu.matmul %878, %143, %cst_328 {dimension_numbers = #tpu.dot_dimension_numbers<[1], [0], [0], [1], [0, 0, 1, 1], [], []>} : vector<2x32xbf16>, vector<32x136xbf16>, vector<2x136xf32> -> vector<2x136xf32>
    %880 = vector.extract_strided_slice %879 {offsets = [0, 128], sizes = [2, 8], strides = [1, 1]} : vector<2x136xf32> to vector<2x8xf32>
    %881 = arith.addf %880, %151 : vector<2x8xf32>
    %882 = arith.subf %872, %881 : vector<2x8xf32>
    %883 = arith.mulf %874, %882 : vector<2x8xf32>
    %884 = arith.addf %881, %883 : vector<2x8xf32>
    %885 = arith.truncf %884 : vector<2x8xf32> to vector<2x8xbf16>
    %cst_329 = arith.constant dense<0.000000e+00> : vector<2x8xf32>
    %886 = tpu.matmul %885, %145, %cst_329 {dimension_numbers = #tpu.dot_dimension_numbers<[1], [0], [0], [1], [0, 0, 1, 1], [], []>} : vector<2x8xbf16>, vector<8x8xbf16>, vector<2x8xf32> -> vector<2x8xf32>
    %887 = arith.addf %886, %155 : vector<2x8xf32>
    %888 = arith.subf %887, %881 : vector<2x8xf32>
    %889 = arith.mulf %170, %888 : vector<2x8xf32>
    %890 = arith.addf %881, %889 : vector<2x8xf32>
    %891 = arith.subf %872, %881 : vector<2x8xf32>
    %892 = math.absf %891 : vector<2x8xf32>
    %893 = arith.subf %872, %887 : vector<2x8xf32>
    %894 = math.absf %893 : vector<2x8xf32>
    %895 = arith.addf %892, %894 : vector<2x8xf32>
    %896 = arith.subf %872, %890 : vector<2x8xf32>
    %897 = math.absf %896 : vector<2x8xf32>
    %898 = arith.addf %895, %897 : vector<2x8xf32>
    %899 = arith.mulf %898, %876 : vector<2x8xf32>
    %900 = arith.addf %794, %899 : vector<2x8xf32>
    %901 = arith.subf %872, %890 : vector<2x8xf32>
    %902 = arith.mulf %874, %901 : vector<2x8xf32>
    %903 = arith.addf %890, %902 : vector<2x8xf32>
    %904 = arith.truncf %903 : vector<2x8xf32> to vector<2x8xbf16>
    %cst_330 = arith.constant dense<0.000000e+00> : vector<2x128xf32>
    %905 = tpu.matmul %904, %147, %cst_330 {dimension_numbers = #tpu.dot_dimension_numbers<[1], [0], [0], [1], [0, 0, 1, 1], [], []>} : vector<2x8xbf16>, vector<8x128xbf16>, vector<2x128xf32> -> vector<2x128xf32>
    %906 = arith.addf %905, %178 : vector<2x128xf32>
    %907 = vector.extract_strided_slice %879 {offsets = [0, 0], sizes = [2, 128], strides = [1, 1]} : vector<2x136xf32> to vector<2x128xf32>
    %908 = arith.addf %906, %907 : vector<2x128xf32>
    %909 = arith.negf %908 : vector<2x128xf32>
    %910 = math.exp %909 : vector<2x128xf32>
    %cst_331 = arith.constant 1.000000e+00 : f32
    %911 = vector.broadcast %cst_331 : f32 to vector<2x128xf32>
    %912 = arith.addf %911, %910 : vector<2x128xf32>
    %913 = arith.divf %911, %912 : vector<2x128xf32>
    %914 = math.tanh %908 : vector<2x128xf32>
    %915 = vector.extract_strided_slice %913 {offsets = [0, 0], sizes = [2, 32], strides = [1, 1]} : vector<2x128xf32> to vector<2x32xf32>
    %916 = vector.extract_strided_slice %913 {offsets = [0, 32], sizes = [2, 32], strides = [1, 1]} : vector<2x128xf32> to vector<2x32xf32>
    %917 = vector.extract_strided_slice %914 {offsets = [0, 64], sizes = [2, 32], strides = [1, 1]} : vector<2x128xf32> to vector<2x32xf32>
    %918 = vector.extract_strided_slice %913 {offsets = [0, 96], sizes = [2, 32], strides = [1, 1]} : vector<2x128xf32> to vector<2x32xf32>
    %919 = arith.mulf %916, %815 : vector<2x32xf32>
    %920 = arith.mulf %915, %917 : vector<2x32xf32>
    %921 = arith.addf %919, %920 : vector<2x32xf32>
    %922 = math.tanh %921 : vector<2x32xf32>
    %923 = arith.mulf %918, %922 : vector<2x32xf32>
    %c0_332 = arith.constant 0 : index
    %c7 = arith.constant 7 : index
    %c0_333 = arith.constant 0 : index
    %c0_334 = arith.constant 0 : index
    %924 = vector.load %arg0[%c0_332, %c7, %c0_333, %c0_334] : memref<2x8x2x8xf32, #tpu.memory_space<vmem>>, vector<1x1x2x8xf32>
    %925 = vector.shape_cast %924 : vector<1x1x2x8xf32> to vector<2x8xf32>
    %c0_335 = arith.constant 0 : index
    %c7_336 = arith.constant 7 : index
    %c0_337 = arith.constant 0 : index
    %c0_338 = arith.constant 0 : index
    %926 = vector.load %arg1[%c0_335, %c7_336, %c0_337, %c0_338] : memref<2x8x2x8xf32, #tpu.memory_space<vmem>>, vector<1x1x2x8xf32>
    %927 = vector.shape_cast %926 : vector<1x1x2x8xf32> to vector<2x8xf32>
    %c0_339 = arith.constant 0 : index
    %c7_340 = arith.constant 7 : index
    %c0_341 = arith.constant 0 : index
    %c0_342 = arith.constant 0 : index
    %928 = vector.load %arg2[%c0_339, %c7_340, %c0_341, %c0_342] : memref<2x8x2x8xf32, #tpu.memory_space<vmem>>, vector<1x1x2x8xf32>
    %929 = vector.shape_cast %928 : vector<1x1x2x8xf32> to vector<2x8xf32>
    %930 = arith.mulf %870, %73 : vector<2x32xf32>
    %931 = arith.truncf %930 : vector<2x32xf32> to vector<2x32xbf16>
    %cst_343 = arith.constant dense<0.000000e+00> : vector<2x136xf32>
    %932 = tpu.matmul %931, %53, %cst_343 {dimension_numbers = #tpu.dot_dimension_numbers<[1], [0], [0], [1], [0, 0, 1, 1], [], []>} : vector<2x32xbf16>, vector<32x136xbf16>, vector<2x136xf32> -> vector<2x136xf32>
    %933 = vector.extract_strided_slice %932 {offsets = [0, 128], sizes = [2, 8], strides = [1, 1]} : vector<2x136xf32> to vector<2x8xf32>
    %934 = arith.addf %933, %61 : vector<2x8xf32>
    %935 = arith.subf %925, %934 : vector<2x8xf32>
    %936 = arith.mulf %927, %935 : vector<2x8xf32>
    %937 = arith.addf %934, %936 : vector<2x8xf32>
    %938 = arith.truncf %937 : vector<2x8xf32> to vector<2x8xbf16>
    %cst_344 = arith.constant dense<0.000000e+00> : vector<2x8xf32>
    %939 = tpu.matmul %938, %55, %cst_344 {dimension_numbers = #tpu.dot_dimension_numbers<[1], [0], [0], [1], [0, 0, 1, 1], [], []>} : vector<2x8xbf16>, vector<8x8xbf16>, vector<2x8xf32> -> vector<2x8xf32>
    %940 = arith.addf %939, %65 : vector<2x8xf32>
    %941 = arith.subf %940, %934 : vector<2x8xf32>
    %942 = arith.mulf %81, %941 : vector<2x8xf32>
    %943 = arith.addf %934, %942 : vector<2x8xf32>
    %944 = arith.subf %925, %934 : vector<2x8xf32>
    %945 = math.absf %944 : vector<2x8xf32>
    %946 = arith.subf %925, %940 : vector<2x8xf32>
    %947 = math.absf %946 : vector<2x8xf32>
    %948 = arith.addf %945, %947 : vector<2x8xf32>
    %949 = arith.subf %925, %943 : vector<2x8xf32>
    %950 = math.absf %949 : vector<2x8xf32>
    %951 = arith.addf %948, %950 : vector<2x8xf32>
    %952 = arith.mulf %951, %929 : vector<2x8xf32>
    %953 = arith.addf %847, %952 : vector<2x8xf32>
    %954 = arith.subf %925, %943 : vector<2x8xf32>
    %955 = arith.mulf %927, %954 : vector<2x8xf32>
    %956 = arith.addf %943, %955 : vector<2x8xf32>
    %957 = arith.truncf %956 : vector<2x8xf32> to vector<2x8xbf16>
    %cst_345 = arith.constant dense<0.000000e+00> : vector<2x128xf32>
    %958 = tpu.matmul %957, %57, %cst_345 {dimension_numbers = #tpu.dot_dimension_numbers<[1], [0], [0], [1], [0, 0, 1, 1], [], []>} : vector<2x8xbf16>, vector<8x128xbf16>, vector<2x128xf32> -> vector<2x128xf32>
    %959 = arith.addf %958, %89 : vector<2x128xf32>
    %960 = vector.extract_strided_slice %932 {offsets = [0, 0], sizes = [2, 128], strides = [1, 1]} : vector<2x136xf32> to vector<2x128xf32>
    %961 = arith.addf %959, %960 : vector<2x128xf32>
    %962 = arith.negf %961 : vector<2x128xf32>
    %963 = math.exp %962 : vector<2x128xf32>
    %cst_346 = arith.constant 1.000000e+00 : f32
    %964 = vector.broadcast %cst_346 : f32 to vector<2x128xf32>
    %965 = arith.addf %964, %963 : vector<2x128xf32>
    %966 = arith.divf %964, %965 : vector<2x128xf32>
    %967 = math.tanh %961 : vector<2x128xf32>
    %968 = vector.extract_strided_slice %966 {offsets = [0, 0], sizes = [2, 32], strides = [1, 1]} : vector<2x128xf32> to vector<2x32xf32>
    %969 = vector.extract_strided_slice %966 {offsets = [0, 32], sizes = [2, 32], strides = [1, 1]} : vector<2x128xf32> to vector<2x32xf32>
    %970 = vector.extract_strided_slice %967 {offsets = [0, 64], sizes = [2, 32], strides = [1, 1]} : vector<2x128xf32> to vector<2x32xf32>
    %971 = vector.extract_strided_slice %966 {offsets = [0, 96], sizes = [2, 32], strides = [1, 1]} : vector<2x128xf32> to vector<2x32xf32>
    %972 = arith.mulf %969, %868 : vector<2x32xf32>
    %973 = arith.mulf %968, %970 : vector<2x32xf32>
    %974 = arith.addf %972, %973 : vector<2x32xf32>
    %975 = math.tanh %974 : vector<2x32xf32>
    %976 = arith.mulf %971, %975 : vector<2x32xf32>
    %c1_347 = arith.constant 1 : index
    %c7_348 = arith.constant 7 : index
    %c0_349 = arith.constant 0 : index
    %c0_350 = arith.constant 0 : index
    %977 = vector.load %arg0[%c1_347, %c7_348, %c0_349, %c0_350] : memref<2x8x2x8xf32, #tpu.memory_space<vmem>>, vector<1x1x2x8xf32>
    %978 = vector.shape_cast %977 : vector<1x1x2x8xf32> to vector<2x8xf32>
    %c1_351 = arith.constant 1 : index
    %c7_352 = arith.constant 7 : index
    %c0_353 = arith.constant 0 : index
    %c0_354 = arith.constant 0 : index
    %979 = vector.load %arg1[%c1_351, %c7_352, %c0_353, %c0_354] : memref<2x8x2x8xf32, #tpu.memory_space<vmem>>, vector<1x1x2x8xf32>
    %980 = vector.shape_cast %979 : vector<1x1x2x8xf32> to vector<2x8xf32>
    %c1_355 = arith.constant 1 : index
    %c7_356 = arith.constant 7 : index
    %c0_357 = arith.constant 0 : index
    %c0_358 = arith.constant 0 : index
    %981 = vector.load %arg2[%c1_355, %c7_356, %c0_357, %c0_358] : memref<2x8x2x8xf32, #tpu.memory_space<vmem>>, vector<1x1x2x8xf32>
    %982 = vector.shape_cast %981 : vector<1x1x2x8xf32> to vector<2x8xf32>
    %983 = arith.mulf %923, %163 : vector<2x32xf32>
    %984 = arith.truncf %983 : vector<2x32xf32> to vector<2x32xbf16>
    %cst_359 = arith.constant dense<0.000000e+00> : vector<2x136xf32>
    %985 = tpu.matmul %984, %143, %cst_359 {dimension_numbers = #tpu.dot_dimension_numbers<[1], [0], [0], [1], [0, 0, 1, 1], [], []>} : vector<2x32xbf16>, vector<32x136xbf16>, vector<2x136xf32> -> vector<2x136xf32>
    %986 = vector.extract_strided_slice %985 {offsets = [0, 128], sizes = [2, 8], strides = [1, 1]} : vector<2x136xf32> to vector<2x8xf32>
    %987 = arith.addf %986, %151 : vector<2x8xf32>
    %988 = arith.subf %978, %987 : vector<2x8xf32>
    %989 = arith.mulf %980, %988 : vector<2x8xf32>
    %990 = arith.addf %987, %989 : vector<2x8xf32>
    %991 = arith.truncf %990 : vector<2x8xf32> to vector<2x8xbf16>
    %cst_360 = arith.constant dense<0.000000e+00> : vector<2x8xf32>
    %992 = tpu.matmul %991, %145, %cst_360 {dimension_numbers = #tpu.dot_dimension_numbers<[1], [0], [0], [1], [0, 0, 1, 1], [], []>} : vector<2x8xbf16>, vector<8x8xbf16>, vector<2x8xf32> -> vector<2x8xf32>
    %993 = arith.addf %992, %155 : vector<2x8xf32>
    %994 = arith.subf %993, %987 : vector<2x8xf32>
    %995 = arith.mulf %171, %994 : vector<2x8xf32>
    %996 = arith.addf %987, %995 : vector<2x8xf32>
    %997 = arith.subf %978, %987 : vector<2x8xf32>
    %998 = math.absf %997 : vector<2x8xf32>
    %999 = arith.subf %978, %993 : vector<2x8xf32>
    %1000 = math.absf %999 : vector<2x8xf32>
    %1001 = arith.addf %998, %1000 : vector<2x8xf32>
    %1002 = arith.subf %978, %996 : vector<2x8xf32>
    %1003 = math.absf %1002 : vector<2x8xf32>
    %1004 = arith.addf %1001, %1003 : vector<2x8xf32>
    %1005 = arith.mulf %1004, %982 : vector<2x8xf32>
    %1006 = arith.addf %900, %1005 : vector<2x8xf32>
    %1007 = arith.subf %978, %996 : vector<2x8xf32>
    %1008 = arith.mulf %980, %1007 : vector<2x8xf32>
    %1009 = arith.addf %996, %1008 : vector<2x8xf32>
    %1010 = arith.truncf %1009 : vector<2x8xf32> to vector<2x8xbf16>
    %cst_361 = arith.constant dense<0.000000e+00> : vector<2x128xf32>
    %1011 = tpu.matmul %1010, %147, %cst_361 {dimension_numbers = #tpu.dot_dimension_numbers<[1], [0], [0], [1], [0, 0, 1, 1], [], []>} : vector<2x8xbf16>, vector<8x128xbf16>, vector<2x128xf32> -> vector<2x128xf32>
    %1012 = arith.addf %1011, %179 : vector<2x128xf32>
    %1013 = vector.extract_strided_slice %985 {offsets = [0, 0], sizes = [2, 128], strides = [1, 1]} : vector<2x136xf32> to vector<2x128xf32>
    %1014 = arith.addf %1012, %1013 : vector<2x128xf32>
    %1015 = arith.negf %1014 : vector<2x128xf32>
    %1016 = math.exp %1015 : vector<2x128xf32>
    %cst_362 = arith.constant 1.000000e+00 : f32
    %1017 = vector.broadcast %cst_362 : f32 to vector<2x128xf32>
    %1018 = arith.addf %1017, %1016 : vector<2x128xf32>
    %1019 = arith.divf %1017, %1018 : vector<2x128xf32>
    %1020 = math.tanh %1014 : vector<2x128xf32>
    %1021 = vector.extract_strided_slice %1019 {offsets = [0, 0], sizes = [2, 32], strides = [1, 1]} : vector<2x128xf32> to vector<2x32xf32>
    %1022 = vector.extract_strided_slice %1019 {offsets = [0, 32], sizes = [2, 32], strides = [1, 1]} : vector<2x128xf32> to vector<2x32xf32>
    %1023 = vector.extract_strided_slice %1020 {offsets = [0, 64], sizes = [2, 32], strides = [1, 1]} : vector<2x128xf32> to vector<2x32xf32>
    %1024 = vector.extract_strided_slice %1019 {offsets = [0, 96], sizes = [2, 32], strides = [1, 1]} : vector<2x128xf32> to vector<2x32xf32>
    %1025 = arith.mulf %1022, %921 : vector<2x32xf32>
    %1026 = arith.mulf %1021, %1023 : vector<2x32xf32>
    %1027 = arith.addf %1025, %1026 : vector<2x32xf32>
    %1028 = math.tanh %1027 : vector<2x32xf32>
    %1029 = arith.mulf %1024, %1028 : vector<2x32xf32>
    %1030 = tpu.concatenate %214, %320, %426, %532, %638, %744, %850, %956, %267, %373, %479, %585, %691, %797, %903, %1009 in 1 : vector<2x8xf32>, vector<2x8xf32>, vector<2x8xf32>, vector<2x8xf32>, vector<2x8xf32>, vector<2x8xf32>, vector<2x8xf32>, vector<2x8xf32>, vector<2x8xf32>, vector<2x8xf32>, vector<2x8xf32>, vector<2x8xf32>, vector<2x8xf32>, vector<2x8xf32>, vector<2x8xf32>, vector<2x8xf32> -> vector<2x128xf32>
    %c0_363 = arith.constant 0 : index
    %c0_364 = arith.constant 0 : index
    %1031 = vector.load %arg21[%c0_363, %c0_364] : memref<2x128xf32, #tpu.memory_space<vmem>>, vector<2x128xf32>
    tpu.vector_store %arg21[%c0_363, %c0_364], %1030 {strides = array<i32>} : memref<2x128xf32, #tpu.memory_space<vmem>>, vector<2x128xf32>,
    %c0_365 = arith.constant 0 : index
    %c0_366 = arith.constant 0 : index
    %c0_367 = arith.constant 0 : index
    %1032 = vector.load %arg19[%c0_365, %c0_366, %c0_367] : memref<2x32x1xf32, #tpu.memory_space<vmem>>, vector<1x32x1xf32>
    %1033 = vector.shape_cast %1032 : vector<1x32x1xf32> to vector<32x1xf32>
    %cst_368 = arith.constant dense<0.000000e+00> : vector<2x1xf32>
    %1034 = tpu.matmul %976, %1033, %cst_368 {dimension_numbers = #tpu.dot_dimension_numbers<[1], [0], [0], [1], [0, 0, 1, 1], [], []>} : vector<2x32xf32>, vector<32x1xf32>, vector<2x1xf32> -> vector<2x1xf32>
    %c0_369 = arith.constant 0 : index
    %c0_370 = arith.constant 0 : index
    %c0_371 = arith.constant 0 : index
    %1035 = vector.load %arg20[%c0_369, %c0_370, %c0_371] : memref<2x1x1xf32, #tpu.memory_space<vmem>>, vector<1x1x1xf32>
    %1036 = vector.shape_cast %1035 : vector<1x1x1xf32> to vector<1x1xf32>
    %1037 = vector.broadcast %1036 : vector<1x1xf32> to vector<2x1xf32>
    %1038 = arith.addf %1034, %1037 : vector<2x1xf32>
    %1039 = vector.shape_cast %953 : vector<2x8xf32> to vector<1x2x8xf32>
    %cst_372 = arith.constant dense<0.000000e+00> : vector<1xf32>
    %1040 = vector.multi_reduction <add>, %1039, %cst_372 [1, 2] : vector<1x2x8xf32> to vector<1xf32>
    %1041 = vector.shape_cast %1040 : vector<1xf32> to vector<1x1x1xf32>
    %1042 = vector.extract %1041[0, 0, 0] : f32 from vector<1x1x1xf32>
    %1043 = vector.broadcast %1042 : f32 to vector<1x1xf32>
    %c1_373 = arith.constant 1 : index
    %c0_374 = arith.constant 0 : index
    %c0_375 = arith.constant 0 : index
    %1044 = vector.load %arg19[%c1_373, %c0_374, %c0_375] : memref<2x32x1xf32, #tpu.memory_space<vmem>>, vector<1x32x1xf32>
    %1045 = vector.shape_cast %1044 : vector<1x32x1xf32> to vector<32x1xf32>
    %cst_376 = arith.constant dense<0.000000e+00> : vector<2x1xf32>
    %1046 = tpu.matmul %1029, %1045, %cst_376 {dimension_numbers = #tpu.dot_dimension_numbers<[1], [0], [0], [1], [0, 0, 1, 1], [], []>} : vector<2x32xf32>, vector<32x1xf32>, vector<2x1xf32> -> vector<2x1xf32>
    %c1_377 = arith.constant 1 : index
    %c0_378 = arith.constant 0 : index
    %c0_379 = arith.constant 0 : index
    %1047 = vector.load %arg20[%c1_377, %c0_378, %c0_379] : memref<2x1x1xf32, #tpu.memory_space<vmem>>, vector<1x1x1xf32>
    %1048 = vector.shape_cast %1047 : vector<1x1x1xf32> to vector<1x1xf32>
    %1049 = vector.broadcast %1048 : vector<1x1xf32> to vector<2x1xf32>
    %1050 = arith.addf %1046, %1049 : vector<2x1xf32>
    %1051 = vector.shape_cast %1006 : vector<2x8xf32> to vector<1x2x8xf32>
    %cst_380 = arith.constant dense<0.000000e+00> : vector<1xf32>
    %1052 = vector.multi_reduction <add>, %1051, %cst_380 [1, 2] : vector<1x2x8xf32> to vector<1xf32>
    %1053 = vector.shape_cast %1052 : vector<1xf32> to vector<1x1x1xf32>
    %1054 = vector.extract %1053[0, 0, 0] : f32 from vector<1x1x1xf32>
    %1055 = vector.broadcast %1054 : f32 to vector<1x1xf32>
    %1056 = tpu.concatenate %1038, %1050 in 1 : vector<2x1xf32>, vector<2x1xf32> -> vector<2x2xf32>
    %c0_381 = arith.constant 0 : index
    %c0_382 = arith.constant 0 : index
    %1057 = vector.load %arg22[%c0_381, %c0_382] : memref<2x2xf32, #tpu.memory_space<vmem>>, vector<2x2xf32>
    tpu.vector_store %arg22[%c0_381, %c0_382], %1056 {strides = array<i32>} : memref<2x2xf32, #tpu.memory_space<vmem>>, vector<2x2xf32>,
    %1058 = tpu.concatenate %1043, %1055 in 1 : vector<1x1xf32>, vector<1x1xf32> -> vector<1x2xf32>
    %c0_383 = arith.constant 0 : index
    %c0_384 = arith.constant 0 : index
    %1059 = vector.load %arg23[%c0_383, %c0_384] : memref<1x2xf32, #tpu.memory_space<vmem>>, vector<1x2xf32>
    tpu.vector_store %arg23[%c0_383, %c0_384], %1058 {strides = array<i32>} : memref<1x2xf32, #tpu.memory_space<vmem>>, vector<1x2xf32>,
    return
  }
}

</mosaic_0001>

<bundles_post_ra>
// kernel: custom-call.9
= control target key start
LH: loop header
LB: loop body
LE: loop exit
PB: predicated region body
PF: predicated region fallthrough
CT: control target
= control target key end

     0   :  { %s6_s0 = inlined_call_operand.vmem [shape: f32[2,8], index: 0, kind: output, shape index: {}]  }

// kernel: _lambda_.1
= control target key start
LH: loop header
LB: loop body
LE: loop exit
PB: predicated region body
PF: predicated region fallthrough
CT: control target
= control target key end

     0   :  { %vm84_vm0 = vcmask 64512   ;;  %v5173_v32 = vmov 0   ;;  %vm944_vm1 = vcmask 261120   ;;  %vm997_vm2 = vcmask 1043456   ;;  %s5181_s30 = smov 48   ;;  %s5182_s25 = smov 80   ;;  %s6462_s5 = inlined_call_operand.vmem [shape: f32[2,8,32], index: 5, kind: input, shape index: {}]   ;;  %s6463_s3 = inlined_call_operand.vmem [shape: f32[2,16,8], index: 3, kind: input, shape index: {}]   ;;  %s6464_s7 = inlined_call_operand.vmem [shape: f32[2,1,8], index: 7, kind: input, shape index: {}]   ;;  %s6465_s8 = inlined_call_operand.vmem [shape: f32[2,1,8], index: 8, kind: input, shape index: {}]   ;;  %s6466_s17 = inlined_call_operand.vmem [shape: f32[2,8,128], index: 17, kind: input, shape index: {}]   ;;  %s6467_s4 = inlined_call_operand.vmem [shape: f32[2,16,8], index: 4, kind: input, shape index: {}]   ;;  %s6468_s12 = inlined_call_operand.vmem [shape: bf16[2,32,136], index: 12, kind: input, shape index: {}]   ;;  %s6469_s10 = inlined_call_operand.vmem [shape: f32[2,8,8], index: 10, kind: input, shape index: {}]   ;;  %s6470_s9 = inlined_call_operand.vmem [shape: f32[2,8,8], index: 9, kind: input, shape index: {}]   ;;  %s6471_s6 = inlined_call_operand.vmem [shape: f32[2,1,32], index: 6, kind: input, shape index: {}]   ;;  %s6472_s18 = inlined_call_operand.vmem [shape: f32[2,1,128], index: 18, kind: input, shape index: {}]   ;;  %s6473_s14 = inlined_call_operand.vmem [shape: bf16[2,8,8], index: 14, kind: input, shape index: {}]   ;;  %s6474_s11 = inlined_call_operand.vmem [shape: f32[2,1,8], index: 11, kind: input, shape index: {}]   ;;  %s6475_s13 = inlined_call_operand.vmem [shape: f32[2,1,8], index: 13, kind: input, shape index: {}]   ;;  %s6476_s0 = inlined_call_operand.vmem [shape: f32[2,8,2,8], index: 0, kind: input, shape index: {}]   ;;  %s6477_s1 = inlined_call_operand.vmem [shape: f32[2,8,2,8], index: 1, kind: input, shape index: {}]   ;;  %s6478_s16 = inlined_call_operand.vmem [shape: bf16[2,8,128], index: 16, kind: input, shape index: {}]   ;;  %s6479_s15 = inlined_call_operand.vmem [shape: f32[2,1,8], index: 15, kind: input, shape index: {}]   ;;  %s6480_s2 = inlined_call_operand.vmem [shape: f32[2,8,2,8], index: 2, kind: input, shape index: {}]   ;;  %s6481_s19 = inlined_call_operand.vmem [shape: f32[2,32,1], index: 19, kind: input, shape index: {}]   ;;  %s6482_s21 = inlined_call_operand.vmem [shape: f32[2,128], index: 21, kind: output, shape index: {0}]   ;;  %s6483_s23 = inlined_call_operand.vmem [shape: f32[1,2], index: 23, kind: output, shape index: {2}]   ;;  %s6484_s20 = inlined_call_operand.vmem [shape: f32[2,1,1], index: 20, kind: input, shape index: {}]   ;;  %s6485_s22 = inlined_call_operand.vmem [shape: f32[2,2], index: 22, kind: output, shape index: {1}]  }
   0x1   :  { %6494 = sst [smem:[#allocation2_spill]] %s6462_s5  ;;  %v200_v36 = vld [vmem:[%s6470_s9] sm:$0xff]  ;;  %v4437_v46 = vld [vmem:[%s6470_s9 + $0x8] sm:$0xff]  ;;  %vm5175_vm3 = vmmov 0   ;;  %vm4273_vm4 = vcmask 58368   ;;  %s5180_s9 = smov 16  }
   0x2   :  { %6495 = sst [smem:[#allocation3_spill]] %s6463_s3  ;;  %s6502_s24 = sld [smem:[#allocation2_spill]]  ;;  %v4407_v49 = vld [vmem:[%s6471_s6] ss:$0 sm:$0xff]  ;;  %vm4159_vm5 = vcmask 130048   ;;  %vm4161_vm6 = vcmask 195584  }
   0x3   :  { %6496 = sst [smem:[#allocation4_spill]] %s6464_s7  ;;  %s6503_s3 = sld [smem:[#allocation3_spill]]  ;;  %v5430_v60 = vld [vmem:[%s6472_s18] ss:$0 sm:$0xff]  ;;  %vm4164_vm7 = vcmask 326656   ;;  %vm4166_vm8 = vcmask 392192  }
   0x4   :  { %6497 = sst [smem:[#allocation5_spill]] %s6465_s8  ;;  %s6504_s29 = sld [smem:[#allocation4_spill]]  ;;  %vm4168_vm9 = vcmask 457728   ;;  %vm4170_vm10 = vcmask 523264   ;;  %vm4172_vm11 = vcmask 588800   ;;  %vm4174_vm12 = vcmask 654336  }
   0x5   :  { %6498 = sst [smem:[#allocation6_spill]] %s6466_s17  ;;  %s6505_s17 = sld [smem:[#allocation5_spill]]  ;;  %vm4176_vm13 = vcmask 719872   ;;  %vm4178_vm14 = vcmask 785408   ;;  %vm4180_vm15 = vcmask 850944  }
   0x6   :  { %6499 = sst [smem:[#allocation7_spill]] %s6467_s4  ;;  %s6506_s27 = sld [smem:[#allocation6_spill]] }
   0x7   :  { %6500 = sst [smem:[#allocation8_spill]] %s6468_s12  ;;  %s6507_s8 = sld [smem:[#allocation7_spill]] }
   0x8   :  { %6501 = sst [smem:[#allocation9_spill]] %s6469_s10  ;;  %v76_v0 = vld [vmem:[%s6502_s24] sm:$0xff]  ;;  %v4428_v17 = vld [vmem:[%s6502_s24 + $0x8] sm:$0xff]  ;;  %s6508_s5 = sld [smem:[#allocation8_spill]] }
   0x9   :  { %v72_v1 = vld [vmem:[%s6503_s3] sm:$0xff]  ;;  %v73_v2 = vld [vmem:[%s6503_s3 + $0x8] sm:$0xff]  ;;  %4686 = vmatprep.subr.mxu0 %v76_v0  ;;  %v4425_v3 = vld [vmem:[%s6503_s3 + $0x18] sm:$0xff]  ;;  %s6509_s12 = sld [smem:[#allocation9_spill]]  ;;  %s5176_s7 = smov 64  }
   0xa   :  { %4688 = vmatprep.mubr.msk.f32.mxu0 %vm84_vm0, %v72_v1  ;;  %4687 = vmatpush3.msra.mxu0 %v76_v0  ;;  %v4434_v4 = vld [vmem:[%s6504_s29 + $0x1] ss:$0 sm:$0xff]  ;;  %v4410_v8 = vld [vmem:[%s6504_s29] ss:$0 sm:$0xff]  ;;  %v4424_v18 = vld [vmem:[%s6503_s3 + $0x10] sm:$0xff]  ;;  %s5186_s28 = smov 40  }
   0xb   :  { %v4436_v5 = vld [vmem:[%s6505_s17 + $0x1] ss:$0 sm:$0xff]  ;;  %v602_v6 = vmul.f32 %v4434_v4, %v4425_v3  ;;  %4689 = vmatmul.mubr.msk.f32.vlgmr.msra.gmra.mrb[0].mxu0 %vm84_vm0, %v73_v2  ;;  %v181_v9 = vmul.f32 %v4410_v8, %v72_v1  ;;  %v4411_v10 = vld [vmem:[%s6505_s17] ss:$0 sm:$0xff]  ;;  %v182_v14 = vmul.f32 %v4410_v8, %v73_v2  ;;  %v601_v21 = vmul.f32 %v4434_v4, %v4424_v18 }
   0xc   :  { %v385_v12 = vld [vmem:[%s6506_s27] sm:$0xff]  ;;  %v4447_v22 = vld [vmem:[%s6506_s27 + $0x8] sm:$0xff] }
   0xd   :  { %v5333_v7 = vadd.f32 %v4436_v5, %v602_v6  ;;  %v190_v11 = vadd.f32 %v4411_v10, %v181_v9  ;;  %4701 = vmatprep.subr.mxu0 %v385_v12  ;;  %v74_v13 = vld [vmem:[%s6507_s8] sm:$0xff]  ;;  %v75_v15 = vld [vmem:[%s6507_s8 + $0x8] sm:$0xff]  ;;  %v191_v19 = vadd.f32 %v4411_v10, %v182_v14  ;;  %v4426_v23 = vld [vmem:[%s6507_s8 + $0x10] sm:$0xff]  ;;  %v611_v28 = vadd.f32 %v4436_v5, %v601_v21 }
   0xe   :  { %4702 = vmatpush3.msra.mxu0 %v385_v12  ;;  %4703 = vmatprep.mubr.msk.f32.mxu0 %vm84_vm0, %v74_v13  ;;  %v4427_v24 = vld [vmem:[%s6507_s8 + $0x18] sm:$0xff]  ;;  %v5374_v26 = vld [vmem:[%s6508_s5 + $0x4] ss:$8 sps:$4 sm:$0xff]   ;;  %v5379_v29 = vld [vmem:[%s6508_s5] ss:$8 sps:$4 sm:$0xff]   ;;  %v5174_v21 = vmov 0.0  }
   0xf   :  { %v192_v16 = vmax.f32 %v190_v11, 0.0  ;;  %4704 = vmatmul.mubr.msk.f32.vlgmr.msra.gmra.mrb[2].mxu0 %vm84_vm0, %v75_v15  ;;  %4693 = vmatprep.mubr.msk.f32.mxu1 %vm84_vm0, %v74_v13  ;;  %v193_v25 = vmax.f32 %v191_v19, 0.0  ;;  %v5386_v30 = vld [vmem:[%s6508_s5 + $0x14] ss:$8 sps:$4 sm:$0xff]   ;;  %v5391_v31 = vld [vmem:[%s6508_s5 + $0x10] ss:$8 sps:$4 sm:$0xff]  }
  0x10   :  { %4706 = vmatprep.subr.mxu0 %v4428_v17  ;;  %4708 = vmatprep.mubr.msk.f32.mxu0 %vm84_vm0, %v4424_v18  ;;  %v201_v35 = vld [vmem:[%s6509_s12] sm:$0xff]  ;;  %v613_v39 = vmax.f32 %v611_v28, 0.0  ;;  %v614_v41 = vmax.f32 %v5333_v7, 0.0  ;;  %v4438_v45 = vld [vmem:[%s6509_s12 + $0x8] sm:$0xff] }
  0x11   :  { %4707 = vmatpush3.msra.mxu0 %v4428_v17  ;;  %v194_v20 = vsub.f32 0.0, %v192_v16  ;;  %v195_v33 = vsub.f32 0.0, %v193_v25  ;;  %4691 = vmatprep.subr.mxu1 %v201_v35  ;;  %v4430_v0 = vld [vmem:[%s6471_s6 + $0x1] ss:$0 sm:$0xff]  ;;  %v5452_v13 = vld [vmem:[%s6508_s5 + $0x24] ss:$8 sps:$4 sm:$0xff]  }
  0x12   :  { %4721 = vmatprep.subr.mxu0 %v4447_v22  ;;  %4692 = vmatpush3.msra.mxu1 %v201_v35  ;;  %v615_v40 = vsub.f32 0.0, %v613_v39  ;;  %v616_v43 = vsub.f32 0.0, %v614_v41  ;;  %v4449_v5 = vld [vmem:[%s6472_s18 + $0x1] ss:$0 sm:$0xff]  ;;  %v5471_v17 = vld [vmem:[%s6508_s5 + $0x30] ss:$8 sps:$4 sm:$0xff]  }
  0x13   :  { %4709 = vmatmul.mubr.msk.f32.vlgmr.msra.gmra.mrb[4].mxu0 %vm84_vm0, %v4425_v3  ;;  %v196_v27 = vmul.f32 1.442695, %v194_v20  ;;  %v198_v34 = vmul.f32 1.442695, %v195_v33  ;;  %4694 = vmatmul.mubr.msk.f32.vlgmr.msra.gmra.mrb[0].mxu1 %vm84_vm0, %v75_v15  ;;  %v5457_v14 = vld [vmem:[%s6508_s5 + $0x20] ss:$8 sps:$4 sm:$0xff]  }
  0x14   :  { %4723 = vmatprep.mubr.msk.f32.mxu0 %vm84_vm0, %v4426_v23  ;;  %4722 = vmatpush3.msra.mxu0 %v4447_v22  ;;  %v617_v42 = vmul.f32 1.442695, %v615_v40  ;;  %v619_v44 = vmul.f32 1.442695, %v616_v43  ;;  %v5464_v15 = vld [vmem:[%s6508_s5 + $0x34] ss:$8 sps:$4 sm:$0xff]  }
  0x15   :  { %948 = vmatprep.subr.bf16.mxu0 %v5374_v26  ;;  %4992 = vpow2.f32 %v196_v27  ;;  %4696 = vmatprep.subr.mxu1 %v200_v36  ;;  %v472_v20 = vld [vmem:[%s6473_s14] sm:$0xf]  ;;  %s5177_s6 = smov 32   ;;  %s5185_s18 = smov 24  }
  0x16   :  { %4994 = vpow2.f32 %v198_v34  ;;  %4697 = vmatpush3.msra.mxu1 %v200_v36  ;;  %v5481_v22 = vsel %vm997_vm2, %v472_v20, 0  ;;  %v4444_v28 = vld [vmem:[%s6474_s11 + $0x1] ss:$0 sm:$0xff] }
  0x17   :  { %4724 = vmatmul.mubr.msk.f32.vlgmr.msra.gmra.mrb[6].mxu0 %vm84_vm0, %v4427_v24  ;;  %4996 = vpow2.f32 %v617_v42  ;;  %4711 = vmatprep.subr.mxu1 %v4438_v45  ;;  %v919_v39 = vld [vmem:[%s6476_s0] sm:$0x3] }
  0x18   :  { %949 = vmatpush1.bf16.msra.mxu0 %v5379_v29  ;;  %980 = vmatprep.mubr.bf16.mxu0 %v5173_v32  ;;  %4998 = vpow2.f32 %v619_v44  ;;  %v920_v43 = vld [vmem:[%s6477_s1] sm:$0x3] }
  0x19   :  { %950 = vmatprep.subr.bf16.mxu0 %v5386_v30 }
  0x1c   :  { %951 = vmatpush1.bf16.msra.mxu0 %v5391_v31 }
  0x1d   :  { %1158 = vmatprep.subr.bf16.mxu0 %v5452_v13 }
  0x1f   :  { %v4993_v37 = vpop.eup %4992 }
  0x20   :  { %4698 = vmatprep.mubr.msk.f32.mxu1 %vm84_vm0, %v4993_v37  ;;  %v4995_v38 = vpop.eup %4994  ;;  %v5506_v37 = vld [vmem:[%s6475_s13] ss:$0 sm:$0xff] }
  0x21   :  { %4699 = vmatmul.mubr.msk.f32.vlgmr.msra.gmra.mrb[0].mxu1 %vm84_vm0, %v4995_v38  ;;  %v4997_v47 = vpop.eup %4996 }
  0x22   :  { %4713 = vmatprep.mubr.msk.f32.mxu1 %vm84_vm0, %v4426_v23  ;;  %4712 = vmatpush3.msra.mxu1 %v4438_v45  ;;  %v4999_v48 = vpop.eup %4998 }
  0x23   :  { %4716 = vmatprep.subr.mxu1 %v4437_v46 }
  0x25   :  { %4714 = vmatmul.mubr.msk.f32.vlgmr.msra.gmra.mrb[2].mxu1 %vm84_vm0, %v4427_v24  ;;  %v4416_v24 = vld [vmem:[%s6474_s11] ss:$0 sm:$0xff]  ;;  %s5178_s11 = smov 96  }
  0x26   :  { %4717 = vmatpush3.msra.mxu1 %v4437_v46  ;;  %4718 = vmatprep.mubr.msk.f32.mxu1 %vm84_vm0, %v4997_v47 }
  0x27   :  { %4726 = vmatprep.subr.bf16.mxu1 %v5174_v21 }
  0x2d   :  { %4719 = vmatmul.mubr.msk.f32.vlgmr.msra.gmra.mrb[2].mxu1 %vm84_vm0, %v4999_v48 }
  0x2e   :  { %4727 = vmatpush3.bf16.msra.mxu1 %v5481_v22  ;;  %4728 = vmatprep.mubr.msk.bf16.mxu1 %vm5175_vm3, %v5174_v21 }
  0x2f   :  { %4732 = vmatprep.subr.bf16.mxu1 %v5174_v21 }
  0xde   :  { %v4690_v50 = vpop.f32.mrb[0].mxu0 }
  0xdf   :  { %v5420_v51 = vadd.f32 %v4690_v50, %v4407_v49  ;;  %v157_v52 = vpop.f32.mrb[1].mxu0 }
  0xe0   :  { %v158_v53 = vadd.f32 %v4407_v49, %v157_v52 }
  0xe2   :  { %v166_v54 = vmax.f32 %v158_v53, 0.0  ;;  %v4705_v61 = vpop.f32.mrb[2].mxu0 }
  0xe3   :  { %v5433_v62 = vadd.f32 %v4705_v61, %v5430_v60  ;;  %v5435_v63 = vpop.f32.mrb[3].mxu0 }
  0xe4   :  { %v168_v55 = vsub.f32 0.0, %v166_v54  ;;  %v473_v54 = vld [vmem:[%s6478_s16] sm:$0xf] }
  0xe6   :  { %v170_v56 = vmul.f32 1.442695, %v168_v55  ;;  %v4710_v1 = vpop.f32.mrb[4].mxu0  ;;  %v5526_v55 = vsel %vm997_vm2, %v473_v54, 0 }
  0xe7   :  { %v5440_v2 = vadd.f32 %v4710_v1, %v4430_v0  ;;  %v576_v3 = vpop.f32.mrb[5].mxu0 }
  0xe8   :  { %5000 = vpow2.f32 %v170_v56  ;;  %v577_v4 = vadd.f32 %v4430_v0, %v576_v3  ;;  %v5533_v0 = vld [vmem:[%s6479_s15] ss:$0 sm:$0xff] }
  0xea   :  { %v585_v6 = vmax.f32 %v577_v4, 0.0  ;;  %v4725_v7 = vpop.f32.mrb[6].mxu0 }
  0xeb   :  { %v5445_v9 = vadd.f32 %v4725_v7, %v4449_v5  ;;  %v885_v10 = vpop.f32.mrb[7].mxu0 }
  0xec   :  { %v587_v8 = vsub.f32 0.0, %v585_v6  ;;  %v5447_v11 = vadd.f32 %v4449_v5, %v885_v10 }
  0xee   :  { %v589_v12 = vmul.f32 1.442695, %v587_v8 }
  0xf0   :  { %5002 = vpow2.f32 %v589_v12  ;;  %v5541_v12 = vld [vmem:[%s6475_s13 + $0x1] ss:$0 sm:$0xff] }
  0xf2   :  { %v5422_v57 = vpop.eup %5000 }
  0xf3   :  { %v922_v58 = vmul.f32 0.0, %v5422_v57 }
  0xf4   :  { %v4700_v23 = vpop.f32.mrb[0].mxu1 }
  0xf5   :  { %v923_v59 = vpack.c.bf16 %v922_v58, %v922_v58  ;;  %v355_v25 = vpop.f32.mrb[1].mxu1  ;;  %v5494_v27 = vadd.f32 %v4700_v23, %v4416_v24 }
  0xf6   :  { %v371_v56 = vadd.f32 %v4416_v24, %v355_v25 }
  0xf7   :  { %4466 = vmatmul.mubr.msk.bf16.vlgmr.msra.gmra.mrb[8].mxu0 %vm944_vm1, %v923_v59 }
  0xf8   :  { %1190 = vmatprep.mubr.bf16.mxu0 %v5173_v32  ;;  %1159 = vmatpush1.bf16.msra.mxu0 %v5457_v14  ;;  %v4417_v58 = vmul.f32 -1.442695, %v371_v56 }
  0xf9   :  { %1160 = vmatprep.subr.bf16.mxu0 %v5464_v15 }
  0xfa   :  { %v5466_v16 = vpop.eup %5002  ;;  %5004 = vpow2.f32 %v4417_v58 }
  0xfb   :  { %v1133_v18 = vmul.f32 0.0, %v5466_v16 }
  0xfc   :  { %1161 = vmatpush1.bf16.msra.mxu0 %v5471_v17 }
  0xfd   :  { %v1134_v19 = vpack.c.bf16 %v1133_v18, %v1133_v18  ;;  %4744 = vmatprep.subr.bf16.mxu0 %v5174_v21 }
  0xff   :  { %4477 = vmatmul.mubr.msk.bf16.vlgmr.msra.gmra.mrb[12].mxu0 %vm944_vm1, %v1134_v19 }
 0x100   :  { %4746 = vmatprep.mubr.msk.bf16.mxu0 %vm5175_vm3, %v5174_v21  ;;  %v4720_v33 = vpop.f32.mrb[2].mxu1 }
 0x101   :  { %v5499_v34 = vadd.f32 %v4720_v33, %v4444_v28  ;;  %v778_v35 = vpop.f32.mrb[3].mxu1 }
 0x102   :  { %v5501_v36 = vadd.f32 %v4444_v28, %v778_v35  ;;  %v4470_v28 = vld [vmem:[%s6476_s0 + $0x10] sm:$0x3] }
 0x104   :  { %v5005_v59 = vpop.eup %5004  ;;  %v4445_v54 = vmul.f32 -1.442695, %v5501_v36  ;;  %v5592_v36 = vld [vmem:[%s6479_s15 + $0x1] ss:$0 sm:$0xff] }
 0x105   :  { %v379_v61 = vadd.f32 1.0, %v5005_v59  ;;  %v5585_v59 = vadd.f32 %v5430_v60, %v5435_v63 }
 0x107   :  { %5006 = vrcp.f32 %v379_v61 }
 0x108   :  { %5008 = vpow2.f32 %v4445_v54 }
 0x111   :  { %v5536_v10 = vpop.eup %5006 }
 0x112   :  { %v5009_v56 = vpop.eup %5008 }
 0x113   :  { %v803_v58 = vadd.f32 1.0, %v5009_v56 }
 0x115   :  { %5010 = vrcp.f32 %v803_v58 }
 0x1ca   :  { %v5508_v38 = vpop.f32.mrb[8].mxu0 }
 0x1cb   :  { %v984_v40 = vpop.f32.mrb[9].mxu0 }
 0x1cc   :  { %v989_v41 = vadd.f32 %v5506_v37, %v984_v40  ;;  %v986_v42 = vpop.f32.mrb[10].mxu0 }
 0x1cd   :  { %v987_v44 = vpop.f32.mrb[11].mxu0 }
 0x1ce   :  { %v990_v45 = vsub.f32 %v919_v39, %v989_v41  ;;  %v4471_v44 = vld [vmem:[%s6477_s1 + $0x10] sm:$0x3] }
 0x1d0   :  { %v991_v46 = vmul.f32 %v990_v45, %v920_v43  ;;  %v1044_v19 = vand.u32 2147483647, %v990_v45  ;;  %v4456_v45 = vld [vmem:[%s6473_s14 + $0x4] sm:$0xf]  ;;  %s5183_s14 = smov 112  }
 0x1d2   :  { %v992_v47 = vadd.f32 %v991_v46, %v989_v41  ;;  %v5520_v49 = vpop.f32.mrb[12].mxu0 }
 0x1d3   :  { %v1194_v50 = vpop.f32.mrb[13].mxu0 }
 0x1d4   :  { %v993_v48 = vpack.c.bf16 %v992_v47, %v992_v47  ;;  %v1196_v52 = vpop.f32.mrb[14].mxu0  ;;  %v1199_v23 = vadd.f32 %v5541_v12, %v1194_v50 }
 0x1d5   :  { %v1197_v53 = vpop.f32.mrb[15].mxu0  ;;  %v4457_v52 = vld [vmem:[%s6478_s16 + $0x4] sm:$0xf] }
 0x1d6   :  { %4729 = vmatmul.mubr.msk.bf16.vlgmr.msra.gmra.mrb[4].mxu1 %vm84_vm0, %v993_v48  ;;  %v1200_v35 = vsub.f32 %v4470_v28, %v1199_v23  ;;  %v5578_v53 = vsel %vm997_vm2, %v4457_v52, 0 }
 0x1d7   :  { %4734 = vmatprep.mubr.msk.bf16.mxu1 %vm5175_vm3, %v5174_v21  ;;  %4733 = vmatpush3.bf16.msra.mxu1 %v5526_v55 }
 0x1d8   :  { %4738 = vmatprep.subr.bf16.mxu1 %v5174_v21  ;;  %v1201_v47 = vmul.f32 %v4471_v44, %v1200_v35  ;;  %4745 = vmatpush3.bf16.msra.mxu0 %v5578_v53 }
 0x1d9   :  { %4750 = vmatprep.subr.bf16.mxu0 %v5174_v21 }
 0x2a9   :  { %v1035_v1 = vpop.f32.mrb[4].mxu1 }
 0x2aa   :  { %v1036_v3 = vadd.f32 %v5533_v0, %v1035_v1  ;;  %v4730_v4 = vpop.f32.mrb[5].mxu1 }
 0x2ab   :  { %v1038_v5 = vpop.f32.mrb[6].mxu1 }
 0x2ac   :  { %v1041_v6 = vsub.f32 %v1036_v3, %v989_v41  ;;  %v1045_v7 = vsub.f32 %v919_v39, %v1036_v3  ;;  %v4731_v8 = vpop.f32.mrb[7].mxu1 }
 0x2ae   :  { %v1042_v18 = vmul.f32 %v5536_v10, %v1041_v6  ;;  %v1046_v20 = vand.u32 2147483647, %v1045_v7 }
 0x2b0   :  { %v1043_v24 = vadd.f32 %v1042_v18, %v989_v41  ;;  %v1047_v25 = vadd.f32 %v1046_v20, %v1044_v19 }
 0x2b2   :  { %v1048_v33 = vsub.f32 %v919_v39, %v1043_v24  ;;  %v5561_v39 = vsel %vm997_vm2, %v4456_v45, 0  ;;  %vm4388_vm2 = vcmask 7168  }
 0x2b4   :  { %v1049_v40 = vand.u32 2147483647, %v1048_v33  ;;  %v1053_v42 = vmul.f32 %v1048_v33, %v920_v43  ;;  %v1202_v43 = vadd.f32 %v1201_v47, %v1199_v23 }
 0x2b6   :  { %v5554_v46 = vadd.f32 %v1049_v40, %v1047_v25  ;;  %v5556_v41 = vadd.f32 %v1053_v42, %v1043_v24  ;;  %v1203_v50 = vpack.c.bf16 %v1202_v43, %v1202_v43  ;;  %v5595_v24 = vpop.eup %5010 }
 0x2b8   :  { %v1055_v48 = vpack.c.bf16 %v5556_v41, %v5556_v41 }
 0x2ba   :  { %4735 = vmatmul.mubr.msk.bf16.vlgmr.msra.gmra.mrb[8].mxu1 %vm84_vm0, %v1055_v48 }
 0x2bb   :  { %4739 = vmatpush3.bf16.msra.mxu1 %v5561_v39  ;;  %4740 = vmatprep.mubr.msk.bf16.mxu1 %vm5175_vm3, %v5174_v21 }
 0x2bc   :  { %1355 = vmatprep.subr.bf16.mxu1 %v5374_v26 }
 0x2c2   :  { %4741 = vmatmul.mubr.msk.bf16.vlgmr.msra.gmra.mrb[12].mxu1 %vm84_vm0, %v1203_v50 }
 0x2c3   :  { %1356 = vmatpush1.bf16.msra.mxu1 %v5379_v29  ;;  %1387 = vmatprep.mubr.bf16.mxu1 %v5173_v32 }
 0x2c4   :  { %1357 = vmatprep.subr.bf16.mxu1 %v5386_v30 }
 0x2c7   :  { %1358 = vmatpush1.bf16.msra.mxu1 %v5391_v31 }
 0x2c8   :  { %4756 = vmatprep.subr.bf16.mxu1 %v5174_v21 }
 0x38d   :  { %v1096_v61 = vpop.f32.mrb[8].mxu1 }
 0x38e   :  { %v1097_v1 = vadd.f32 %v1096_v61, %v5585_v59  ;;  %v4736_v3 = vpop.f32.mrb[9].mxu1 }
 0x38f   :  { %v1099_v4 = vpop.f32.mrb[10].mxu1 }
 0x390   :  { %v1102_v5 = vadd.f32 %v1097_v1, %v5508_v38  ;;  %v4737_v6 = vpop.f32.mrb[11].mxu1  ;;  %v1253_v38 = vand.u32 2147483647, %v1200_v35 }
 0x392   :  { %5012 = vtanh.f32 %v1102_v5 }
 0x395   :  { %v1244_v7 = vpop.f32.mrb[12].mxu1 }
 0x396   :  { %v1245_v8 = vadd.f32 %v5592_v36, %v1244_v7  ;;  %v4742_v60 = vpop.f32.mrb[13].mxu1 }
 0x397   :  { %v1247_v63 = vpop.f32.mrb[14].mxu1 }
 0x398   :  { %v1250_v18 = vsub.f32 %v1245_v8, %v1199_v23  ;;  %v1254_v19 = vsub.f32 %v4470_v28, %v1245_v8  ;;  %v4743_v20 = vpop.f32.mrb[15].mxu1 }
 0x39a   :  { %v1251_v25 = vmul.f32 %v5595_v24, %v1250_v18  ;;  %v1255_v33 = vand.u32 2147483647, %v1254_v19  ;;  %v1343_v18 = vrot.slane %v5422_v57, 2 }
 0x39c   :  { %v5013_v40 = vpop.eup %5012  ;;  %v1252_v42 = vadd.f32 %v1251_v25, %v1199_v23  ;;  %v1256_v45 = vadd.f32 %v1255_v33, %v1253_v38  ;;  %v4469_v23 = vmul.f32 -1.442695, %v1102_v5 }
 0x39d   :  { %1112 = vrot.lane.b32.xlu0 %v5013_v40, %s5176_s7 }
 0x39e   :  { %v1257_v47 = vsub.f32 %v4470_v28, %v1252_v42  ;;  %5014 = vpow2.f32 %v4469_v23 }
 0x3a0   :  { %v1258_v48 = vand.u32 2147483647, %v1257_v47  ;;  %v1262_v43 = vmul.f32 %v4471_v44, %v1257_v47 }
 0x3a2   :  { %v5599_v50 = vadd.f32 %v1258_v48, %v1256_v45  ;;  %v5601_v52 = vadd.f32 %v1262_v43, %v1252_v42 }
 0x3a4   :  { %v1264_v54 = vpack.c.bf16 %v5601_v52, %v5601_v52 }
 0x3a6   :  { %4747 = vmatmul.mubr.msk.bf16.vlgmr.msra.gmra.mrb[16].mxu0 %vm84_vm0, %v1264_v54  ;;  %v1543_v54 = vrot.slane %v5466_v16, 2 }
 0x3a7   :  { %4751 = vmatpush3.bf16.msra.mxu0 %v5481_v22  ;;  %4752 = vmatprep.mubr.msk.bf16.mxu0 %vm5175_vm3, %v5174_v21 }
 0x3a8   :  { %1555 = vmatprep.subr.bf16.mxu0 %v5452_v13  ;;  %v5015_v28 = vpop.eup %5014 }
 0x3a9   :  { %v1106_v35 = vadd.f32 1.0, %v5015_v28 }
 0x3ab   :  { %5016 = vrcp.f32 %v1106_v35 }
 0x3b5   :  { %v5017_v44 = vpop.eup %5016 }
 0x3b6   :  { %v1110_v8 = vmul.f32 0.0, %v5017_v44 }
 0x40f   :  { %v1113_v56 = vpop.permute.xlu0 %1112 }
 0x410   :  { %v1115_v58 = vmul.f32 %v5017_v44, %v1113_v56 }
 0x412   :  { %1117 = vrot.lane.b32.xlu0 %v1115_v58, %s5177_s6 }
 0x479   :  { %v1305_v61 = vpop.f32.mrb[16].mxu0 }
 0x47a   :  { %v1306_v1 = vadd.f32 %v1305_v61, %v5447_v11  ;;  %v4748_v3 = vpop.f32.mrb[17].mxu0 }
 0x47b   :  { %v1308_v4 = vpop.f32.mrb[18].mxu0 }
 0x47c   :  { %v1311_v6 = vadd.f32 %v1306_v1, %v5520_v49  ;;  %v4749_v7 = vpop.f32.mrb[19].mxu0 }
 0x47d   :  { %v4481_v7 = vld [vmem:[%s6476_s0 + $0x2] sm:$0x3] }
 0x47e   :  { %v4480_v49 = vmul.f32 -1.442695, %v1311_v6 }
 0x484   :  { %v1118_v5 = vpop.permute.xlu0 %1117 }
 0x485   :  { %v5613_v60 = vadd.f32 %v1118_v5, %v1110_v8 }
 0x487   :  { %5018 = vtanh.f32 %v5613_v60 }
 0x488   :  { %5020 = vtanh.f32 %v1311_v6 }
 0x489   :  { %5022 = vpow2.f32 %v4480_v49 }
 0x491   :  { %v5019_v63 = vpop.eup %5018 }
 0x492   :  { %1123 = vrot.lane.b32.xlu1 %v5019_v63, %s5176_s7  ;;  %v5021_v19 = vpop.eup %5020 }
 0x493   :  { %v5023_v20 = vpop.eup %5022 }
 0x494   :  { %v1315_v25 = vadd.f32 1.0, %v5023_v20 }
 0x496   :  { %1344 = vrot.lane.b32.xlu1 %v1343_v18, %s5178_s11  ;;  %5024 = vrcp.f32 %v1315_v25  ;;  %v4482_v18 = vld [vmem:[%s6477_s1 + $0x2] sm:$0x3] }
 0x49a   :  { %1321 = vrot.lane.b32.xlu1 %v5021_v19, %s5176_s7 }
 0x4a0   :  { %v5025_v48 = vpop.eup %5024 }
 0x4a1   :  { %v1319_v28 = vmul.f32 0.0, %v5025_v48 }
 0x504   :  { %v1124_v38 = vpop.permute.xlu1 %1123 }
 0x505   :  { %v1126_v33 = vmul.f32 %v5017_v44, %v1124_v38 }
 0x508   :  { %v1345_v40 = vpop.permute.xlu1 %1344 }
 0x509   :  { %v1347_v42 = vmul.f32 %v1345_v40, %v1126_v33 }
 0x50b   :  { %v1348_v45 = vpack.c.bf16 %v1347_v42, %v1347_v42 }
 0x50c   :  { %v1322_v47 = vpop.permute.xlu1 %1321 }
 0x50d   :  { %1350 = vrot.lane.b32.xlu0 %v1348_v45, %s5177_s6  ;;  %v1324_v43 = vmul.f32 %v5025_v48, %v1322_v47 }
 0x511   :  { %1326 = vrot.lane.b32.xlu0 %v1324_v43, %s5177_s6 }
 0x515   :  { %1544 = vrot.lane.b32.xlu0 %v1543_v54, %s5178_s11 }
 0x57f   :  { %v1351_v23 = vpop.permute.xlu0 %1350 }
 0x580   :  { %4484 = vmatmul.mubr.msk.bf16.vlgmr.msra.gmra.mrb[16].mxu1 %vm944_vm1, %v1351_v23 }
 0x581   :  { %4757 = vmatpush3.bf16.msra.mxu1 %v5526_v55  ;;  %4758 = vmatprep.mubr.msk.bf16.mxu1 %vm5175_vm3, %v5174_v21 }
 0x582   :  { %4762 = vmatprep.subr.bf16.mxu1 %v5174_v21 }
 0x583   :  { %v1327_v35 = vpop.permute.xlu0 %1326 }
 0x584   :  { %v5629_v44 = vadd.f32 %v1327_v35, %v1319_v28 }
 0x586   :  { %5026 = vtanh.f32 %v5629_v44 }
 0x587   :  { %v1545_v1 = vpop.permute.xlu0 %1544 }
 0x590   :  { %v5027_v56 = vpop.eup %5026 }
 0x591   :  { %1332 = vrot.lane.b32.xlu1 %v5027_v56, %s5176_s7 }
 0x603   :  { %v1333_v58 = vpop.permute.xlu1 %1332 }
 0x604   :  { %v1335_v61 = vmul.f32 %v5025_v48, %v1333_v58 }
 0x606   :  { %v1547_v3 = vmul.f32 %v1545_v1, %v1335_v61 }
 0x608   :  { %v1548_v4 = vpack.c.bf16 %v1547_v3, %v1547_v3 }
 0x60a   :  { %1550 = vrot.lane.b32.xlu1 %v1548_v4, %s5177_s6 }
 0x653   :  { %v5634_v6 = vpop.f32.mrb[16].mxu1 }
 0x654   :  { %v1391_v8 = vpop.f32.mrb[17].mxu1 }
 0x655   :  { %v1396_v5 = vadd.f32 %v5506_v37, %v1391_v8  ;;  %v1393_v63 = vpop.f32.mrb[18].mxu1 }
 0x656   :  { %v1394_v19 = vpop.f32.mrb[19].mxu1  ;;  %v921_v63 = vld [vmem:[%s6480_s2] sm:$0x3] }
 0x657   :  { %v1397_v49 = vsub.f32 %v4481_v7, %v1396_v5  ;;  %v4483_v19 = vld [vmem:[%s6480_s2 + $0x2] sm:$0x3] }
 0x659   :  { %v1398_v20 = vmul.f32 %v4482_v18, %v1397_v49  ;;  %v1453_v28 = vand.u32 2147483647, %v1397_v49  ;;  %v1051_v49 = vmul.f32 %v5554_v46, %v921_v63  ;;  %v4488_v46 = vld [vmem:[%s6476_s0 + $0x12] sm:$0x3] }
 0x65b   :  { %v1399_v25 = vadd.f32 %v1398_v20, %v1396_v5 }
 0x65d   :  { %v1400_v38 = vpack.c.bf16 %v1399_v25, %v1399_v25 }
 0x65f   :  { %4753 = vmatmul.mubr.msk.bf16.vlgmr.msra.gmra.mrb[20].mxu0 %vm84_vm0, %v1400_v38 }
 0x660   :  { %1556 = vmatpush1.bf16.msra.mxu0 %v5457_v14  ;;  %1587 = vmatprep.mubr.bf16.mxu0 %v5173_v32 }
 0x661   :  { %1557 = vmatprep.subr.bf16.mxu0 %v5464_v15 }
 0x664   :  { %1558 = vmatpush1.bf16.msra.mxu0 %v5471_v17 }
 0x665   :  { %4768 = vmatprep.subr.bf16.mxu0 %v5174_v21 }
 0x67c   :  { %v1551_v33 = vpop.permute.xlu1 %1550 }
 0x67d   :  { %4491 = vmatmul.mubr.msk.bf16.vlgmr.msra.gmra.mrb[24].mxu0 %vm944_vm1, %v1551_v33 }
 0x67e   :  { %4769 = vmatpush3.bf16.msra.mxu0 %v5578_v53  ;;  %4770 = vmatprep.mubr.msk.bf16.mxu0 %vm5175_vm3, %v5174_v21 }
 0x67f   :  { %4774 = vmatprep.subr.bf16.mxu0 %v5174_v21 }
 0x732   :  { %v1438_v40 = vpop.f32.mrb[20].mxu0 }
 0x733   :  { %v1439_v42 = vadd.f32 %v5533_v0, %v1438_v40  ;;  %v4754_v45 = vpop.f32.mrb[21].mxu0 }
 0x734   :  { %v1441_v47 = vpop.f32.mrb[22].mxu0  ;;  %v4489_v45 = vld [vmem:[%s6477_s1 + $0x12] sm:$0x3] }
 0x735   :  { %v1444_v48 = vsub.f32 %v1439_v42, %v1396_v5  ;;  %v1454_v43 = vsub.f32 %v4481_v7, %v1439_v42  ;;  %v4755_v54 = vpop.f32.mrb[23].mxu0 }
 0x737   :  { %v1446_v23 = vrot.slane %v1444_v48, 6  ;;  %v1455_v35 = vand.u32 2147483647, %v1454_v43 }
 0x739   :  { %v1448_v56 = vmul.f32 %v5536_v10, %v1446_v23  ;;  %v1456_v58 = vadd.f32 %v1455_v35, %v1453_v28 }
 0x73b   :  { %v1450_v61 = vrot.slane %v1448_v56, 2 }
 0x73d   :  { %v1452_v1 = vadd.f32 %v1450_v61, %v1396_v5 }
 0x73f   :  { %v1457_v3 = vsub.f32 %v4481_v7, %v1452_v1 }
 0x741   :  { %v1458_v4 = vand.u32 2147483647, %v1457_v3  ;;  %v1462_v8 = vmul.f32 %v4482_v18, %v1457_v3 }
 0x743   :  { %v1459_v20 = vadd.f32 %v1458_v4, %v1456_v58  ;;  %v5662_v25 = vadd.f32 %v1462_v8, %v1452_v1 }
 0x745   :  { %v1460_v38 = vmul.f32 %v4483_v19, %v1459_v20  ;;  %v1464_v5 = vpack.c.bf16 %v5662_v25, %v5662_v25 }
 0x747   :  { %v5667_v7 = vadd.f32 %v1460_v38, %v1051_v49  ;;  %4759 = vmatmul.mubr.msk.bf16.vlgmr.msra.gmra.mrb[20].mxu1 %vm84_vm0, %v1464_v5 }
 0x748   :  { %4763 = vmatpush3.bf16.msra.mxu1 %v5561_v39  ;;  %4764 = vmatprep.mubr.msk.bf16.mxu1 %vm5175_vm3, %v5174_v21 }
 0x749   :  { %1754 = vmatprep.subr.bf16.mxu1 %v5374_v26  ;;  %v1466_v26 = vrot.slane %v5585_v59, 2 }
 0x750   :  { %v5674_v18 = vpop.f32.mrb[24].mxu0 }
 0x751   :  { %v1591_v33 = vpop.f32.mrb[25].mxu0 }
 0x752   :  { %v1596_v40 = vadd.f32 %v5541_v12, %v1591_v33  ;;  %v1593_v42 = vpop.f32.mrb[26].mxu0 }
 0x753   :  { %v1594_v47 = vpop.f32.mrb[27].mxu0 }
 0x754   :  { %v1597_v48 = vsub.f32 %v4488_v46, %v1596_v40 }
 0x756   :  { %v1598_v43 = vmul.f32 %v4489_v45, %v1597_v48  ;;  %v1653_v49 = vand.u32 2147483647, %v1597_v48 }
 0x758   :  { %v1599_v54 = vadd.f32 %v1598_v43, %v1596_v40 }
 0x75a   :  { %v1600_v23 = vpack.c.bf16 %v1599_v54, %v1599_v54 }
 0x75c   :  { %4765 = vmatmul.mubr.msk.bf16.vlgmr.msra.gmra.mrb[24].mxu1 %vm84_vm0, %v1600_v23  ;;  %v4472_v23 = vld [vmem:[%s6480_s2 + $0x10] sm:$0x3] }
 0x75d   :  { %1755 = vmatpush1.bf16.msra.mxu1 %v5379_v29  ;;  %1786 = vmatprep.mubr.bf16.mxu1 %v5173_v32  ;;  %v1260_v48 = vmul.f32 %v4472_v23, %v5599_v50 }
 0x75e   :  { %1756 = vmatprep.subr.bf16.mxu1 %v5386_v30 }
 0x761   :  { %1757 = vmatpush1.bf16.msra.mxu1 %v5391_v31 }
 0x762   :  { %4780 = vmatprep.subr.bf16.mxu1 %v5174_v21 }
 0x81a   :  { %v1505_v28 = vpop.f32.mrb[20].mxu1 }
 0x81b   :  { %v1506_v35 = vadd.f32 %v1505_v28, %v1466_v26  ;;  %v4760_v56 = vpop.f32.mrb[21].mxu1  ;;  %v4490_v26 = vld [vmem:[%s6480_s2 + $0x12] sm:$0x3] }
 0x81c   :  { %v1508_v58 = vpop.f32.mrb[22].mxu1 }
 0x81d   :  { %v1511_v61 = vadd.f32 %v1506_v35, %v5634_v6  ;;  %v4761_v1 = vpop.f32.mrb[23].mxu1 }
 0x81f   :  { %5028 = vtanh.f32 %v1511_v61 }
 0x829   :  { %v5029_v3 = vpop.eup %5028 }
 0x82a   :  { %1521 = vrot.lane.b32.xlu0 %v5029_v3, %s5176_s7 }
 0x82f   :  { %v1638_v29 = vpop.f32.mrb[24].mxu1 }
 0x830   :  { %v1639_v30 = vadd.f32 %v5592_v36, %v1638_v29  ;;  %v4766_v4 = vpop.f32.mrb[25].mxu1 }
 0x831   :  { %v1641_v31 = vpop.f32.mrb[26].mxu1 }
 0x832   :  { %v1644_v8 = vsub.f32 %v1639_v30, %v1596_v40  ;;  %v1654_v63 = vsub.f32 %v4488_v46, %v1639_v30  ;;  %v4767_v19 = vpop.f32.mrb[27].mxu1  ;;  %v1742_v30 = vrot.slane %v5422_v57, 4 }
 0x834   :  { %v1646_v20 = vrot.slane %v1644_v8, 6  ;;  %v1655_v38 = vand.u32 2147483647, %v1654_v63 }
 0x836   :  { %v1648_v5 = vmul.f32 %v5595_v24, %v1646_v20  ;;  %v1656_v33 = vadd.f32 %v1655_v38, %v1653_v49 }
 0x838   :  { %v1650_v6 = vrot.slane %v1648_v5, 2 }
 0x83a   :  { %v1652_v42 = vadd.f32 %v1650_v6, %v1596_v40 }
 0x83c   :  { %v1657_v47 = vsub.f32 %v4488_v46, %v1652_v42 }
 0x83e   :  { %v1658_v43 = vand.u32 2147483647, %v1657_v47  ;;  %v1662_v54 = vmul.f32 %v4489_v45, %v1657_v47  ;;  %v4487_v45 = vmul.f32 -1.442695, %v1511_v61  ;;  %v1666_v61 = vrot.slane %v5447_v11, 2 }
 0x840   :  { %v1659_v28 = vadd.f32 %v1658_v43, %v1656_v33  ;;  %v5700_v35 = vadd.f32 %v1662_v54, %v1652_v42  ;;  %5030 = vpow2.f32 %v4487_v45 }
 0x842   :  { %v1660_v56 = vmul.f32 %v4490_v26, %v1659_v28  ;;  %v1664_v40 = vpack.c.bf16 %v5700_v35, %v5700_v35 }
 0x844   :  { %v5705_v46 = vadd.f32 %v1660_v56, %v1260_v48  ;;  %4771 = vmatmul.mubr.msk.bf16.vlgmr.msra.gmra.mrb[28].mxu0 %vm84_vm0, %v1664_v40  ;;  %v1940_v40 = vrot.slane %v5466_v16, 4 }
 0x845   :  { %4775 = vmatpush3.bf16.msra.mxu0 %v5481_v22  ;;  %4776 = vmatprep.mubr.msk.bf16.mxu0 %vm5175_vm3, %v5174_v21 }
 0x846   :  { %1952 = vmatprep.subr.bf16.mxu0 %v5452_v13 }
 0x84a   :  { %v5031_v58 = vpop.eup %5030 }
 0x84b   :  { %v1515_v1 = vadd.f32 1.0, %v5031_v58 }
 0x84d   :  { %5032 = vrcp.f32 %v1515_v1 }
 0x857   :  { %v5033_v50 = vpop.eup %5032 }
 0x858   :  { %v1519_v4 = vmul.f32 %v5033_v50, %v5613_v60 }
 0x89c   :  { %v1522_v3 = vpop.permute.xlu0 %1521 }
 0x89d   :  { %v1524_v29 = vmul.f32 %v5033_v50, %v1522_v3 }
 0x89f   :  { %1526 = vrot.lane.b32.xlu1 %v1524_v29, %s5177_s6 }
 0x8a3   :  { %1743 = vrot.lane.b32.xlu1 %v1742_v30, %s5178_s11 }
 0x911   :  { %v1527_v31 = vpop.permute.xlu1 %1526 }
 0x912   :  { %v5716_v8 = vadd.f32 %v1527_v31, %v1519_v4 }
 0x914   :  { %5034 = vtanh.f32 %v5716_v8 }
 0x915   :  { %v1744_v23 = vpop.permute.xlu1 %1743 }
 0x917   :  { %v1705_v63 = vpop.f32.mrb[28].mxu0 }
 0x918   :  { %v1706_v19 = vadd.f32 %v1705_v63, %v1666_v61  ;;  %v4772_v20 = vpop.f32.mrb[29].mxu0 }
 0x919   :  { %v1708_v49 = vpop.f32.mrb[30].mxu0 }
 0x91a   :  { %v1711_v38 = vadd.f32 %v1706_v19, %v5674_v18  ;;  %v4773_v5 = vpop.f32.mrb[31].mxu0 }
 0x91c   :  { %5036 = vtanh.f32 %v1711_v38  ;;  %v4494_v60 = vmul.f32 -1.442695, %v1711_v38  ;;  %v4496_v38 = vld [vmem:[%s6477_s1 + $0x4] sm:$0x3] }
 0x91e   :  { %v5035_v33 = vpop.eup %5034  ;;  %5038 = vpow2.f32 %v4494_v60 }
 0x91f   :  { %1532 = vrot.lane.b32.xlu0 %v5035_v33, %s5176_s7 }
 0x926   :  { %v5037_v6 = vpop.eup %5036 }
 0x927   :  { %1721 = vrot.lane.b32.xlu1 %v5037_v6, %s5176_s7 }
 0x928   :  { %v5039_v42 = vpop.eup %5038 }
 0x929   :  { %v1715_v47 = vadd.f32 1.0, %v5039_v42 }
 0x92b   :  { %5040 = vrcp.f32 %v1715_v47 }
 0x935   :  { %v5041_v18 = vpop.eup %5040 }
 0x936   :  { %v1719_v58 = vmul.f32 %v5041_v18, %v5629_v44  ;;  %v4495_v44 = vld [vmem:[%s6476_s0 + $0x4] sm:$0x3] }
 0x991   :  { %v1533_v43 = vpop.permute.xlu0 %1532 }
 0x992   :  { %v1535_v54 = vmul.f32 %v5033_v50, %v1533_v43 }
 0x994   :  { %v1746_v26 = vmul.f32 %v1744_v23, %v1535_v54 }
 0x996   :  { %v1747_v28 = vpack.c.bf16 %v1746_v26, %v1746_v26 }
 0x998   :  { %1749 = vrot.lane.b32.xlu0 %v1747_v28, %s5177_s6 }
 0x999   :  { %v1722_v48 = vpop.permute.xlu1 %1721 }
 0x99a   :  { %v1724_v56 = vmul.f32 %v5041_v18, %v1722_v48 }
 0x99c   :  { %1726 = vrot.lane.b32.xlu0 %v1724_v56, %s5177_s6 }
 0x9a0   :  { %1941 = vrot.lane.b32.xlu0 %v1940_v40, %s5178_s11 }
 0xa0a   :  { %v1750_v45 = vpop.permute.xlu0 %1749 }
 0xa0b   :  { %4498 = vmatmul.mubr.msk.bf16.vlgmr.msra.gmra.mrb[28].mxu1 %vm944_vm1, %v1750_v45 }
 0xa0c   :  { %4781 = vmatpush3.bf16.msra.mxu1 %v5526_v55  ;;  %4782 = vmatprep.mubr.msk.bf16.mxu1 %vm5175_vm3, %v5174_v21 }
 0xa0d   :  { %4786 = vmatprep.subr.bf16.mxu1 %v5174_v21 }
 0xa0e   :  { %v1727_v1 = vpop.permute.xlu0 %1726 }
 0xa0f   :  { %v5733_v50 = vadd.f32 %v1727_v1, %v1719_v58 }
 0xa11   :  { %5042 = vtanh.f32 %v5733_v50 }
 0xa12   :  { %v1942_v4 = vpop.permute.xlu0 %1941 }
 0xa1b   :  { %v5043_v3 = vpop.eup %5042 }
 0xa1c   :  { %1732 = vrot.lane.b32.xlu1 %v5043_v3, %s5176_s7 }
 0xa8e   :  { %v1733_v29 = vpop.permute.xlu1 %1732 }
 0xa8f   :  { %v1735_v30 = vmul.f32 %v5041_v18, %v1733_v29  ;;  %v4497_v29 = vld [vmem:[%s6480_s2 + $0x4] sm:$0x3] }
 0xa91   :  { %v1944_v31 = vmul.f32 %v1942_v4, %v1735_v30 }
 0xa93   :  { %v1945_v61 = vpack.c.bf16 %v1944_v31, %v1944_v31 }
 0xa95   :  { %1947 = vrot.lane.b32.xlu1 %v1945_v61, %s5177_s6 }
 0xade   :  { %v5738_v63 = vpop.f32.mrb[28].mxu1 }
 0xadf   :  { %v1790_v19 = vpop.f32.mrb[29].mxu1 }
 0xae0   :  { %v1795_v20 = vadd.f32 %v5506_v37, %v1790_v19  ;;  %v1792_v49 = vpop.f32.mrb[30].mxu1 }
 0xae1   :  { %v1793_v5 = vpop.f32.mrb[31].mxu1 }
 0xae2   :  { %v1796_v33 = vsub.f32 %v4495_v44, %v1795_v20 }
 0xae4   :  { %v1797_v6 = vmul.f32 %v4496_v38, %v1796_v33  ;;  %v1852_v28 = vand.u32 2147483647, %v1796_v33  ;;  %v4503_v33 = vld [vmem:[%s6477_s1 + $0x14] sm:$0x3] }
 0xae6   :  { %v1798_v60 = vadd.f32 %v1797_v6, %v1795_v20 }
 0xae8   :  { %v1799_v42 = vpack.c.bf16 %v1798_v60, %v1798_v60 }
 0xaea   :  { %4777 = vmatmul.mubr.msk.bf16.vlgmr.msra.gmra.mrb[32].mxu0 %vm84_vm0, %v1799_v42 }
 0xaeb   :  { %1953 = vmatpush1.bf16.msra.mxu0 %v5457_v14  ;;  %1984 = vmatprep.mubr.bf16.mxu0 %v5173_v32 }
 0xaec   :  { %1954 = vmatprep.subr.bf16.mxu0 %v5464_v15 }
 0xaef   :  { %1955 = vmatpush1.bf16.msra.mxu0 %v5471_v17 }
 0xaf0   :  { %4792 = vmatprep.subr.bf16.mxu0 %v5174_v21 }
 0xb07   :  { %v1948_v37 = vpop.permute.xlu1 %1947 }
 0xb08   :  { %4505 = vmatmul.mubr.msk.bf16.vlgmr.msra.gmra.mrb[36].mxu0 %vm944_vm1, %v1948_v37 }
 0xb09   :  { %4793 = vmatpush3.bf16.msra.mxu0 %v5578_v53  ;;  %4794 = vmatprep.mubr.msk.bf16.mxu0 %vm5175_vm3, %v5174_v21 }
 0xb0a   :  { %4798 = vmatprep.subr.bf16.mxu0 %v5174_v21 }
 0xbbd   :  { %v1837_v47 = vpop.f32.mrb[32].mxu0 }
 0xbbe   :  { %v1838_v14 = vadd.f32 %v5533_v0, %v1837_v47  ;;  %v4778_v43 = vpop.f32.mrb[33].mxu0 }
 0xbbf   :  { %v1840_v54 = vpop.f32.mrb[34].mxu0  ;;  %v5806_v43 = vld [vmem:[%s6508_s5 + $0x10] ss:$8 sps:$4 sm:$0xff]  }
 0xbc0   :  { %v1843_v15 = vsub.f32 %v1838_v14, %v1795_v20  ;;  %v1853_v23 = vsub.f32 %v4495_v44, %v1838_v14  ;;  %v4779_v17 = vpop.f32.mrb[35].mxu0  ;;  %v5793_v14 = vld [vmem:[%s6508_s5] ss:$8 sps:$4 sm:$0xff]   ;;  %v1864_v54 = vrot.slane %v5585_v59, 4 }
 0xbc2   :  { %v1845_v26 = vrot.slane %v1843_v15, 4  ;;  %v1854_v18 = vand.u32 2147483647, %v1853_v23 }
 0xbc4   :  { %v1847_v48 = vmul.f32 %v5536_v10, %v1845_v26  ;;  %v1855_v56 = vadd.f32 %v1854_v18, %v1852_v28 }
 0xbc6   :  { %v1849_v40 = vrot.slane %v1847_v48, 4 }
 0xbc8   :  { %v1851_v45 = vadd.f32 %v1849_v40, %v1795_v20 }
 0xbca   :  { %v1856_v58 = vsub.f32 %v4495_v44, %v1851_v45  ;;  %v5777_v44 = vld [vmem:[%s6508_s5 + $0x4] ss:$8 sps:$4 sm:$0xff]  }
 0xbcc   :  { %v1857_v1 = vand.u32 2147483647, %v1856_v58  ;;  %v1861_v3 = vmul.f32 %v4496_v38, %v1856_v58 }
 0xbce   :  { %v1858_v30 = vadd.f32 %v1857_v1, %v1855_v56  ;;  %v5763_v4 = vadd.f32 %v1861_v3, %v1851_v45 }
 0xbd0   :  { %v1859_v31 = vmul.f32 %v4497_v29, %v1858_v30  ;;  %v1863_v61 = vpack.c.bf16 %v5763_v4, %v5763_v4 }
 0xbd2   :  { %v5768_v19 = vadd.f32 %v1859_v31, %v5667_v7  ;;  %4783 = vmatmul.mubr.msk.bf16.vlgmr.msra.gmra.mrb[32].mxu1 %vm84_vm0, %v1863_v61  ;;  %v4502_v7 = vld [vmem:[%s6476_s0 + $0x14] sm:$0x3] }
 0xbd3   :  { %4787 = vmatpush3.bf16.msra.mxu1 %v5561_v39  ;;  %4788 = vmatprep.mubr.msk.bf16.mxu1 %vm5175_vm3, %v5174_v21 }
 0xbd4   :  { %2150 = vmatprep.subr.bf16.mxu1 %v5777_v44 }
 0xbdb   :  { %v5780_v20 = vpop.f32.mrb[36].mxu0 }
 0xbdc   :  { %v1988_v49 = vpop.f32.mrb[37].mxu0 }
 0xbdd   :  { %v1993_v38 = vadd.f32 %v5541_v12, %v1988_v49  ;;  %v1990_v5 = vpop.f32.mrb[38].mxu0  ;;  %v5800_v12 = vld [vmem:[%s6508_s5 + $0x14] ss:$8 sps:$4 sm:$0xff]  }
 0xbde   :  { %v1991_v6 = vpop.f32.mrb[39].mxu0 }
 0xbdf   :  { %v1994_v60 = vsub.f32 %v4502_v7, %v1993_v38 }
 0xbe1   :  { %v1995_v42 = vmul.f32 %v4503_v33, %v1994_v60  ;;  %v2050_v31 = vand.u32 2147483647, %v1994_v60 }
 0xbe3   :  { %v1996_v37 = vadd.f32 %v1995_v42, %v1993_v38 }
 0xbe5   :  { %v1997_v47 = vpack.c.bf16 %v1996_v37, %v1996_v37 }
 0xbe7   :  { %4789 = vmatmul.mubr.msk.bf16.vlgmr.msra.gmra.mrb[36].mxu1 %vm84_vm0, %v1997_v47 }
 0xbe8   :  { %2151 = vmatpush1.bf16.msra.mxu1 %v5793_v14  ;;  %2182 = vmatprep.mubr.bf16.mxu1 %v5173_v32 }
 0xbe9   :  { %2152 = vmatprep.subr.bf16.mxu1 %v5800_v12 }
 0xbec   :  { %2153 = vmatpush1.bf16.msra.mxu1 %v5806_v43 }
 0xbed   :  { %4804 = vmatprep.subr.bf16.mxu1 %v5174_v21 }
 0xca5   :  { %v1903_v15 = vpop.f32.mrb[32].mxu1 }
 0xca6   :  { %v1904_v23 = vadd.f32 %v1903_v15, %v1864_v54  ;;  %v4784_v17 = vpop.f32.mrb[33].mxu1  ;;  %v4504_v54 = vld [vmem:[%s6480_s2 + $0x14] sm:$0x3] }
 0xca7   :  { %v1906_v26 = vpop.f32.mrb[34].mxu1 }
 0xca8   :  { %v1909_v28 = vadd.f32 %v1904_v23, %v5738_v63  ;;  %v4785_v18 = vpop.f32.mrb[35].mxu1 }
 0xcaa   :  { %5044 = vtanh.f32 %v1909_v28 }
 0xcb4   :  { %v5045_v48 = vpop.eup %5044 }
 0xcb5   :  { %1919 = vrot.lane.b32.xlu0 %v5045_v48, %s5176_s7 }
 0xcba   :  { %v2035_v56 = vpop.f32.mrb[36].mxu1 }
 0xcbb   :  { %v2036_v40 = vadd.f32 %v5592_v36, %v2035_v56  ;;  %v4790_v45 = vpop.f32.mrb[37].mxu1 }
 0xcbc   :  { %v2038_v58 = vpop.f32.mrb[38].mxu1 }
 0xcbd   :  { %v2041_v1 = vsub.f32 %v2036_v40, %v1993_v38  ;;  %v2051_v3 = vsub.f32 %v4502_v7, %v2036_v40  ;;  %v4791_v29 = vpop.f32.mrb[39].mxu1 }
 0xcbf   :  { %v2043_v30 = vrot.slane %v2041_v1, 4  ;;  %v2052_v61 = vand.u32 2147483647, %v2051_v3 }
 0xcc1   :  { %v2045_v49 = vmul.f32 %v5595_v24, %v2043_v30  ;;  %v2053_v5 = vadd.f32 %v2052_v61, %v2050_v31 }
 0xcc3   :  { %v2047_v63 = vrot.slane %v2045_v49, 4 }
 0xcc5   :  { %v2049_v6 = vadd.f32 %v2047_v63, %v1993_v38 }
 0xcc7   :  { %v2054_v42 = vsub.f32 %v4502_v7, %v2049_v6  ;;  %v4501_v7 = vmul.f32 -1.442695, %v1909_v28 }
 0xcc9   :  { %v2055_v37 = vand.u32 2147483647, %v2054_v42  ;;  %v2059_v47 = vmul.f32 %v4503_v33, %v2054_v42  ;;  %5046 = vpow2.f32 %v4501_v7 }
 0xccb   :  { %v2056_v15 = vadd.f32 %v2055_v37, %v2053_v5  ;;  %v5818_v23 = vadd.f32 %v2059_v47, %v2049_v6 }
 0xccd   :  { %v2057_v17 = vmul.f32 %v4504_v54, %v2056_v15  ;;  %v2061_v60 = vpack.c.bf16 %v5818_v23, %v5818_v23 }
 0xccf   :  { %v5823_v26 = vadd.f32 %v2057_v17, %v5705_v46  ;;  %4795 = vmatmul.mubr.msk.bf16.vlgmr.msra.gmra.mrb[40].mxu0 %vm84_vm0, %v2061_v60  ;;  %v2138_v46 = vrot.slane %v5422_v57, 6  ;;  %v2336_v17 = vrot.slane %v5466_v16, 6 }
 0xcd0   :  { %4799 = vmatpush3.bf16.msra.mxu0 %v5481_v22  ;;  %4800 = vmatprep.mubr.msk.bf16.mxu0 %vm5175_vm3, %v5174_v21 }
 0xcd1   :  { %2348 = vmatprep.subr.bf16.mxu0 %v5452_v13  ;;  %v2062_v13 = vrot.slane %v5447_v11, 4 }
 0xcd3   :  { %v5047_v38 = vpop.eup %5046 }
 0xcd4   :  { %v1913_v33 = vadd.f32 1.0, %v5047_v38 }
 0xcd6   :  { %5048 = vrcp.f32 %v1913_v33 }
 0xce0   :  { %v5049_v18 = vpop.eup %5048 }
 0xce1   :  { %v1917_v40 = vmul.f32 %v5049_v18, %v5716_v8 }
 0xd27   :  { %v1920_v48 = vpop.permute.xlu0 %1919 }
 0xd28   :  { %v1922_v56 = vmul.f32 %v5049_v18, %v1920_v48 }
 0xd2a   :  { %1924 = vrot.lane.b32.xlu1 %v1922_v56, %s5177_s6 }
 0xd2e   :  { %2139 = vrot.lane.b32.xlu1 %v2138_v46, %s5178_s11 }
 0xd9c   :  { %v1925_v45 = vpop.permute.xlu1 %1924 }
 0xd9d   :  { %v5834_v58 = vadd.f32 %v1925_v45, %v1917_v40 }
 0xd9f   :  { %5050 = vtanh.f32 %v5834_v58 }
 0xda0   :  { %v2140_v42 = vpop.permute.xlu1 %2139 }
 0xda2   :  { %v2101_v28 = vpop.f32.mrb[40].mxu0 }
 0xda3   :  { %v2102_v1 = vadd.f32 %v2101_v28, %v2062_v13  ;;  %v4796_v3 = vpop.f32.mrb[41].mxu0  ;;  %v5864_v28 = vld [vmem:[%s6475_s13] ss:$0 sm:$0xff] }
 0xda4   :  { %v2104_v29 = vpop.f32.mrb[42].mxu0 }
 0xda5   :  { %v2107_v30 = vadd.f32 %v2102_v1, %v5780_v20  ;;  %v4797_v31 = vpop.f32.mrb[43].mxu0  ;;  %v4510_v29 = vld [vmem:[%s6477_s1 + $0x6] sm:$0x3] }
 0xda7   :  { %5052 = vtanh.f32 %v2107_v30  ;;  %v4508_v8 = vmul.f32 -1.442695, %v2107_v30 }
 0xda9   :  { %v5051_v57 = vpop.eup %5050  ;;  %5054 = vpow2.f32 %v4508_v8 }
 0xdaa   :  { %1930 = vrot.lane.b32.xlu0 %v5051_v57, %s5176_s7 }
 0xdb1   :  { %v5053_v61 = vpop.eup %5052 }
 0xdb2   :  { %2117 = vrot.lane.b32.xlu1 %v5053_v61, %s5176_s7 }
 0xdb3   :  { %v5055_v49 = vpop.eup %5054 }
 0xdb4   :  { %v2111_v5 = vadd.f32 1.0, %v5055_v49  ;;  %v5874_v49 = vld [vmem:[%s6508_s5 + $0x20] ss:$8 sps:$4 sm:$0xff]  }
 0xdb6   :  { %5056 = vrcp.f32 %v2111_v5  ;;  %v5881_v5 = vld [vmem:[%s6508_s5 + $0x34] ss:$8 sps:$4 sm:$0xff]  }
 0xdc0   :  { %v5057_v20 = vpop.eup %5056 }
 0xdc1   :  { %v2115_v7 = vmul.f32 %v5057_v20, %v5733_v50  ;;  %v4509_v50 = vld [vmem:[%s6476_s0 + $0x6] sm:$0x3] }
 0xe1c   :  { %v1931_v63 = vpop.permute.xlu0 %1930 }
 0xe1d   :  { %v1933_v6 = vmul.f32 %v5049_v18, %v1931_v63  ;;  %v5887_v63 = vld [vmem:[%s6508_s5 + $0x30] ss:$8 sps:$4 sm:$0xff]  }
 0xe1f   :  { %v2142_v37 = vmul.f32 %v2140_v42, %v1933_v6 }
 0xe21   :  { %v2143_v47 = vpack.c.bf16 %v2142_v37, %v2142_v37 }
 0xe23   :  { %2145 = vrot.lane.b32.xlu0 %v2143_v47, %s5177_s6 }
 0xe24   :  { %v2118_v54 = vpop.permute.xlu1 %2117 }
 0xe25   :  { %v2120_v15 = vmul.f32 %v5057_v20, %v2118_v54 }
 0xe27   :  { %2122 = vrot.lane.b32.xlu0 %v2120_v15, %s5177_s6 }
 0xe2b   :  { %2337 = vrot.lane.b32.xlu0 %v2336_v17, %s5178_s11 }
 0xe95   :  { %v2146_v60 = vpop.permute.xlu0 %2145 }
 0xe96   :  { %4512 = vmatmul.mubr.msk.bf16.vlgmr.msra.gmra.mrb[40].mxu1 %vm944_vm1, %v2146_v60 }
 0xe97   :  { %4805 = vmatpush3.bf16.msra.mxu1 %v5526_v55  ;;  %4806 = vmatprep.mubr.msk.bf16.mxu1 %vm5175_vm3, %v5174_v21 }
 0xe98   :  { %4810 = vmatprep.subr.bf16.mxu1 %v5174_v21 }
 0xe99   :  { %v2123_v38 = vpop.permute.xlu0 %2122 }
 0xe9a   :  { %v5851_v33 = vadd.f32 %v2123_v38, %v2115_v7 }
 0xe9c   :  { %5058 = vtanh.f32 %v5851_v33 }
 0xe9d   :  { %v2338_v56 = vpop.permute.xlu0 %2337 }
 0xea6   :  { %v5059_v16 = vpop.eup %5058 }
 0xea7   :  { %2128 = vrot.lane.b32.xlu1 %v5059_v16, %s5176_s7 }
 0xf19   :  { %v2129_v18 = vpop.permute.xlu1 %2128 }
 0xf1a   :  { %v2131_v48 = vmul.f32 %v5057_v20, %v2129_v18 }
 0xf1c   :  { %v2340_v46 = vmul.f32 %v2338_v56, %v2131_v48 }
 0xf1e   :  { %v2341_v40 = vpack.c.bf16 %v2340_v46, %v2340_v46 }
 0xf20   :  { %2343 = vrot.lane.b32.xlu1 %v2341_v40, %s5177_s6 }
 0xf69   :  { %v5856_v45 = vpop.f32.mrb[40].mxu1 }
 0xf6a   :  { %v2186_v13 = vpop.f32.mrb[41].mxu1 }
 0xf6b   :  { %v2191_v1 = vadd.f32 %v5864_v28, %v2186_v13  ;;  %v2188_v3 = vpop.f32.mrb[42].mxu1 }
 0xf6c   :  { %v2189_v30 = vpop.f32.mrb[43].mxu1 }
 0xf6d   :  { %v2192_v31 = vsub.f32 %v4509_v50, %v2191_v1 }
 0xf6f   :  { %v2193_v57 = vmul.f32 %v4510_v29, %v2192_v31  ;;  %v2248_v7 = vand.u32 2147483647, %v2192_v31 }
 0xf71   :  { %v2194_v61 = vadd.f32 %v2193_v57, %v2191_v1 }
 0xf73   :  { %v2195_v8 = vpack.c.bf16 %v2194_v61, %v2194_v61  ;;  %v5921_v61 = vld [vmem:[%s6475_s13 + $0x1] ss:$0 sm:$0xff] }
 0xf75   :  { %4801 = vmatmul.mubr.msk.bf16.vlgmr.msra.gmra.mrb[44].mxu0 %vm84_vm0, %v2195_v8 }
 0xf76   :  { %2349 = vmatpush1.bf16.msra.mxu0 %v5874_v49  ;;  %2380 = vmatprep.mubr.bf16.mxu0 %v5173_v32 }
 0xf77   :  { %2350 = vmatprep.subr.bf16.mxu0 %v5881_v5 }
 0xf7a   :  { %2351 = vmatpush1.bf16.msra.mxu0 %v5887_v63 }
 0xf7b   :  { %4816 = vmatprep.subr.bf16.mxu0 %v5174_v21 }
 0xf92   :  { %v2344_v6 = vpop.permute.xlu1 %2343 }
 0xf93   :  { %4519 = vmatmul.mubr.msk.bf16.vlgmr.msra.gmra.mrb[48].mxu0 %vm944_vm1, %v2344_v6  ;;  %v4517_v6 = vld [vmem:[%s6477_s1 + $0x16] sm:$0x3] }
 0xf94   :  { %4817 = vmatpush3.bf16.msra.mxu0 %v5578_v53  ;;  %4818 = vmatprep.mubr.msk.bf16.mxu0 %vm5175_vm3, %v5174_v21 }
 0xf95   :  { %4822 = vmatprep.subr.bf16.mxu0 %v5174_v21 }
0x1048   :  { %v2233_v42 = vpop.f32.mrb[44].mxu0 }
0x1049   :  { %v2234_v37 = vadd.f32 %v5533_v0, %v2233_v42  ;;  %v4802_v47 = vpop.f32.mrb[45].mxu0  ;;  %v4511_v0 = vld [vmem:[%s6480_s2 + $0x6] sm:$0x3] }
0x104a   :  { %v2236_v20 = vpop.f32.mrb[46].mxu0 }
0x104b   :  { %v2239_v54 = vsub.f32 %v2234_v37, %v2191_v1  ;;  %v2249_v15 = vsub.f32 %v4509_v50, %v2234_v37  ;;  %v4803_v17 = vpop.f32.mrb[47].mxu0 }
0x104d   :  { %v2241_v60 = vrot.slane %v2239_v54, 2  ;;  %v2250_v38 = vand.u32 2147483647, %v2249_v15  ;;  %v2260_v15 = vrot.slane %v5585_v59, 6 }
0x104f   :  { %v2243_v16 = vmul.f32 %v5536_v10, %v2241_v60  ;;  %v2251_v18 = vadd.f32 %v2250_v38, %v2248_v7 }
0x1051   :  { %v2245_v48 = vrot.slane %v2243_v16, 6 }
0x1053   :  { %v2247_v56 = vadd.f32 %v2245_v48, %v2191_v1  ;;  %v4516_v1 = vld [vmem:[%s6476_s0 + $0x16] sm:$0x3] }
0x1055   :  { %v2252_v46 = vsub.f32 %v4509_v50, %v2247_v56 }
0x1057   :  { %v2253_v40 = vand.u32 2147483647, %v2252_v46  ;;  %v2257_v13 = vmul.f32 %v4510_v29, %v2252_v46 }
0x1059   :  { %v2254_v3 = vadd.f32 %v2253_v40, %v2251_v18  ;;  %v5901_v30 = vadd.f32 %v2257_v13, %v2247_v56 }
0x105b   :  { %v2255_v57 = vmul.f32 %v4511_v0, %v2254_v3  ;;  %v2259_v31 = vpack.c.bf16 %v5901_v30, %v5901_v30 }
0x105d   :  { %4807 = vmatmul.mubr.msk.bf16.vlgmr.msra.gmra.mrb[44].mxu1 %vm84_vm0, %v2259_v31  ;;  %v5907_v10 = vadd.f32 %v2255_v57, %v5768_v19 }
0x105e   :  { %4811 = vmatpush3.bf16.msra.mxu1 %v5561_v39  ;;  %4812 = vmatprep.mubr.msk.bf16.mxu1 %vm5175_vm3, %v5174_v21 }
0x105f   :  { %2546 = vmatprep.subr.bf16.mxu1 %v5777_v44 }
0x1066   :  { %v5913_v50 = vpop.f32.mrb[48].mxu0 }
0x1067   :  { %v2384_v29 = vpop.f32.mrb[49].mxu0 }
0x1068   :  { %v2389_v19 = vadd.f32 %v5921_v61, %v2384_v29  ;;  %v2386_v8 = vpop.f32.mrb[50].mxu0 }
0x1069   :  { %v2387_v42 = vpop.f32.mrb[51].mxu0 }
0x106a   :  { %v2390_v37 = vsub.f32 %v4516_v1, %v2389_v19 }
0x106c   :  { %v2391_v47 = vmul.f32 %v4517_v6, %v2390_v37  ;;  %v2446_v31 = vand.u32 2147483647, %v2390_v37 }
0x106e   :  { %v2392_v20 = vadd.f32 %v2391_v47, %v2389_v19 }
0x1070   :  { %v2393_v54 = vpack.c.bf16 %v2392_v20, %v2392_v20 }
0x1072   :  { %4813 = vmatmul.mubr.msk.bf16.vlgmr.msra.gmra.mrb[48].mxu1 %vm84_vm0, %v2393_v54 }
0x1073   :  { %2547 = vmatpush1.bf16.msra.mxu1 %v5793_v14  ;;  %2578 = vmatprep.mubr.bf16.mxu1 %v5173_v32 }
0x1074   :  { %2548 = vmatprep.subr.bf16.mxu1 %v5800_v12 }
0x1077   :  { %2549 = vmatpush1.bf16.msra.mxu1 %v5806_v43 }
0x1078   :  { %4828 = vmatprep.subr.bf16.mxu1 %v5174_v21 }
0x1130   :  { %v2299_v17 = vpop.f32.mrb[44].mxu1 }
0x1131   :  { %v2300_v60 = vadd.f32 %v2299_v17, %v2260_v15  ;;  %v4808_v7 = vpop.f32.mrb[45].mxu1 }
0x1132   :  { %v2302_v38 = vpop.f32.mrb[46].mxu1 }
0x1133   :  { %v2305_v16 = vadd.f32 %v2300_v60, %v5856_v45  ;;  %v4809_v18 = vpop.f32.mrb[47].mxu1  ;;  %v167_v38 = vmax.f32 %v5420_v51, 0.0  ;;  %v2458_v51 = vrot.slane %v5447_v11, 6 }
0x1135   :  { %5060 = vtanh.f32 %v2305_v16 }
0x113f   :  { %v5061_v48 = vpop.eup %5060 }
0x1140   :  { %2315 = vrot.lane.b32.xlu0 %v5061_v48, %s5176_s7 }
0x1145   :  { %v2431_v56 = vpop.f32.mrb[48].mxu1 }
0x1146   :  { %v2432_v46 = vadd.f32 %v5592_v36, %v2431_v56  ;;  %v4814_v40 = vpop.f32.mrb[49].mxu1  ;;  %v4518_v36 = vld [vmem:[%s6480_s2 + $0x16] sm:$0x3] }
0x1147   :  { %v2434_v13 = vpop.f32.mrb[50].mxu1 }
0x1148   :  { %v2437_v0 = vsub.f32 %v2432_v46, %v2389_v19  ;;  %v2447_v3 = vsub.f32 %v4516_v1, %v2432_v46  ;;  %v4815_v57 = vpop.f32.mrb[51].mxu1 }
0x114a   :  { %v2439_v59 = vrot.slane %v2437_v0, 2  ;;  %v2448_v29 = vand.u32 2147483647, %v2447_v3 }
0x114c   :  { %v2441_v8 = vmul.f32 %v5595_v24, %v2439_v59  ;;  %v2449_v42 = vadd.f32 %v2448_v29, %v2446_v31 }
0x114e   :  { %v2443_v45 = vrot.slane %v2441_v8, 6 }
0x1150   :  { %v2445_v47 = vadd.f32 %v2443_v45, %v2389_v19  ;;  %v4515_v19 = vmul.f32 -1.442695, %v2305_v16 }
0x1152   :  { %v2450_v20 = vsub.f32 %v4516_v1, %v2445_v47  ;;  %v5955_v1 = vld [vmem:[%s6508_s5 + $0x24] ss:$8 sps:$4 sm:$0xff]   ;;  %5062 = vpow2.f32 %v4515_v19 }
0x1154   :  { %v2451_v54 = vand.u32 2147483647, %v2450_v20  ;;  %v2455_v15 = vmul.f32 %v4517_v6, %v2450_v20 }
0x1156   :  { %v2452_v17 = vadd.f32 %v2451_v54, %v2449_v42  ;;  %v5941_v60 = vadd.f32 %v2455_v15, %v2445_v47  ;;  %v586_v54 = vmax.f32 %v5440_v2, 0.0 }
0x1158   :  { %v2453_v7 = vmul.f32 %v4518_v36, %v2452_v17  ;;  %v2457_v37 = vpack.c.bf16 %v5941_v60, %v5941_v60  ;;  %v588_v15 = vsub.f32 0.0, %v586_v54 }
0x115a   :  { %4819 = vmatmul.mubr.msk.bf16.vlgmr.msra.gmra.mrb[52].mxu0 %vm84_vm0, %v2457_v37  ;;  %v5947_v24 = vadd.f32 %v2453_v7, %v5823_v26  ;;  %v169_v26 = vsub.f32 0.0, %v167_v38  ;;  %v591_v36 = vmul.f32 1.442695, %v588_v15 }
0x115b   :  { %4823 = vmatpush3.bf16.msra.mxu0 %v5481_v22  ;;  %4824 = vmatprep.mubr.msk.bf16.mxu0 %vm5175_vm3, %v5174_v21 }
0x115c   :  { %2736 = vmatprep.subr.bf16.mxu0 %v5955_v1  ;;  %v5063_v6 = vpop.eup %5062  ;;  %v172_v48 = vmul.f32 1.442695, %v169_v26 }
0x115d   :  { %v2309_v18 = vadd.f32 1.0, %v5063_v6 }
0x115f   :  { %5064 = vrcp.f32 %v2309_v18 }
0x1160   :  { %5066 = vpow2.f32 %v172_v48 }
0x1169   :  { %v5065_v56 = vpop.eup %5064 }
0x116a   :  { %v5960_v13 = vpop.eup %5066  ;;  %v2313_v16 = vmul.f32 %v5065_v56, %v5834_v58 }
0x11b2   :  { %v2316_v46 = vpop.permute.xlu0 %2315 }
0x11b3   :  { %v2318_v40 = vmul.f32 %v5065_v56, %v2316_v46 }
0x11b5   :  { %2320 = vrot.lane.b32.xlu1 %v2318_v40, %s5177_s6 }
0x11b9   :  { %2535 = vrot.lane.b32.xlu1 %v5960_v13, %s5178_s11 }
0x1227   :  { %v2321_v0 = vpop.permute.xlu1 %2320 }
0x1228   :  { %v5965_v3 = vadd.f32 %v2321_v0, %v2313_v16 }
0x122a   :  { %5068 = vtanh.f32 %v5965_v3 }
0x122d   :  { %v2497_v57 = vpop.f32.mrb[52].mxu0 }
0x122e   :  { %v2498_v59 = vadd.f32 %v2497_v57, %v2458_v51  ;;  %v4820_v31 = vpop.f32.mrb[53].mxu0 }
0x122f   :  { %v2500_v29 = vpop.f32.mrb[54].mxu0 }
0x1230   :  { %v2503_v8 = vadd.f32 %v2498_v59, %v5913_v50  ;;  %v4821_v42 = vpop.f32.mrb[55].mxu0  ;;  %v2536_v50 = vpop.permute.xlu1 %2535 }
0x1232   :  { %5070 = vtanh.f32 %v2503_v8  ;;  %v4522_v58 = vmul.f32 -1.442695, %v2503_v8 }
0x1234   :  { %v5069_v45 = vpop.eup %5068  ;;  %5072 = vpow2.f32 %v4522_v58 }
0x1235   :  { %2326 = vrot.lane.b32.xlu0 %v5069_v45, %s5176_s7  ;;  %v4524_v45 = vld [vmem:[%s6477_s1 + $0x8] sm:$0x3] }
0x123c   :  { %v5071_v47 = vpop.eup %5070 }
0x123d   :  { %2513 = vrot.lane.b32.xlu1 %v5071_v47, %s5176_s7 }
0x123e   :  { %v5073_v20 = vpop.eup %5072 }
0x123f   :  { %v2507_v11 = vadd.f32 1.0, %v5073_v20 }
0x1241   :  { %5074 = vrcp.f32 %v2507_v11 }
0x1242   :  { %5076 = vpow2.f32 %v591_v36  ;;  %v4418_v36 = vmul.f32 -1.442695, %v5494_v27 }
0x124b   :  { %v5075_v6 = vpop.eup %5074 }
0x124c   :  { %v5975_v26 = vpop.eup %5076  ;;  %v2511_v48 = vmul.f32 %v5075_v6, %v5851_v33  ;;  %v4523_v33 = vld [vmem:[%s6476_s0 + $0x8] sm:$0x3] }
0x12a7   :  { %v2327_v17 = vpop.permute.xlu0 %2326 }
0x12a8   :  { %v2329_v7 = vmul.f32 %v5065_v56, %v2327_v17 }
0x12aa   :  { %v2538_v37 = vmul.f32 %v2536_v50, %v2329_v7 }
0x12ac   :  { %v2539_v19 = vpack.c.bf16 %v2538_v37, %v2538_v37  ;;  %v6014_v37 = vld [vmem:[%s6479_s15] ss:$0 sm:$0xff] }
0x12ae   :  { %2541 = vrot.lane.b32.xlu0 %v2539_v19, %s5177_s6 }
0x12af   :  { %v2514_v38 = vpop.permute.xlu1 %2513 }
0x12b0   :  { %v2516_v18 = vmul.f32 %v5075_v6, %v2514_v38 }
0x12b2   :  { %2518 = vrot.lane.b32.xlu0 %v2516_v18, %s5177_s6 }
0x12b6   :  { %2725 = vrot.lane.b32.xlu0 %v5975_v26, %s5178_s11 }
0x1320   :  { %v2542_v2 = vpop.permute.xlu0 %2541 }
0x1321   :  { %4526 = vmatmul.mubr.msk.bf16.vlgmr.msra.gmra.mrb[52].mxu1 %vm944_vm1, %v2542_v2 }
0x1322   :  { %4829 = vmatpush3.bf16.msra.mxu1 %v5526_v55  ;;  %4830 = vmatprep.mubr.msk.bf16.mxu1 %vm5175_vm3, %v5174_v21 }
0x1323   :  { %4834 = vmatprep.subr.bf16.mxu1 %v5174_v21 }
0x1324   :  { %v2519_v56 = vpop.permute.xlu0 %2518 }
0x1325   :  { %v5985_v46 = vadd.f32 %v2519_v56, %v2511_v48 }
0x1327   :  { %5078 = vtanh.f32 %v5985_v46 }
0x1328   :  { %v2726_v51 = vpop.permute.xlu0 %2725  ;;  %5080 = vpow2.f32 %v4418_v36 }
0x1331   :  { %v5079_v40 = vpop.eup %5078 }
0x1332   :  { %2524 = vrot.lane.b32.xlu1 %v5079_v40, %s5176_s7  ;;  %v5081_v17 = vpop.eup %5080 }
0x1333   :  { %v380_v7 = vadd.f32 1.0, %v5081_v17 }
0x1335   :  { %5082 = vrcp.f32 %v380_v7 }
0x133f   :  { %v6017_v56 = vpop.eup %5082 }
0x13a4   :  { %v2525_v16 = vpop.permute.xlu1 %2524 }
0x13a5   :  { %v2527_v0 = vmul.f32 %v5075_v6, %v2525_v16 }
0x13a7   :  { %v2728_v57 = vmul.f32 %v2726_v51, %v2527_v0 }
0x13a9   :  { %v2729_v59 = vpack.c.bf16 %v2728_v57, %v2728_v57 }
0x13ab   :  { %2731 = vrot.lane.b32.xlu1 %v2729_v59, %s5177_s6 }
0x13f4   :  { %v5990_v31 = vpop.f32.mrb[52].mxu1 }
0x13f5   :  { %v2582_v29 = vpop.f32.mrb[53].mxu1 }
0x13f6   :  { %v2587_v8 = vadd.f32 %v5864_v28, %v2582_v29  ;;  %v2584_v42 = vpop.f32.mrb[54].mxu1 }
0x13f7   :  { %v2585_v47 = vpop.f32.mrb[55].mxu1  ;;  %v4525_v42 = vld [vmem:[%s6480_s2 + $0x8] sm:$0x3] }
0x13f8   :  { %v2588_v58 = vsub.f32 %v4523_v33, %v2587_v8 }
0x13fa   :  { %v2589_v20 = vmul.f32 %v4524_v45, %v2588_v58  ;;  %v2638_v40 = vand.u32 2147483647, %v2588_v58 }
0x13fc   :  { %v2590_v54 = vadd.f32 %v2589_v20, %v2587_v8 }
0x13fe   :  { %v2591_v11 = vpack.c.bf16 %v2590_v54, %v2590_v54 }
0x1400   :  { %4825 = vmatmul.mubr.msk.bf16.vlgmr.msra.gmra.mrb[56].mxu0 %vm84_vm0, %v2591_v11 }
0x1401   :  { %2737 = vmatpush1.bf16.msra.mxu0 %v5874_v49  ;;  %2768 = vmatprep.mubr.bf16.mxu0 %v5173_v32 }
0x1402   :  { %2738 = vmatprep.subr.bf16.mxu0 %v5881_v5 }
0x1405   :  { %2739 = vmatpush1.bf16.msra.mxu0 %v5887_v63 }
0x1406   :  { %4840 = vmatprep.subr.bf16.mxu0 %v5174_v21 }
0x141d   :  { %v2732_v15 = vpop.permute.xlu1 %2731 }
0x141e   :  { %4533 = vmatmul.mubr.msk.bf16.vlgmr.msra.gmra.mrb[60].mxu0 %vm944_vm1, %v2732_v15 }
0x141f   :  { %4841 = vmatpush3.bf16.msra.mxu0 %v5578_v53  ;;  %4842 = vmatprep.mubr.msk.bf16.mxu0 %vm5175_vm3, %v5174_v21 }
0x1420   :  { %4846 = vmatprep.subr.bf16.mxu0 %v5174_v21 }
0x14d3   :  { %v2629_v50 = vpop.f32.mrb[56].mxu0 }
0x14d4   :  { %v2630_v19 = vadd.f32 %v6014_v37, %v2629_v50  ;;  %v4826_v6 = vpop.f32.mrb[57].mxu0 }
0x14d5   :  { %v2632_v38 = vpop.f32.mrb[58].mxu0 }
0x14d6   :  { %v2635_v18 = vsub.f32 %v2630_v19, %v2587_v8  ;;  %v2639_v2 = vsub.f32 %v4523_v33, %v2630_v19  ;;  %v4827_v48 = vpop.f32.mrb[59].mxu0  ;;  %v4446_v38 = vmul.f32 -1.442695, %v5499_v34  ;;  %v6057_v34 = vld [vmem:[%s6479_s15 + $0x1] ss:$0 sm:$0xff] }
0x14d8   :  { %v2636_v27 = vmul.f32 %v6017_v56, %v2635_v18  ;;  %v2640_v16 = vand.u32 2147483647, %v2639_v2  ;;  %5084 = vpow2.f32 %v4446_v38 }
0x14da   :  { %v2637_v0 = vadd.f32 %v2636_v27, %v2587_v8  ;;  %v2641_v51 = vadd.f32 %v2640_v16, %v2638_v40  ;;  %v4530_v8 = vld [vmem:[%s6476_s0 + $0x18] sm:$0x3] }
0x14dc   :  { %v2642_v57 = vsub.f32 %v4523_v33, %v2637_v0 }
0x14de   :  { %v2643_v59 = vand.u32 2147483647, %v2642_v57  ;;  %v2647_v29 = vmul.f32 %v4524_v45, %v2642_v57 }
0x14e0   :  { %v2644_v47 = vadd.f32 %v2643_v59, %v2641_v51  ;;  %v6023_v20 = vadd.f32 %v2647_v29, %v2637_v0 }
0x14e2   :  { %v2645_v54 = vmul.f32 %v4525_v42, %v2644_v47  ;;  %v2649_v11 = vpack.c.bf16 %v6023_v20, %v6023_v20  ;;  %v5085_v0 = vpop.eup %5084 }
0x14e3   :  { %v804_v57 = vadd.f32 1.0, %v5085_v0 }
0x14e4   :  { %4831 = vmatmul.mubr.msk.bf16.vlgmr.msra.gmra.mrb[56].mxu1 %vm84_vm0, %v2649_v11  ;;  %v6029_v58 = vadd.f32 %v2645_v54, %v5907_v10  ;;  %v4531_v10 = vld [vmem:[%s6477_s1 + $0x18] sm:$0x3] }
0x14e5   :  { %4835 = vmatpush3.bf16.msra.mxu1 %v5561_v39  ;;  %4836 = vmatprep.mubr.msk.bf16.mxu1 %vm5175_vm3, %v5174_v21 }
0x14e6   :  { %2926 = vmatprep.subr.bf16.mxu1 %v5777_v44 }
0x14f1   :  { %v6035_v33 = vpop.f32.mrb[60].mxu0 }
0x14f2   :  { %v2772_v45 = vpop.f32.mrb[61].mxu0 }
0x14f3   :  { %v2777_v15 = vadd.f32 %v5921_v61, %v2772_v45  ;;  %v2774_v36 = vpop.f32.mrb[62].mxu0 }
0x14f4   :  { %v2775_v17 = vpop.f32.mrb[63].mxu0 }
0x14f5   :  { %v2778_v7 = vsub.f32 %v4530_v8, %v2777_v15 }
0x14f7   :  { %v2779_v50 = vmul.f32 %v4531_v10, %v2778_v7  ;;  %v2828_v17 = vand.u32 2147483647, %v2778_v7 }
0x14f9   :  { %v2780_v19 = vadd.f32 %v2779_v50, %v2777_v15 }
0x14fb   :  { %v2781_v6 = vpack.c.bf16 %v2780_v19, %v2780_v19 }
0x14fd   :  { %4837 = vmatmul.mubr.msk.bf16.vlgmr.msra.gmra.mrb[60].mxu1 %vm84_vm0, %v2781_v6 }
0x14fe   :  { %2927 = vmatpush1.bf16.msra.mxu1 %v5793_v14  ;;  %2958 = vmatprep.mubr.bf16.mxu1 %v5173_v32 }
0x14ff   :  { %2928 = vmatprep.subr.bf16.mxu1 %v5800_v12 }
0x1502   :  { %2929 = vmatpush1.bf16.msra.mxu1 %v5806_v43 }
0x1503   :  { %4852 = vmatprep.subr.bf16.mxu1 %v5174_v21 }
0x15b7   :  { %v2687_v18 = vpop.f32.mrb[56].mxu1 }
0x15b8   :  { %v2688_v2 = vadd.f32 %v2687_v18, %v5433_v62  ;;  %v4832_v48 = vpop.f32.mrb[57].mxu1 }
0x15b9   :  { %v2690_v27 = vpop.f32.mrb[58].mxu1  ;;  %v4532_v48 = vld [vmem:[%s6480_s2 + $0x18] sm:$0x3] }
0x15ba   :  { %v2693_v40 = vadd.f32 %v2688_v2, %v5990_v31  ;;  %v4833_v16 = vpop.f32.mrb[59].mxu1 }
0x15bc   :  { %5086 = vtanh.f32 %v2693_v40 }
0x15bd   :  { %5088 = vrcp.f32 %v804_v57 }
0x15c6   :  { %v5087_v51 = vpop.eup %5086 }
0x15c7   :  { %2703 = vrot.lane.b32.xlu0 %v5087_v51, %s5176_s7  ;;  %v6060_v45 = vpop.eup %5088 }
0x15d0   :  { %v2819_v59 = vpop.f32.mrb[60].mxu1 }
0x15d1   :  { %v2820_v29 = vadd.f32 %v6057_v34, %v2819_v59  ;;  %v4838_v42 = vpop.f32.mrb[61].mxu1 }
0x15d2   :  { %v2822_v47 = vpop.f32.mrb[62].mxu1 }
0x15d3   :  { %v2825_v54 = vsub.f32 %v2820_v29, %v2777_v15  ;;  %v2829_v31 = vsub.f32 %v4530_v8, %v2820_v29  ;;  %v4839_v11 = vpop.f32.mrb[63].mxu1 }
0x15d5   :  { %v2826_v36 = vmul.f32 %v6060_v45, %v2825_v54  ;;  %v2830_v50 = vand.u32 2147483647, %v2829_v31 }
0x15d7   :  { %v2827_v19 = vadd.f32 %v2826_v36, %v2777_v15  ;;  %v2831_v6 = vadd.f32 %v2830_v50, %v2828_v17 }
0x15d9   :  { %v2832_v38 = vsub.f32 %v4530_v8, %v2827_v19  ;;  %v4529_v8 = vmul.f32 -1.442695, %v2693_v40 }
0x15db   :  { %v2833_v18 = vand.u32 2147483647, %v2832_v38  ;;  %v2837_v2 = vmul.f32 %v4531_v10, %v2832_v38  ;;  %5090 = vpow2.f32 %v4529_v8 }
0x15dd   :  { %v2834_v27 = vadd.f32 %v2833_v18, %v2831_v6  ;;  %v6066_v16 = vadd.f32 %v2837_v2, %v2827_v19 }
0x15df   :  { %v2835_v0 = vmul.f32 %v4532_v48, %v2834_v27  ;;  %v2839_v51 = vpack.c.bf16 %v6066_v16, %v6066_v16 }
0x15e1   :  { %4843 = vmatmul.mubr.msk.bf16.vlgmr.msra.gmra.mrb[64].mxu0 %vm84_vm0, %v2839_v51  ;;  %v6072_v7 = vadd.f32 %v2835_v0, %v5947_v24  ;;  %v2914_v24 = vrot.slane %v5960_v13, 2 }
0x15e2   :  { %4847 = vmatpush3.bf16.msra.mxu0 %v5481_v22  ;;  %4848 = vmatprep.mubr.msk.bf16.mxu0 %vm5175_vm3, %v5174_v21 }
0x15e3   :  { %3125 = vmatprep.subr.bf16.mxu0 %v5955_v1 }
0x15e5   :  { %v5091_v15 = vpop.eup %5090 }
0x15e6   :  { %v2697_v10 = vadd.f32 1.0, %v5091_v15 }
0x15e8   :  { %5092 = vrcp.f32 %v2697_v10  ;;  %v3113_v10 = vrot.slane %v5975_v26, 2 }
0x15f2   :  { %v5093_v57 = vpop.eup %5092 }
0x15f3   :  { %v2701_v42 = vmul.f32 %v5093_v57, %v5965_v3 }
0x1639   :  { %v2704_v59 = vpop.permute.xlu0 %2703 }
0x163a   :  { %v2706_v29 = vmul.f32 %v5093_v57, %v2704_v59 }
0x163c   :  { %2708 = vrot.lane.b32.xlu1 %v2706_v29, %s5177_s6 }
0x1640   :  { %2915 = vrot.lane.b32.xlu1 %v2914_v24, %s5178_s11 }
0x16ae   :  { %v2709_v47 = vpop.permute.xlu1 %2708 }
0x16af   :  { %v6082_v54 = vadd.f32 %v2709_v47, %v2701_v42 }
0x16b1   :  { %5094 = vtanh.f32 %v6082_v54 }
0x16b2   :  { %v2916_v27 = vpop.permute.xlu1 %2915 }
0x16b4   :  { %v2877_v40 = vpop.f32.mrb[64].mxu0 }
0x16b5   :  { %v2878_v31 = vadd.f32 %v2877_v40, %v5445_v9  ;;  %v4844_v11 = vpop.f32.mrb[65].mxu0 }
0x16b6   :  { %v2880_v36 = vpop.f32.mrb[66].mxu0 }
0x16b7   :  { %v2883_v17 = vadd.f32 %v2878_v31, %v6035_v33  ;;  %v4845_v50 = vpop.f32.mrb[67].mxu0 }
0x16b9   :  { %5096 = vtanh.f32 %v2883_v17  ;;  %v4536_v3 = vmul.f32 -1.442695, %v2883_v17 }
0x16bb   :  { %v5095_v19 = vpop.eup %5094  ;;  %5098 = vpow2.f32 %v4536_v3  ;;  %v4538_v3 = vld [vmem:[%s6477_s1 + $0xa] sm:$0x3] }
0x16bc   :  { %2714 = vrot.lane.b32.xlu0 %v5095_v19, %s5176_s7 }
0x16c3   :  { %v5097_v6 = vpop.eup %5096 }
0x16c4   :  { %2893 = vrot.lane.b32.xlu1 %v5097_v6, %s5176_s7 }
0x16c5   :  { %v5099_v38 = vpop.eup %5098 }
0x16c6   :  { %v2887_v18 = vadd.f32 1.0, %v5099_v38 }
0x16c8   :  { %5100 = vrcp.f32 %v2887_v18 }
0x16d2   :  { %v5101_v33 = vpop.eup %5100 }
0x172e   :  { %v2715_v2 = vpop.permute.xlu0 %2714 }
0x172f   :  { %v2717_v48 = vmul.f32 %v5093_v57, %v2715_v2  ;;  %v2891_v57 = vmul.f32 %v5101_v33, %v5985_v46  ;;  %v4537_v46 = vld [vmem:[%s6476_s0 + $0xa] sm:$0x3] }
0x1731   :  { %v2918_v0 = vmul.f32 %v2916_v27, %v2717_v48 }
0x1733   :  { %v2919_v51 = vpack.c.bf16 %v2918_v0, %v2918_v0 }
0x1735   :  { %2921 = vrot.lane.b32.xlu0 %v2919_v51, %s5177_s6 }
0x1736   :  { %v2894_v8 = vpop.permute.xlu1 %2893 }
0x1737   :  { %v2896_v15 = vmul.f32 %v5101_v33, %v2894_v8 }
0x1739   :  { %2898 = vrot.lane.b32.xlu0 %v2896_v15, %s5177_s6 }
0x173d   :  { %3114 = vrot.lane.b32.xlu0 %v3113_v10, %s5178_s11 }
0x17a7   :  { %v2922_v59 = vpop.permute.xlu0 %2921 }
0x17a8   :  { %4540 = vmatmul.mubr.msk.bf16.vlgmr.msra.gmra.mrb[64].mxu1 %vm944_vm1, %v2922_v59 }
0x17a9   :  { %4853 = vmatpush3.bf16.msra.mxu1 %v5526_v55  ;;  %4854 = vmatprep.mubr.msk.bf16.mxu1 %vm5175_vm3, %v5174_v21 }
0x17aa   :  { %4858 = vmatprep.subr.bf16.mxu1 %v5174_v21 }
0x17ab   :  { %v2899_v29 = vpop.permute.xlu0 %2898 }
0x17ac   :  { %v6099_v24 = vadd.f32 %v2899_v29, %v2891_v57 }
0x17ae   :  { %5102 = vtanh.f32 %v6099_v24 }
0x17af   :  { %v3115_v31 = vpop.permute.xlu0 %3114 }
0x17b8   :  { %v5103_v42 = vpop.eup %5102 }
0x17b9   :  { %2904 = vrot.lane.b32.xlu1 %v5103_v42, %s5176_s7 }
0x182b   :  { %v2905_v47 = vpop.permute.xlu1 %2904 }
0x182c   :  { %v2907_v40 = vmul.f32 %v5101_v33, %v2905_v47 }
0x182e   :  { %v3117_v11 = vmul.f32 %v3115_v31, %v2907_v40 }
0x1830   :  { %v3118_v36 = vpack.c.bf16 %v3117_v11, %v3117_v11 }
0x1832   :  { %3120 = vrot.lane.b32.xlu1 %v3118_v36, %s5177_s6 }
0x187b   :  { %v6104_v17 = vpop.f32.mrb[64].mxu1 }
0x187c   :  { %v2962_v50 = vpop.f32.mrb[65].mxu1 }
0x187d   :  { %v2967_v19 = vadd.f32 %v5864_v28, %v2962_v50  ;;  %v2964_v6 = vpop.f32.mrb[66].mxu1 }
0x187e   :  { %v2965_v38 = vpop.f32.mrb[67].mxu1 }
0x187f   :  { %v2968_v18 = vsub.f32 %v4537_v46, %v2967_v19 }
0x1881   :  { %v2969_v2 = vmul.f32 %v4538_v3, %v2968_v18  ;;  %v3024_v42 = vand.u32 2147483647, %v2968_v18 }
0x1883   :  { %v2970_v48 = vadd.f32 %v2969_v2, %v2967_v19  ;;  %v4539_v2 = vld [vmem:[%s6480_s2 + $0xa] sm:$0x3] }
0x1885   :  { %v2971_v27 = vpack.c.bf16 %v2970_v48, %v2970_v48 }
0x1887   :  { %4849 = vmatmul.mubr.msk.bf16.vlgmr.msra.gmra.mrb[68].mxu0 %vm84_vm0, %v2971_v27 }
0x1888   :  { %3126 = vmatpush1.bf16.msra.mxu0 %v5874_v49  ;;  %3157 = vmatprep.mubr.bf16.mxu0 %v5173_v32 }
0x1889   :  { %3127 = vmatprep.subr.bf16.mxu0 %v5881_v5 }
0x188c   :  { %3128 = vmatpush1.bf16.msra.mxu0 %v5887_v63 }
0x188d   :  { %4864 = vmatprep.subr.bf16.mxu0 %v5174_v21 }
0x18a4   :  { %v3121_v0 = vpop.permute.xlu1 %3120 }
0x18a5   :  { %4547 = vmatmul.mubr.msk.bf16.vlgmr.msra.gmra.mrb[72].mxu0 %vm944_vm1, %v3121_v0 }
0x18a6   :  { %4865 = vmatpush3.bf16.msra.mxu0 %v5578_v53  ;;  %4866 = vmatprep.mubr.msk.bf16.mxu0 %vm5175_vm3, %v5174_v21 }
0x18a7   :  { %4870 = vmatprep.subr.bf16.mxu0 %v5174_v21 }
0x195a   :  { %v3009_v51 = vpop.f32.mrb[68].mxu0 }
0x195b   :  { %v3010_v33 = vadd.f32 %v6014_v37, %v3009_v51  ;;  %v4850_v8 = vpop.f32.mrb[69].mxu0 }
0x195c   :  { %v3012_v15 = vpop.f32.mrb[70].mxu0 }
0x195d   :  { %v3015_v10 = vsub.f32 %v3010_v33, %v2967_v19  ;;  %v3025_v59 = vsub.f32 %v4537_v46, %v3010_v33  ;;  %v4851_v57 = vpop.f32.mrb[71].mxu0 }
0x195f   :  { %v3017_v29 = vrot.slane %v3015_v10, 6  ;;  %v3026_v47 = vand.u32 2147483647, %v3025_v59 }
0x1961   :  { %v3019_v40 = vmul.f32 %v6017_v56, %v3017_v29  ;;  %v3027_v31 = vadd.f32 %v3026_v47, %v3024_v42 }
0x1963   :  { %v3021_v11 = vrot.slane %v3019_v40, 2 }
0x1965   :  { %v3023_v36 = vadd.f32 %v3021_v11, %v2967_v19  ;;  %v4544_v19 = vld [vmem:[%s6476_s0 + $0x1a] sm:$0x3] }
0x1967   :  { %v3028_v50 = vsub.f32 %v4537_v46, %v3023_v36 }
0x1969   :  { %v3029_v6 = vand.u32 2147483647, %v3028_v50  ;;  %v3033_v38 = vmul.f32 %v4538_v3, %v3028_v50 }
0x196b   :  { %v3030_v48 = vadd.f32 %v3029_v6, %v3027_v31  ;;  %v6129_v27 = vadd.f32 %v3033_v38, %v3023_v36 }
0x196d   :  { %v3035_v0 = vpack.c.bf16 %v6129_v27, %v6129_v27  ;;  %v3031_v18 = vmul.f32 %v4539_v2, %v3030_v48 }
0x196f   :  { %4855 = vmatmul.mubr.msk.bf16.vlgmr.msra.gmra.mrb[68].mxu1 %vm84_vm0, %v3035_v0  ;;  %v6135_v51 = vadd.f32 %v3031_v18, %v6029_v58  ;;  %v4545_v58 = vld [vmem:[%s6477_s1 + $0x1a] sm:$0x3] }
0x1970   :  { %4859 = vmatpush3.bf16.msra.mxu1 %v5561_v39  ;;  %4860 = vmatprep.mubr.msk.bf16.mxu1 %vm5175_vm3, %v5174_v21 }
0x1971   :  { %3324 = vmatprep.subr.bf16.mxu1 %v5777_v44  ;;  %v3037_v44 = vrot.slane %v5433_v62, 2 }
0x1978   :  { %v6141_v46 = vpop.f32.mrb[72].mxu0 }
0x1979   :  { %v3161_v3 = vpop.f32.mrb[73].mxu0 }
0x197a   :  { %v3166_v33 = vadd.f32 %v5921_v61, %v3161_v3  ;;  %v3163_v8 = vpop.f32.mrb[74].mxu0 }
0x197b   :  { %v3164_v15 = vpop.f32.mrb[75].mxu0 }
0x197c   :  { %v3167_v10 = vsub.f32 %v4544_v19, %v3166_v33 }
0x197e   :  { %v3168_v59 = vmul.f32 %v4545_v58, %v3167_v10  ;;  %v3223_v18 = vand.u32 2147483647, %v3167_v10 }
0x1980   :  { %v3169_v57 = vadd.f32 %v3168_v59, %v3166_v33 }
0x1982   :  { %v3170_v29 = vpack.c.bf16 %v3169_v57, %v3169_v57 }
0x1984   :  { %4861 = vmatmul.mubr.msk.bf16.vlgmr.msra.gmra.mrb[72].mxu1 %vm84_vm0, %v3170_v29 }
0x1985   :  { %3325 = vmatpush1.bf16.msra.mxu1 %v5793_v14  ;;  %3356 = vmatprep.mubr.bf16.mxu1 %v5173_v32 }
0x1986   :  { %3326 = vmatprep.subr.bf16.mxu1 %v5800_v12 }
0x1989   :  { %3327 = vmatpush1.bf16.msra.mxu1 %v5806_v43 }
0x198a   :  { %4876 = vmatprep.subr.bf16.mxu1 %v5174_v21 }
0x1a42   :  { %v3076_v42 = vpop.f32.mrb[68].mxu1 }
0x1a43   :  { %v3077_v47 = vadd.f32 %v3076_v42, %v3037_v44  ;;  %v4856_v40 = vpop.f32.mrb[69].mxu1  ;;  %v4546_v42 = vld [vmem:[%s6480_s2 + $0x1a] sm:$0x3] }
0x1a44   :  { %v3079_v31 = vpop.f32.mrb[70].mxu1 }
0x1a45   :  { %v3082_v11 = vadd.f32 %v3077_v47, %v6104_v17  ;;  %v4857_v36 = vpop.f32.mrb[71].mxu1 }
0x1a47   :  { %5104 = vtanh.f32 %v3082_v11 }
0x1a51   :  { %v5105_v50 = vpop.eup %5104 }
0x1a52   :  { %3092 = vrot.lane.b32.xlu0 %v5105_v50, %s5176_s7 }
0x1a57   :  { %v3208_v14 = vpop.f32.mrb[72].mxu1 }
0x1a58   :  { %v3209_v12 = vadd.f32 %v6057_v34, %v3208_v14  ;;  %v4862_v6 = vpop.f32.mrb[73].mxu1 }
0x1a59   :  { %v3211_v43 = vpop.f32.mrb[74].mxu1 }
0x1a5a   :  { %v3214_v38 = vsub.f32 %v3209_v12, %v3166_v33  ;;  %v3224_v2 = vsub.f32 %v4544_v19, %v3209_v12  ;;  %v4863_v48 = vpop.f32.mrb[75].mxu1 }
0x1a5c   :  { %v3216_v0 = vrot.slane %v3214_v38, 6  ;;  %v3225_v3 = vand.u32 2147483647, %v3224_v2 }
0x1a5e   :  { %v3218_v8 = vmul.f32 %v6060_v45, %v3216_v0  ;;  %v3226_v15 = vadd.f32 %v3225_v3, %v3223_v18 }
0x1a60   :  { %v3220_v17 = vrot.slane %v3218_v8, 2 }
0x1a62   :  { %v3222_v59 = vadd.f32 %v3220_v17, %v3166_v33 }
0x1a64   :  { %v3227_v57 = vsub.f32 %v4544_v19, %v3222_v59  ;;  %v4543_v19 = vmul.f32 -1.442695, %v3082_v11  ;;  %v3236_v11 = vrot.slane %v5445_v9, 2 }
0x1a66   :  { %v3228_v29 = vand.u32 2147483647, %v3227_v57  ;;  %v3232_v44 = vmul.f32 %v4545_v58, %v3227_v57  ;;  %5106 = vpow2.f32 %v4543_v19 }
0x1a68   :  { %v3229_v47 = vadd.f32 %v3228_v29, %v3226_v15  ;;  %v6164_v40 = vadd.f32 %v3232_v44, %v3222_v59 }
0x1a6a   :  { %v3234_v31 = vpack.c.bf16 %v6164_v40, %v6164_v40  ;;  %v3230_v10 = vmul.f32 %v4546_v42, %v3229_v47 }
0x1a6c   :  { %4867 = vmatmul.mubr.msk.bf16.vlgmr.msra.gmra.mrb[76].mxu0 %vm84_vm0, %v3234_v31  ;;  %v6170_v36 = vadd.f32 %v3230_v10, %v6072_v7  ;;  %v3312_v7 = vrot.slane %v5960_v13, 4 }
0x1a6d   :  { %4871 = vmatpush3.bf16.msra.mxu0 %v5481_v22  ;;  %4872 = vmatprep.mubr.msk.bf16.mxu0 %vm5175_vm3, %v5174_v21 }
0x1a6e   :  { %3522 = vmatprep.subr.bf16.mxu0 %v5955_v1 }
0x1a70   :  { %v5107_v33 = vpop.eup %5106 }
0x1a71   :  { %v3086_v58 = vadd.f32 1.0, %v5107_v33  ;;  %v3510_v33 = vrot.slane %v5975_v26, 4 }
0x1a73   :  { %5108 = vrcp.f32 %v3086_v58 }
0x1a7d   :  { %v5109_v50 = vpop.eup %5108 }
0x1a7e   :  { %v3090_v6 = vmul.f32 %v5109_v50, %v6082_v54 }
0x1ac4   :  { %v3093_v14 = vpop.permute.xlu0 %3092 }
0x1ac5   :  { %v3095_v12 = vmul.f32 %v5109_v50, %v3093_v14 }
0x1ac7   :  { %3097 = vrot.lane.b32.xlu1 %v3095_v12, %s5177_s6 }
0x1acb   :  { %3313 = vrot.lane.b32.xlu1 %v3312_v7, %s5178_s11 }
0x1b39   :  { %v3098_v43 = vpop.permute.xlu1 %3097 }
0x1b3a   :  { %v6180_v38 = vadd.f32 %v3098_v43, %v3090_v6 }
0x1b3c   :  { %5110 = vtanh.f32 %v6180_v38 }
0x1b3d   :  { %v3314_v42 = vpop.permute.xlu1 %3313 }
0x1b3f   :  { %v3275_v2 = vpop.f32.mrb[76].mxu0 }
0x1b40   :  { %v3276_v48 = vadd.f32 %v3275_v2, %v3236_v11  ;;  %v4868_v0 = vpop.f32.mrb[77].mxu0 }
0x1b41   :  { %v3278_v18 = vpop.f32.mrb[78].mxu0 }
0x1b42   :  { %v3281_v3 = vadd.f32 %v3276_v48, %v6141_v46  ;;  %v4869_v8 = vpop.f32.mrb[79].mxu0 }
0x1b44   :  { %5112 = vtanh.f32 %v3281_v3  ;;  %v4550_v54 = vmul.f32 -1.442695, %v3281_v3 }
0x1b46   :  { %v5111_v15 = vpop.eup %5110  ;;  %5114 = vpow2.f32 %v4550_v54 }
0x1b47   :  { %3103 = vrot.lane.b32.xlu0 %v5111_v15, %s5176_s7  ;;  %v4552_v15 = vld [vmem:[%s6477_s1 + $0xc] sm:$0x3] }
0x1b4e   :  { %v5113_v17 = vpop.eup %5112 }
0x1b4f   :  { %3291 = vrot.lane.b32.xlu1 %v5113_v17, %s5176_s7 }
0x1b50   :  { %v5115_v59 = vpop.eup %5114 }
0x1b51   :  { %v3285_v57 = vadd.f32 1.0, %v5115_v59 }
0x1b53   :  { %5116 = vrcp.f32 %v3285_v57 }
0x1b5d   :  { %v5117_v46 = vpop.eup %5116 }
0x1bb9   :  { %v3104_v29 = vpop.permute.xlu0 %3103 }
0x1bba   :  { %v3106_v44 = vmul.f32 %v5109_v50, %v3104_v29  ;;  %v3289_v50 = vmul.f32 %v5117_v46, %v6099_v24  ;;  %v4551_v24 = vld [vmem:[%s6476_s0 + $0xc] sm:$0x3] }
0x1bbc   :  { %v3316_v47 = vmul.f32 %v3314_v42, %v3106_v44 }
0x1bbe   :  { %v3317_v31 = vpack.c.bf16 %v3316_v47, %v3316_v47 }
0x1bc0   :  { %3319 = vrot.lane.b32.xlu0 %v3317_v31, %s5177_s6 }
0x1bc1   :  { %v3292_v10 = vpop.permute.xlu1 %3291 }
0x1bc2   :  { %v3294_v19 = vmul.f32 %v5117_v46, %v3292_v10 }
0x1bc4   :  { %3296 = vrot.lane.b32.xlu0 %v3294_v19, %s5177_s6 }
0x1bc8   :  { %3511 = vrot.lane.b32.xlu0 %v3510_v33, %s5178_s11 }
0x1c32   :  { %v3320_v58 = vpop.permute.xlu0 %3319 }
0x1c33   :  { %4554 = vmatmul.mubr.msk.bf16.vlgmr.msra.gmra.mrb[76].mxu1 %vm944_vm1, %v3320_v58 }
0x1c34   :  { %4877 = vmatpush3.bf16.msra.mxu1 %v5526_v55  ;;  %4878 = vmatprep.mubr.msk.bf16.mxu1 %vm5175_vm3, %v5174_v21 }
0x1c35   :  { %4882 = vmatprep.subr.bf16.mxu1 %v5174_v21 }
0x1c36   :  { %v3297_v14 = vpop.permute.xlu0 %3296 }
0x1c37   :  { %v6197_v12 = vadd.f32 %v3297_v14, %v3289_v50 }
0x1c39   :  { %5118 = vtanh.f32 %v6197_v12 }
0x1c3a   :  { %v3512_v11 = vpop.permute.xlu0 %3511 }
0x1c43   :  { %v5119_v7 = vpop.eup %5118 }
0x1c44   :  { %3302 = vrot.lane.b32.xlu1 %v5119_v7, %s5176_s7 }
0x1cb6   :  { %v3303_v6 = vpop.permute.xlu1 %3302 }
0x1cb7   :  { %v3305_v43 = vmul.f32 %v5117_v46, %v3303_v6 }
0x1cb9   :  { %v3514_v2 = vmul.f32 %v3512_v11, %v3305_v43  ;;  %v4553_v11 = vld [vmem:[%s6480_s2 + $0xc] sm:$0x3] }
0x1cbb   :  { %v3515_v48 = vpack.c.bf16 %v3514_v2, %v3514_v2 }
0x1cbd   :  { %3517 = vrot.lane.b32.xlu1 %v3515_v48, %s5177_s6 }
0x1d06   :  { %v6202_v0 = vpop.f32.mrb[76].mxu1 }
0x1d07   :  { %v3360_v18 = vpop.f32.mrb[77].mxu1 }
0x1d08   :  { %v3365_v3 = vadd.f32 %v5864_v28, %v3360_v18  ;;  %v3362_v8 = vpop.f32.mrb[78].mxu1 }
0x1d09   :  { %v3363_v17 = vpop.f32.mrb[79].mxu1 }
0x1d0a   :  { %v3366_v54 = vsub.f32 %v4551_v24, %v3365_v3 }
0x1d0c   :  { %v3367_v59 = vmul.f32 %v4552_v15, %v3366_v54  ;;  %v3422_v10 = vand.u32 2147483647, %v3366_v54 }
0x1d0e   :  { %v3368_v57 = vadd.f32 %v3367_v59, %v3365_v3 }
0x1d10   :  { %v3369_v29 = vpack.c.bf16 %v3368_v57, %v3368_v57  ;;  %v4559_v57 = vld [vmem:[%s6477_s1 + $0x1c] sm:$0x3] }
0x1d12   :  { %4873 = vmatmul.mubr.msk.bf16.vlgmr.msra.gmra.mrb[80].mxu0 %vm84_vm0, %v3369_v29 }
0x1d13   :  { %3523 = vmatpush1.bf16.msra.mxu0 %v5874_v49  ;;  %3554 = vmatprep.mubr.bf16.mxu0 %v5173_v32 }
0x1d14   :  { %3524 = vmatprep.subr.bf16.mxu0 %v5881_v5 }
0x1d17   :  { %3525 = vmatpush1.bf16.msra.mxu0 %v5887_v63 }
0x1d18   :  { %4888 = vmatprep.subr.bf16.mxu0 %v5174_v21 }
0x1d2f   :  { %v3518_v28 = vpop.permute.xlu1 %3517 }
0x1d30   :  { %4561 = vmatmul.mubr.msk.bf16.vlgmr.msra.gmra.mrb[84].mxu0 %vm944_vm1, %v3518_v28 }
0x1d31   :  { %4889 = vmatpush3.bf16.msra.mxu0 %v5578_v53  ;;  %4890 = vmatprep.mubr.msk.bf16.mxu0 %vm5175_vm3, %v5174_v21 }
0x1d32   :  { %4894 = vmatprep.subr.bf16.mxu0 %v5174_v21 }
0x1de5   :  { %v3407_v44 = vpop.f32.mrb[80].mxu0 }
0x1de6   :  { %v3408_v49 = vadd.f32 %v6014_v37, %v3407_v44  ;;  %v4874_v42 = vpop.f32.mrb[81].mxu0 }
0x1de7   :  { %v3410_v47 = vpop.f32.mrb[82].mxu0 }
0x1de8   :  { %v3413_v5 = vsub.f32 %v3408_v49, %v3365_v3  ;;  %v3423_v31 = vsub.f32 %v4551_v24, %v3408_v49  ;;  %v4875_v63 = vpop.f32.mrb[83].mxu0  ;;  %v5165_v47 = vld [vmem:[%s6508_s5] ss:$8 sps:$4 sm:$0xff]  }
0x1dea   :  { %v3415_v46 = vrot.slane %v3413_v5, 4  ;;  %v3424_v19 = vand.u32 2147483647, %v3423_v31  ;;  %v5167_v5 = vld [vmem:[%s6508_s5 + $0x10] ss:$8 sps:$4 sm:$0xff]   ;;  %v3434_v31 = vrot.slane %v5433_v62, 4 }
0x1dec   :  { %v3417_v33 = vmul.f32 %v6017_v56, %v3415_v46  ;;  %v3425_v58 = vadd.f32 %v3424_v19, %v3422_v10 }
0x1dee   :  { %v3419_v50 = vrot.slane %v3417_v33, 4 }
0x1df0   :  { %v3421_v14 = vadd.f32 %v3419_v50, %v3365_v3 }
0x1df2   :  { %v3426_v7 = vsub.f32 %v4551_v24, %v3421_v14  ;;  %v5164_v24 = vld [vmem:[%s6508_s5 + $0x4] ss:$8 sps:$4 sm:$0xff]  }
0x1df4   :  { %v3427_v6 = vand.u32 2147483647, %v3426_v7  ;;  %v3431_v43 = vmul.f32 %v4552_v15, %v3426_v7  ;;  %v4558_v15 = vld [vmem:[%s6476_s0 + $0x1c] sm:$0x3] }
0x1df6   :  { %v3428_v2 = vadd.f32 %v3427_v6, %v3425_v58  ;;  %v6227_v48 = vadd.f32 %v3431_v43, %v3421_v14 }
0x1df8   :  { %v3433_v18 = vpack.c.bf16 %v6227_v48, %v6227_v48  ;;  %v3429_v8 = vmul.f32 %v4553_v11, %v3428_v2 }
0x1dfa   :  { %4879 = vmatmul.mubr.msk.bf16.vlgmr.msra.gmra.mrb[80].mxu1 %vm84_vm0, %v3433_v18  ;;  %v6233_v17 = vadd.f32 %v3429_v8, %v6135_v51 }
0x1dfb   :  { %4883 = vmatpush3.bf16.msra.mxu1 %v5561_v39  ;;  %4884 = vmatprep.mubr.msk.bf16.mxu1 %vm5175_vm3, %v5174_v21 }
0x1dfc   :  { %3720 = vmatprep.subr.bf16.mxu1 %v5164_v24 }
0x1e03   :  { %v6241_v3 = vpop.f32.mrb[84].mxu0 }
0x1e04   :  { %v3558_v54 = vpop.f32.mrb[85].mxu0 }
0x1e05   :  { %v3563_v51 = vadd.f32 %v5921_v61, %v3558_v54  ;;  %v3560_v59 = vpop.f32.mrb[86].mxu0  ;;  %v5166_v61 = vld [vmem:[%s6508_s5 + $0x14] ss:$8 sps:$4 sm:$0xff]  }
0x1e06   :  { %v3561_v29 = vpop.f32.mrb[87].mxu0 }
0x1e07   :  { %v3564_v28 = vsub.f32 %v4558_v15, %v3563_v51 }
0x1e09   :  { %v3565_v44 = vmul.f32 %v4559_v57, %v3564_v28  ;;  %v3620_v24 = vand.u32 2147483647, %v3564_v28 }
0x1e0b   :  { %v3566_v49 = vadd.f32 %v3565_v44, %v3563_v51 }
0x1e0d   :  { %v3567_v42 = vpack.c.bf16 %v3566_v49, %v3566_v49 }
0x1e0f   :  { %4885 = vmatmul.mubr.msk.bf16.vlgmr.msra.gmra.mrb[84].mxu1 %vm84_vm0, %v3567_v42 }
0x1e10   :  { %3721 = vmatpush1.bf16.msra.mxu1 %v5165_v47  ;;  %3752 = vmatprep.mubr.bf16.mxu1 %v5173_v32 }
0x1e11   :  { %3722 = vmatprep.subr.bf16.mxu1 %v5166_v61  ;;  %v4560_v61 = vld [vmem:[%s6480_s2 + $0x1c] sm:$0x3] }
0x1e14   :  { %3723 = vmatpush1.bf16.msra.mxu1 %v5167_v5 }
0x1e15   :  { %4900 = vmatprep.subr.bf16.mxu1 %v5174_v21 }
0x1ecd   :  { %v3473_v63 = vpop.f32.mrb[80].mxu1 }
0x1ece   :  { %v3474_v46 = vadd.f32 %v3473_v63, %v3434_v31  ;;  %v4880_v10 = vpop.f32.mrb[81].mxu1 }
0x1ecf   :  { %v3476_v19 = vpop.f32.mrb[82].mxu1 }
0x1ed0   :  { %v3479_v33 = vadd.f32 %v3474_v46, %v6202_v0  ;;  %v4881_v58 = vpop.f32.mrb[83].mxu1 }
0x1ed2   :  { %5120 = vtanh.f32 %v3479_v33 }
0x1edc   :  { %v5121_v50 = vpop.eup %5120 }
0x1edd   :  { %3489 = vrot.lane.b32.xlu0 %v5121_v50, %s5176_s7 }
0x1ee2   :  { %v3605_v14 = vpop.f32.mrb[84].mxu1 }
0x1ee3   :  { %v3606_v7 = vadd.f32 %v6057_v34, %v3605_v14  ;;  %v4886_v6 = vpop.f32.mrb[85].mxu1 }
0x1ee4   :  { %v3608_v43 = vpop.f32.mrb[86].mxu1 }
0x1ee5   :  { %v3611_v11 = vsub.f32 %v3606_v7, %v3563_v51  ;;  %v3621_v2 = vsub.f32 %v4558_v15, %v3606_v7  ;;  %v4887_v18 = vpop.f32.mrb[87].mxu1 }
0x1ee7   :  { %v3613_v8 = vrot.slane %v3611_v11, 4  ;;  %v3622_v54 = vand.u32 2147483647, %v3621_v2 }
0x1ee9   :  { %v3615_v59 = vmul.f32 %v6060_v45, %v3613_v8  ;;  %v3623_v29 = vadd.f32 %v3622_v54, %v3620_v24 }
0x1eeb   :  { %v3617_v0 = vrot.slane %v3615_v59, 4 }
0x1eed   :  { %v3619_v44 = vadd.f32 %v3617_v0, %v3563_v51 }
0x1eef   :  { %v3624_v49 = vsub.f32 %v4558_v15, %v3619_v44  ;;  %v4557_v15 = vmul.f32 -1.442695, %v3479_v33 }
0x1ef1   :  { %v3625_v42 = vand.u32 2147483647, %v3624_v49  ;;  %v3629_v47 = vmul.f32 %v4559_v57, %v3624_v49  ;;  %5122 = vpow2.f32 %v4557_v15 }
0x1ef3   :  { %v3626_v5 = vadd.f32 %v3625_v42, %v3623_v29  ;;  %v6270_v31 = vadd.f32 %v3629_v47, %v3619_v44  ;;  %v3906_v47 = vrot.slane %v5975_v26, 6 }
0x1ef5   :  { %v3631_v63 = vpack.c.bf16 %v6270_v31, %v6270_v31  ;;  %v3627_v28 = vmul.f32 %v4560_v61, %v3626_v5 }
0x1ef7   :  { %4891 = vmatmul.mubr.msk.bf16.vlgmr.msra.gmra.mrb[88].mxu0 %vm84_vm0, %v3631_v63  ;;  %v6276_v46 = vadd.f32 %v3627_v28, %v6170_v36  ;;  %v3708_v36 = vrot.slane %v5960_v13, 6 }
0x1ef8   :  { %4895 = vmatpush3.bf16.msra.mxu0 %v5481_v22  ;;  %4896 = vmatprep.mubr.msk.bf16.mxu0 %vm5175_vm3, %v5174_v21 }
0x1ef9   :  { %3918 = vmatprep.subr.bf16.mxu0 %v5955_v1  ;;  %v3632_v1 = vrot.slane %v5445_v9, 4 }
0x1efb   :  { %v5123_v51 = vpop.eup %5122 }
0x1efc   :  { %v3483_v57 = vadd.f32 1.0, %v5123_v51 }
0x1efe   :  { %5124 = vrcp.f32 %v3483_v57 }
0x1f08   :  { %v5125_v10 = vpop.eup %5124 }
0x1f09   :  { %v3487_v22 = vmul.f32 %v5125_v10, %v6180_v38 }
0x1f4f   :  { %v3490_v19 = vpop.permute.xlu0 %3489 }
0x1f50   :  { %v3492_v58 = vmul.f32 %v5125_v10, %v3490_v19 }
0x1f52   :  { %3494 = vrot.lane.b32.xlu1 %v3492_v58, %s5177_s6 }
0x1f56   :  { %3709 = vrot.lane.b32.xlu1 %v3708_v36, %s5178_s11  ;;  %v5168_v36 = vld [vmem:[%s6475_s13] ss:$0 sm:$0xff] }
0x1fc4   :  { %v3495_v50 = vpop.permute.xlu1 %3494 }
0x1fc5   :  { %v6286_v14 = vadd.f32 %v3495_v50, %v3487_v22 }
0x1fc7   :  { %5126 = vtanh.f32 %v6286_v14 }
0x1fc8   :  { %v3710_v29 = vpop.permute.xlu1 %3709 }
0x1fca   :  { %v3671_v33 = vpop.f32.mrb[88].mxu0 }
0x1fcb   :  { %v3672_v7 = vadd.f32 %v3671_v33, %v3632_v1  ;;  %v4892_v6 = vpop.f32.mrb[89].mxu0  ;;  %v4566_v1 = vld [vmem:[%s6477_s1 + $0xe] sm:$0x3] }
0x1fcc   :  { %v3674_v43 = vpop.f32.mrb[90].mxu0 }
0x1fcd   :  { %v3677_v11 = vadd.f32 %v3672_v7, %v6241_v3  ;;  %v4893_v2 = vpop.f32.mrb[91].mxu0 }
0x1fce   :  { %v5169_v2 = vld [vmem:[%s6508_s5 + $0x20] ss:$8 sps:$4 sm:$0xff]  }
0x1fcf   :  { %5128 = vtanh.f32 %v3677_v11  ;;  %v4564_v38 = vmul.f32 -1.442695, %v3677_v11 }
0x1fd1   :  { %v5127_v13 = vpop.eup %5126  ;;  %5130 = vpow2.f32 %v4564_v38 }
0x1fd2   :  { %3500 = vrot.lane.b32.xlu0 %v5127_v13, %s5176_s7  ;;  %v5170_v13 = vld [vmem:[%s6508_s5 + $0x34] ss:$8 sps:$4 sm:$0xff]  }
0x1fd9   :  { %v5129_v18 = vpop.eup %5128 }
0x1fda   :  { %3687 = vrot.lane.b32.xlu1 %v5129_v18, %s5176_s7  ;;  %v5171_v18 = vld [vmem:[%s6508_s5 + $0x30] ss:$8 sps:$4 sm:$0xff]  }
0x1fdb   :  { %v5131_v8 = vpop.eup %5130 }
0x1fdc   :  { %v3681_v24 = vadd.f32 1.0, %v5131_v8 }
0x1fde   :  { %5132 = vrcp.f32 %v3681_v24 }
0x1fe8   :  { %v5133_v3 = vpop.eup %5132 }
0x1fe9   :  { %v3685_v5 = vmul.f32 %v5133_v3, %v6197_v12  ;;  %v4565_v12 = vld [vmem:[%s6476_s0 + $0xe] sm:$0x3] }
0x2044   :  { %v3501_v54 = vpop.permute.xlu0 %3500 }
0x2045   :  { %v3503_v59 = vmul.f32 %v5125_v10, %v3501_v54 }
0x2047   :  { %v3712_v0 = vmul.f32 %v3710_v29, %v3503_v59 }
0x2049   :  { %v3713_v44 = vpack.c.bf16 %v3712_v0, %v3712_v0 }
0x204b   :  { %3715 = vrot.lane.b32.xlu0 %v3713_v44, %s5177_s6 }
0x204c   :  { %v3688_v49 = vpop.permute.xlu1 %3687 }
0x204d   :  { %v3690_v42 = vmul.f32 %v5133_v3, %v3688_v49 }
0x204f   :  { %3692 = vrot.lane.b32.xlu0 %v3690_v42, %s5177_s6 }
0x2053   :  { %3907 = vrot.lane.b32.xlu0 %v3906_v47, %s5178_s11 }
0x20bd   :  { %v3716_v61 = vpop.permute.xlu0 %3715 }
0x20be   :  { %4568 = vmatmul.mubr.msk.bf16.vlgmr.msra.gmra.mrb[88].mxu1 %vm944_vm1, %v3716_v61 }
0x20bf   :  { %4901 = vmatpush3.bf16.msra.mxu1 %v5526_v55  ;;  %4902 = vmatprep.mubr.msk.bf16.mxu1 %vm5175_vm3, %v5174_v21 }
0x20c0   :  { %4906 = vmatprep.subr.bf16.mxu1 %v5174_v21 }
0x20c1   :  { %v3693_v63 = vpop.permute.xlu0 %3692 }
0x20c2   :  { %v6303_v28 = vadd.f32 %v3693_v63, %v3685_v5 }
0x20c4   :  { %5134 = vtanh.f32 %v6303_v28 }
0x20c5   :  { %v3908_v57 = vpop.permute.xlu0 %3907 }
0x20ce   :  { %v5135_v26 = vpop.eup %5134 }
0x20cf   :  { %3698 = vrot.lane.b32.xlu1 %v5135_v26, %s5176_s7 }
0x2141   :  { %v3699_v15 = vpop.permute.xlu1 %3698 }
0x2142   :  { %v3701_v51 = vmul.f32 %v5133_v3, %v3699_v15 }
0x2144   :  { %v3910_v10 = vmul.f32 %v3908_v57, %v3701_v51 }
0x2146   :  { %v3911_v55 = vpack.c.bf16 %v3910_v10, %v3910_v10 }
0x2148   :  { %3913 = vrot.lane.b32.xlu1 %v3911_v55, %s5177_s6 }
0x2191   :  { %v6308_v19 = vpop.f32.mrb[88].mxu1 }
0x2192   :  { %v3756_v58 = vpop.f32.mrb[89].mxu1 }
0x2193   :  { %v3761_v22 = vadd.f32 %v5168_v36, %v3756_v58  ;;  %v3758_v50 = vpop.f32.mrb[90].mxu1  ;;  %v5172_v36 = vld [vmem:[%s6475_s13 + $0x1] ss:$0 sm:$0xff] }
0x2194   :  { %v3759_v33 = vpop.f32.mrb[91].mxu1 }
0x2195   :  { %v3762_v7 = vsub.f32 %v4565_v12, %v3761_v22 }
0x2197   :  { %v3763_v6 = vmul.f32 %v4566_v1, %v3762_v7  ;;  %v3818_v3 = vand.u32 2147483647, %v3762_v7 }
0x2199   :  { %v3764_v43 = vadd.f32 %v3763_v6, %v3761_v22 }
0x219b   :  { %v3765_v11 = vpack.c.bf16 %v3764_v43, %v3764_v43  ;;  %v3830_v43 = vrot.slane %v5433_v62, 6 }
0x219d   :  { %4897 = vmatmul.mubr.msk.bf16.vlgmr.msra.gmra.mrb[92].mxu0 %vm84_vm0, %v3765_v11 }
0x219e   :  { %3919 = vmatpush1.bf16.msra.mxu0 %v5169_v2  ;;  %3950 = vmatprep.mubr.bf16.mxu0 %v5173_v32 }
0x219f   :  { %3920 = vmatprep.subr.bf16.mxu0 %v5170_v13 }
0x21a2   :  { %3921 = vmatpush1.bf16.msra.mxu0 %v5171_v18 }
0x21a3   :  { %4912 = vmatprep.subr.bf16.mxu0 %v5174_v21 }
0x21ba   :  { %v3914_v38 = vpop.permute.xlu1 %3913 }
0x21bb   :  { %4575 = vmatmul.mubr.msk.bf16.vlgmr.msra.gmra.mrb[96].mxu0 %vm944_vm1, %v3914_v38 }
0x21bc   :  { %4913 = vmatpush3.bf16.msra.mxu0 %v5578_v53  ;;  %4914 = vmatprep.mubr.msk.bf16.mxu0 %vm5175_vm3, %v5174_v21 }
0x2270   :  { %v3803_v32 = vpop.f32.mrb[92].mxu0 }
0x2271   :  { %v3804_v8 = vadd.f32 %v6014_v37, %v3803_v32  ;;  %v4898_v24 = vpop.f32.mrb[93].mxu0  ;;  %v4567_v37 = vld [vmem:[%s6480_s2 + $0xe] sm:$0x3] }
0x2272   :  { %v3806_v54 = vpop.f32.mrb[94].mxu0 }
0x2273   :  { %v3809_v59 = vsub.f32 %v3804_v8, %v3761_v22  ;;  %v3819_v29 = vsub.f32 %v4565_v12, %v3804_v8  ;;  %v4899_v0 = vpop.f32.mrb[95].mxu0 }
0x2275   :  { %v3811_v44 = vrot.slane %v3809_v59, 2  ;;  %v3820_v49 = vand.u32 2147483647, %v3819_v29 }
0x2277   :  { %v3813_v42 = vmul.f32 %v6017_v56, %v3811_v44  ;;  %v3821_v47 = vadd.f32 %v3820_v49, %v3818_v3 }
0x2279   :  { %v3815_v61 = vrot.slane %v3813_v42, 6 }
0x227b   :  { %v3817_v5 = vadd.f32 %v3815_v61, %v3761_v22 }
0x227d   :  { %v3822_v53 = vsub.f32 %v4565_v12, %v3817_v5  ;;  %v4572_v12 = vld [vmem:[%s6476_s0 + $0x1e] sm:$0x3]  ;;  %s5188_s0 = smov 72  }
0x227f   :  { %v3827_v63 = vmul.f32 %v4566_v1, %v3822_v53  ;;  %v3823_v26 = vand.u32 2147483647, %v3822_v53 }
0x2281   :  { %v6340_v15 = vadd.f32 %v3827_v63, %v3817_v5  ;;  %v3824_v51 = vadd.f32 %v3823_v26, %v3821_v47 }
0x2283   :  { %v3829_v57 = vpack.c.bf16 %v6340_v15, %v6340_v15  ;;  %v3825_v10 = vmul.f32 %v4567_v37, %v3824_v51 }
0x2285   :  { %4903 = vmatmul.mubr.msk.bf16.vlgmr.msra.gmra.mrb[92].mxu1 %vm84_vm0, %v3829_v57  ;;  %v6346_v56 = vadd.f32 %v3825_v10, %v6233_v17 }
0x2286   :  { %4907 = vmatpush3.bf16.msra.mxu1 %v5561_v39  ;;  %4908 = vmatprep.mubr.msk.bf16.mxu1 %vm5175_vm3, %v5174_v21  ;;  %v4573_v39 = vld [vmem:[%s6477_s1 + $0x1e] sm:$0x3]  ;;  %s5190_s1 = smov 104  }
0x228e   :  { %v6351_v55 = vpop.f32.mrb[96].mxu0 }
0x228f   :  { %v3954_v58 = vpop.f32.mrb[97].mxu0 }
0x2290   :  { %v3959_v22 = vadd.f32 %v5172_v36, %v3954_v58  ;;  %v3956_v50 = vpop.f32.mrb[98].mxu0 }
0x2291   :  { %v3957_v17 = vpop.f32.mrb[99].mxu0 }
0x2292   :  { %v3960_v1 = vsub.f32 %v4572_v12, %v3959_v22 }
0x2294   :  { %v3961_v33 = vmul.f32 %v4573_v39, %v3960_v1  ;;  %v4016_v49 = vand.u32 2147483647, %v3960_v1 }
0x2296   :  { %v3962_v7 = vadd.f32 %v3961_v33, %v3959_v22 }
0x2298   :  { %v3963_v6 = vpack.c.bf16 %v3962_v7, %v3962_v7 }
0x229a   :  { %4909 = vmatmul.mubr.msk.bf16.vlgmr.msra.gmra.mrb[96].mxu1 %vm84_vm0, %v3963_v6 }
0x229b   :  { %4926 = vmatprep.mubr.msk.f32.mxu1 %vm5175_vm3, %v5174_v21 }
0x2358   :  { %v3869_v11 = vpop.f32.mrb[92].mxu1 }
0x2359   :  { %v3870_v2 = vadd.f32 %v3869_v11, %v3830_v43  ;;  %v4904_v13 = vpop.f32.mrb[93].mxu1 }
0x235a   :  { %v3872_v18 = vpop.f32.mrb[94].mxu1 }
0x235b   :  { %v3875_v38 = vadd.f32 %v3870_v2, %v6308_v19  ;;  %v4905_v32 = vpop.f32.mrb[95].mxu1 }
0x235d   :  { %5136 = vtanh.f32 %v3875_v38 }
0x2367   :  { %v5137_v8 = vpop.eup %5136 }
0x2368   :  { %3885 = vrot.lane.b32.xlu1 %v5137_v8, %s5176_s7  ;;  %v4190_v8 = vld [vmem:[%s6481_s19 + $0x18] sm:$0xff] }
0x236d   :  { %v4001_v24 = vpop.f32.mrb[96].mxu1 }
0x236e   :  { %v4002_v54 = vadd.f32 %v6057_v34, %v4001_v24  ;;  %v4910_v59 = vpop.f32.mrb[97].mxu1  ;;  %v4574_v34 = vld [vmem:[%s6480_s2 + $0x1e] sm:$0x3]  ;;  %s5191_s2 = smov 120  }
0x236f   :  { %v4004_v29 = vpop.f32.mrb[98].mxu1 }
0x2370   :  { %v4007_v0 = vsub.f32 %v4002_v54, %v3959_v22  ;;  %v4017_v44 = vsub.f32 %v4572_v12, %v4002_v54  ;;  %v4911_v3 = vpop.f32.mrb[99].mxu1 }
0x2372   :  { %v4009_v62 = vrot.slane %v4007_v0, 2  ;;  %v4018_v42 = vand.u32 2147483647, %v4017_v44 }
0x2374   :  { %v4011_v47 = vmul.f32 %v6060_v45, %v4009_v62  ;;  %v4019_v61 = vadd.f32 %v4018_v42, %v4016_v49 }
0x2376   :  { %v4013_v19 = vrot.slane %v4011_v47, 6 }
0x2378   :  { %v4015_v5 = vadd.f32 %v4013_v19, %v3959_v22 }
0x237a   :  { %v4020_v53 = vsub.f32 %v4572_v12, %v4015_v5  ;;  %v4571_v12 = vmul.f32 -1.442695, %v3875_v38  ;;  %v4188_v38 = vld [vmem:[%s6481_s19 + $0x8] sm:$0xff] }
0x237c   :  { %v4025_v63 = vmul.f32 %v4573_v39, %v4020_v53  ;;  %v4021_v26 = vand.u32 2147483647, %v4020_v53  ;;  %5138 = vpow2.f32 %v4571_v12 }
0x237e   :  { %v6373_v37 = vadd.f32 %v4025_v63, %v4015_v5  ;;  %v4022_v51 = vadd.f32 %v4021_v26, %v4019_v61  ;;  %v4274_v63 = vsel %vm4273_vm4, %v6346_v56, 0.0 }
0x2380   :  { %v4027_v57 = vpack.c.bf16 %v6373_v37, %v6373_v37  ;;  %v4023_v10 = vmul.f32 %v4574_v34, %v4022_v51 }
0x2382   :  { %4915 = vmatmul.mubr.msk.bf16.vlgmr.msra.gmra.mrb[100].mxu0 %vm84_vm0, %v4027_v57  ;;  %v4024_v45 = vadd.f32 %v4023_v10, %v6276_v46  ;;  %v4028_v46 = vrot.slane %v5445_v9, 6  ;;  %v4187_v9 = vld [vmem:[%s6481_s19] sm:$0xff] }
0x2383   :  { %4937 = vmatprep.mubr.msk.f32.mxu0 %vm5175_vm3, %v5174_v21  ;;  %v4941_v32 = vpack.c.bf16 %v4188_v38, %v4187_v9  ;;  %vm4393_vm3 = vcmask 8192  }
0x2384   :  { %v4373_v42 = vsel %vm4273_vm4, %v4024_v45, 0.0  ;;  %vm4390_vm4 = vcmask 9216  }
0x2386   :  { %v5139_v58 = vpop.eup %5138 }
0x2387   :  { %v3879_v36 = vadd.f32 1.0, %v5139_v58 }
0x2389   :  { %5140 = vrcp.f32 %v3879_v36 }
0x2393   :  { %v5141_v22 = vpop.eup %5140 }
0x2394   :  { %v3883_v17 = vmul.f32 %v5141_v22, %v6286_v14  ;;  %v5179_v14 = vmov 0.0|0.0  }
0x2395   :  { %4940 = vmatprep.subr.bf16.mxu1 %v5179_v14  ;;  %4946 = vmatprep.subr.bf16.mxu0 %v5179_v14 }
0x2396   :  { %4942 = vmatpush3.bf16.msra.mxu1 %v4941_v32 }
0x2397   :  { %4943 = vmatprep.subr.bf16.mxu1 %v5179_v14 }
0x23da   :  { %v3886_v50 = vpop.permute.xlu1 %3885 }
0x23db   :  { %v3888_v39 = vmul.f32 %v5141_v22, %v3886_v50 }
0x23dd   :  { %3890 = vrot.lane.b32.xlu1 %v3888_v39, %s5177_s6 }
0x244f   :  { %v3891_v1 = vpop.permute.xlu1 %3890 }
0x2450   :  { %v3893_v33 = vadd.f32 %v3891_v1, %v3883_v17 }
0x2452   :  { %5142 = vtanh.f32 %v3893_v33 }
0x2455   :  { %v4067_v7 = vpop.f32.mrb[100].mxu0 }
0x2456   :  { %v4068_v6 = vadd.f32 %v4067_v7, %v4028_v46  ;;  %v4916_v21 = vpop.f32.mrb[101].mxu0 }
0x2457   :  { %v4070_v43 = vpop.f32.mrb[102].mxu0 }
0x2458   :  { %v4073_v11 = vadd.f32 %v4068_v6, %v6351_v55  ;;  %v4917_v2 = vpop.f32.mrb[103].mxu0  ;;  %v4189_v55 = vld [vmem:[%s6481_s19 + $0x10] sm:$0xff] }
0x2459   :  { %v4944_v24 = vpack.c.bf16 %v4190_v8, %v4189_v55 }
0x245a   :  { %5144 = vtanh.f32 %v4073_v11  ;;  %v4578_v54 = vmul.f32 -1.442695, %v4073_v11 }
0x245b   :  { %4945 = vmatpush3.bf16.msra.mxu1 %v4944_v24 }
0x245c   :  { %v5143_v13 = vpop.eup %5142  ;;  %5146 = vpow2.f32 %v4578_v54 }
0x245d   :  { %3896 = vrot.lane.b32.xlu1 %v5143_v13, %s5176_s7 }
0x2464   :  { %v5145_v18 = vpop.eup %5144 }
0x2465   :  { %4083 = vrot.lane.b32.xlu0 %v5145_v18, %s5176_s7 }
0x2466   :  { %v5147_v59 = vpop.eup %5146 }
0x2467   :  { %v4077_v29 = vadd.f32 1.0, %v5147_v59 }
0x2469   :  { %5148 = vrcp.f32 %v4077_v29 }
0x2473   :  { %v5149_v3 = vpop.eup %5148 }
0x24cf   :  { %v3897_v0 = vpop.permute.xlu1 %3896 }
0x24d0   :  { %v3899_v44 = vmul.f32 %v5141_v22, %v3897_v0 }
0x24d2   :  { %4199 = vrot.lane.b32.xlu1 %v3899_v44, %s5177_s6 }
0x24d7   :  { %v4084_v62 = vpop.permute.xlu0 %4083 }
0x24d8   :  { %v4086_v49 = vmul.f32 %v5149_v3, %v4084_v62 }
0x24da   :  { %4088 = vrot.lane.b32.xlu0 %v4086_v49, %s5177_s6 }
0x24f6   :  { %4374 = vadd.xlane.f32.xlu1 %v4373_v42 }
0x2507   :  { %4103 = vrot.lane.b32.xlu1 %v5763_v4, %s5180_s9  ;;  %v4081_v4 = vmul.f32 %v5149_v3, %v6303_v28  ;;  %v4584_v28 = vld [vmem:[%s6481_s19 + $0x38] sm:$0xff] }
0x250b   :  { %4111 = vrot.lane.b32.xlu1 %v6023_v20, %s5177_s6 }
0x250f   :  { %4119 = vrot.lane.b32.xlu1 %v6227_v48, %s5181_s30 }
0x2513   :  { %4127 = vrot.lane.b32.xlu1 %v5601_v52, %s5176_s7  ;;  %v4581_v52 = vld [vmem:[%s6481_s19 + $0x20] sm:$0xff] }
0x2517   :  { %4135 = vrot.lane.b32.xlu1 %v5818_v23, %s5182_s25  ;;  %v4582_v23 = vld [vmem:[%s6481_s19 + $0x28] sm:$0xff] }
0x251b   :  { %4143 = vrot.lane.b32.xlu1 %v6066_v16, %s5178_s11  ;;  %v4583_v16 = vld [vmem:[%s6481_s19 + $0x30] sm:$0xff]  ;;  %s5187_s19 = smov 56  }
0x251c   :  { %v4950_v19 = vpack.c.bf16 %v4584_v28, %v4583_v16 }
0x251f   :  { %4151 = vrot.lane.b32.xlu1 %v6270_v31, %s5183_s14  ;;  %v4947_v31 = vpack.c.bf16 %v4582_v23, %v4581_v52 }
0x2521   :  { %4948 = vmatpush3.bf16.msra.mxu0 %v4947_v31 }
0x2522   :  { %4949 = vmatprep.subr.bf16.mxu0 %v5179_v14 }
0x2525   :  { %4951 = vmatpush3.bf16.msra.mxu0 %v4950_v19 }
0x2544   :  { %v4200_v47 = vpop.permute.xlu1 %4199 }
0x2545   :  { %4927 = vmatmul.mubr.msk.f32.vlgmr.msra.gmra.mrb[100].mxu1 %vm944_vm1, %v4200_v47  ;;  %v4586_v47 = vld [vmem:[%s6484_s20 + $0x1] ss:$0 sm:$0xff] }
0x254c   :  { %v4089_v20 = vpop.permute.xlu0 %4088 }
0x254d   :  { %v4091_v61 = vadd.f32 %v4089_v20, %v4081_v4 }
0x254f   :  { %5150 = vtanh.f32 %v4091_v61 }
0x2559   :  { %v5151_v48 = vpop.eup %5150 }
0x255a   :  { %4094 = vrot.lane.b32.xlu0 %v5151_v48, %s5176_s7  ;;  %s5184_s7 = smov 8   ;;  %v4579_v48 = vld [vmem:[%s6484_s20] ss:$0 sm:$0xff] }
0x25cc   :  { %v4095_v5 = vpop.permute.xlu0 %4094 }
0x25cd   :  { %v4097_v53 = vmul.f32 %v5149_v3, %v4095_v5 }
0x25cf   :  { %4299 = vrot.lane.b32.xlu0 %v4097_v53, %s5177_s6  ;;  %s5189_s6 = smov 88  }
0x25ee   :  { %4275 = vadd.xlane.f32.xlu0 %v4274_v63 }
0x2604   :  { %4099 = vrot.lane.b32.xlu0 %v5662_v25, %s5184_s7 }
0x2608   :  { %4107 = vrot.lane.b32.xlu0 %v5901_v30, %s5185_s18  ;;  %v4375_v30 = vpop.xlane.xlu1 %4374 }
0x260c   :  { %4115 = vrot.lane.b32.xlu0 %v6129_v27, %s5186_s28  ;;  %v4376_v27 = vrot.slane %v4375_v30, 4 }
0x260e   :  { %v4377_v34 = vadd.f32 %v4376_v27, %v4375_v30 }
0x2610   :  { %4123 = vrot.lane.b32.xlu0 %v6340_v15, %s5187_s19  ;;  %v4104_v15 = vpop.permute.xlu1 %4103 }
0x2614   :  { %4131 = vrot.lane.b32.xlu0 %v5700_v35, %s5188_s0  ;;  %v4378_v35 = vrot.slane %v4377_v34, 2  ;;  %v4112_v57 = vpop.permute.xlu1 %4111 }
0x2616   :  { %v4379_v12 = vadd.f32 %v4378_v35, %v4377_v34 }
0x2618   :  { %4139 = vrot.lane.b32.xlu0 %v5941_v60, %s5189_s6  ;;  %v6436_v56 = vpop.f32.mrb[100].mxu1  ;;  %v4380_v39 = vrot.slane %v4379_v12, 1 }
0x2619   :  { %v4928_v26 = vpop.f32.mrb[101].mxu1  ;;  %v4270_v52 = vadd.f32 %v4579_v48, %v6436_v56 }
0x261a   :  { %v4381_v6 = vadd.f32 %v4380_v39, %v4379_v12 }
0x261c   :  { %4147 = vrot.lane.b32.xlu0 %v6164_v40, %s5190_s1 }
0x2620   :  { %4155 = vrot.lane.b32.xlu0 %v6373_v37, %s5191_s2  ;;  %v4120_v37 = vpop.permute.xlu1 %4119 }
0x2624   :  { %v4128_v21 = vpop.permute.xlu1 %4127 }
0x2628   :  { %v4136_v13 = vpop.permute.xlu1 %4135 }
0x262c   :  { %v4144_v32 = vpop.permute.xlu1 %4143 }
0x2630   :  { %v4152_v29 = vpop.permute.xlu1 %4151 }
0x2641   :  { %v4300_v25 = vpop.permute.xlu0 %4299 }
0x2642   :  { %4938 = vmatmul.mubr.msk.f32.vlgmr.msra.gmra.mrb[104].mxu0 %vm944_vm1, %v4300_v25 }
0x267b   :  { %v4276_v51 = vpop.xlane.xlu0 %4275 }
0x267c   :  { %v4277_v60 = vrot.slane %v4276_v51, 4 }
0x267e   :  { %v4278_v10 = vadd.f32 %v4277_v60, %v4276_v51 }
0x267f   :  { %v4100_v45 = vpop.permute.xlu0 %4099 }
0x2680   :  { %v4279_v58 = vrot.slane %v4278_v10, 2  ;;  %v4158_v40 = vsel %vm84_vm0, %v5556_v41, %v4100_v45  ;;  %vm4182_vm0 = vcmask 916480  }
0x2681   :  { %v4160_v50 = vsel %vm4159_vm5, %v4158_v40, %v4104_v15 }
0x2682   :  { %v4280_v36 = vadd.f32 %v4279_v58, %v4278_v10 }
0x2683   :  { %v4108_v22 = vpop.permute.xlu0 %4107 }
0x2684   :  { %v4162_v17 = vsel %vm4161_vm6, %v4160_v50, %v4108_v22  ;;  %v4281_v1 = vrot.slane %v4280_v36, 1 }
0x2685   :  { %v4163_v7 = vsel %vm944_vm1, %v4162_v17, %v4112_v57  ;;  %vm4184_vm1 = vcmask 982016  }
0x2686   :  { %v4282_v33 = vadd.f32 %v4281_v1, %v4280_v36 }
0x2687   :  { %v4116_v46 = vpop.permute.xlu0 %4115 }
0x2688   :  { %v4165_v43 = vsel %vm4164_vm7, %v4163_v7, %v4116_v46  ;;  %4956 = vpush %v4282_v33 }
0x2689   :  { %4958 = vpush %v4381_v6  ;;  %v4167_v11 = vsel %vm4166_vm8, %v4165_v43, %v4120_v37 }
0x268b   :  { %v4124_v41 = vpop.permute.xlu0 %4123 }
0x268c   :  { %v4169_v2 = vsel %vm4168_vm9, %v4167_v11, %v4124_v41 }
0x268d   :  { %v4171_v14 = vsel %vm4170_vm10, %v4169_v2, %v4128_v21 }
0x268f   :  { %v4132_v18 = vpop.permute.xlu0 %4131 }
0x2690   :  { %v4173_v9 = vsel %vm4172_vm11, %v4171_v14, %v4132_v18 }
0x2691   :  { %v4175_v55 = vsel %vm4174_vm12, %v4173_v9, %v4136_v13 }
0x2693   :  { %v4140_v38 = vpop.permute.xlu0 %4139 }
0x2694   :  { %v4177_v8 = vsel %vm4176_vm13, %v4175_v55, %v4140_v38 }
0x2695   :  { %v4179_v54 = vsel %vm4178_vm14, %v4177_v8, %v4144_v32 }
0x2697   :  { %v4148_v24 = vpop.permute.xlu0 %4147 }
0x2698   :  { %v4181_v59 = vsel %vm4180_vm15, %v4179_v54, %v4148_v24 }
0x2699   :  { %v4183_v44 = vsel %vm4182_vm0, %v4181_v59, %v4152_v29 }
0x269b   :  { %v4156_v0 = vpop.permute.xlu0 %4155 }
0x269c   :  { %v4185_v3 = vsel %vm4184_vm1, %v4183_v44, %v4156_v0 }
0x269d   :  { %4186 = vst [vmem:[%s6482_s21] sm:$0x3] %v4185_v3  ;;  %s5192_s21 = smov 1  }
0x26b9   :  { %s4957_s15 = spop %4956 }
0x26ba   :  { %v4284_v62 = vstv %s4957_s15  ;;  %s4959_s29 = spop %4958 }
0x26bb   :  { %v4383_v49 = vstv %s4959_s29 }
0x26bc   :  { %v4392_v42 = vsel %vm4388_vm2, %v4284_v62, %v4383_v49 }
0x26bd   :  { %4394 = vst.msk [vmem:[%s6483_s23] sm:$0x1] %vm4393_vm3, %v4392_v42 }
0x2715   :  { %v4369_v4 = vpop.f32.mrb[104].mxu0 }
0x2716   :  { %v4370_v20 = vadd.f32 %v4586_v47, %v4369_v4  ;;  %v4939_v61 = vpop.f32.mrb[105].mxu0 }
0x2718   :  { %4385 = vrot.lane.b32.xlu1 %v4370_v20, %s5192_s21 }
0x278a   :  { %v4386_v23 = vpop.permute.xlu1 %4385 }
0x278b   :  { %v4389_v16 = vsel %vm4388_vm2, %v4270_v52, %v4386_v23 }
0x278c   :  { %4391 = vst.msk [vmem:[%s6485_s22] sm:$0x3] %vm4390_vm4, %v4389_v16 }

</bundles_post_ra>
